<compile_context>
chip_gen: v6e
topology: v6e:2x2x1
jax: 0.10.0
libtpu: 0.0.40
codegen_flags: <defaults>
</compile_context>

<pallas_src>
import jax
import jax.numpy as jnp
from jax.experimental import pallas as pl
from jax.experimental.pallas import tpu as pltpu

KH = KW = 3
PAD = 2


def conv_tanh_kernel(x_ref, w_ref, b_ref, o_ref, xpad_ref, patch_ref):
    # x_ref:     (B, Cin, H, W)            raw input block (channels-first)
    # w_ref:     (Cout, KH*KW*Cin)         fused im2col weight (resident)
    # b_ref:     (Cout, 1)                 bias splat (resident)
    # o_ref:     (B, Cout, Hout*Wout)      lane-dense output block
    # xpad_ref:  VMEM (B, Cin, H+2P, W+2P) zero-padded input scratch
    # patch_ref: VMEM (B, 27, Hout*Wout)   im2col operand scratch
    bblk, cin, h, w = x_ref.shape
    hp, wp = h + 2 * PAD, w + 2 * PAD
    hout, wout = hp - KH + 1, wp - KW + 1
    hw = hout * wout

    x = x_ref[...]                                   # (B, Cin, H, W)
    dt = x.dtype

    # ---- in-kernel zero padding via scratch (no lane-axis concats) ----
    zrow = jnp.zeros((bblk, cin, PAD, wp), dt)
    zcol = jnp.zeros((bblk, cin, hp, PAD), dt)
    xpad_ref[:, :, :PAD, :] = zrow                   # top border
    xpad_ref[:, :, PAD + h:, :] = zrow               # bottom border
    xpad_ref[:, :, :, :PAD] = zcol                   # left border (incl. corners)
    xpad_ref[:, :, :, PAD + w:] = zcol               # right border (incl. corners)
    xpad_ref[:, :, PAD:PAD + h, PAD:PAD + w] = x     # interior, single store

    # ---- im2col: write each of the 9 taps straight into the patches scratch ----
    # Row order: k = (kh*KW + kw)*Cin + c  (matches wrapper's weight reshape).
    for kh in range(KH):
        for kw in range(KW):
            t = kh * KW + kw
            tap = xpad_ref[:, :, kh:kh + hout, kw:kw + wout]   # (B, Cin, Hout, Wout)
            patch_ref[:, t * cin:(t + 1) * cin, :] = tap.reshape(bblk, cin, hw)

    # ---- one fused K=27 MXU matmul per image; output stays (B, Cout, HW) ----
    w2 = w_ref[...]                                  # (Cout, 27), loaded once
    bias = b_ref[...]                                # (Cout, 1)
    for b in range(bblk):                            # bblk <= 8, static unroll
        acc = jnp.dot(w2, patch_ref[b],
                      preferred_element_type=jnp.float32)      # (Cout, HW)
        o_ref[b] = jnp.tanh(acc + bias).astype(o_ref.dtype)


def _pick_batch_block(n, cap=8):
    """Largest divisor of n that is <= cap (keeps VMEM footprint bounded)."""
    b = min(n, cap)
    while n % b:
        b -= 1
    return b


@jax.jit
def conv2d_tanh(x_nchw, w_oihw, bias):
    """Conv2d(3->16, 3x3, stride=1, padding=2) + tanh, PyTorch semantics."""
    n, cin, h, w = x_nchw.shape
    cout = w_oihw.shape[0]
    hout = h + 2 * PAD - KH + 1
    wout = w + 2 * PAD - KW + 1
    hw = hout * wout
    k27 = KH * KW * cin
    bblk = _pick_batch_block(n)

    # (O, I, KH, KW) -> (O, KH, KW, I) -> (O, 27); matches kernel tap order
    # index = (kh*KW + kw)*Cin + c.  Tiny one-time op.
    w2d = jnp.transpose(w_oihw, (0, 2, 3, 1)).reshape(cout, k27)
    b2 = bias.reshape(cout, 1)

    out2d = pl.pallas_call(
        conv_tanh_kernel,
        out_shape=jax.ShapeDtypeStruct((n, cout, hw), jnp.float32),
        grid_spec=pltpu.PrefetchScalarGridSpec(
            num_scalar_prefetch=0,
            grid=(pl.cdiv(n, bblk),),
            in_specs=[
                pl.BlockSpec((bblk, cin, h, w), lambda b: (b, 0, 0, 0)),
                pl.BlockSpec((cout, k27), lambda b: (0, 0)),
                pl.BlockSpec((cout, 1), lambda b: (0, 0)),
            ],
            out_specs=pl.BlockSpec((bblk, cout, hw), lambda b: (b, 0, 0)),
            scratch_shapes=[
                pltpu.VMEM((bblk, cin, h + 2 * PAD, w + 2 * PAD), x_nchw.dtype),
                pltpu.VMEM((bblk, k27, hw), x_nchw.dtype),
            ],
        ),
        compiler_params=pltpu.CompilerParams(
            dimension_semantics=("parallel",)),
    )(x_nchw, w2d, b2)

    # (N, Cout, HW) -> (N, Cout, Hout, Wout): already NCHW, metadata-only reshape.
    return out2d.reshape(n, cout, hout, wout)


if __name__ == "__main__":
    key = jax.random.PRNGKey(0)
    k_x, k_w, k_b = jax.random.split(key, 3)

    # Small shapes consistent with the module (Conv2d(3 -> 16, 3x3, pad=2))
    N, CIN, H, W = 2, 3, 16, 16
    COUT = 16

    x = jax.random.normal(k_x, (N, CIN, H, W), dtype=jnp.float32)
    # Deterministic parameter init (PyTorch-like uniform fan-in bound)
    bound = 1.0 / (CIN * KH * KW) ** 0.5
    w = jax.random.uniform(k_w, (COUT, CIN, KH, KW), jnp.float32, -bound, bound)
    b = jax.random.uniform(k_b, (COUT,), jnp.float32, -bound, bound)

    out = jax.block_until_ready(conv2d_tanh(x, w, b))

    # Reference: XLA conv (NCHW / OIHW) + bias + tanh
    ref = jnp.tanh(
        jax.lax.conv_general_dilated(
            x, w, window_strides=(1, 1), padding=((PAD, PAD), (PAD, PAD)),
            dimension_numbers=("NCHW", "OIHW", "NCHW"))
        + b[None, :, None, None])

    assert out.shape == (N, COUT, H + 2, W + 2), out.shape
    assert jnp.allclose(out, ref, atol=1e-5, rtol=1e-5), float(jnp.max(jnp.abs(out - ref)))
    print("KERNEL_OK")
</pallas_src>

<mosaic_0001>
module attributes {stable_mosaic.version = 11 : i64} {
  func.func @conv_tanh_kernel(%arg0: i32, %arg1: memref<2x3x16x16xf32, #tpu.memory_space<vmem>>, %arg2: memref<16x27xf32, #tpu.memory_space<vmem>>, %arg3: memref<16x1xf32, #tpu.memory_space<vmem>>, %arg4: memref<2x16x324xf32, #tpu.memory_space<vmem>>, %arg5: memref<2x3x20x20xf32, #tpu.memory_space<vmem>>, %arg6: memref<2x27x324xf32, #tpu.memory_space<vmem>>) attributes {dimension_semantics = [#tpu.dimension_semantics<parallel>], iteration_bounds = array<i64: 1>, scalar_prefetch = 0 : i64, scratch_operands = 2 : i64, tpu.core_type = #tpu.core_type<tc>, window_params = [{transform_indices = @transform_0, window_bounds = array<i64: 2, 3, 16, 16>}, {pipeline_mode = #tpu.pipeline_mode<synchronous>, transform_indices = @transform_1, window_bounds = array<i64: 16, 27>}, {pipeline_mode = #tpu.pipeline_mode<synchronous>, transform_indices = @transform_2, window_bounds = array<i64: 16, 1>}, {transform_indices = @transform_3, window_bounds = array<i64: 2, 16, 324>}]} {
    %c0 = arith.constant 0 : index
    %c0_0 = arith.constant 0 : index
    %c0_1 = arith.constant 0 : index
    %c0_2 = arith.constant 0 : index
    %0 = vector.load %arg1[%c0, %c0_0, %c0_1, %c0_2] : memref<2x3x16x16xf32, #tpu.memory_space<vmem>>, vector<2x3x16x16xf32>
    %cst = arith.constant 0.000000e+00 : f32
    %1 = vector.broadcast %cst : f32 to vector<2x3x2x20xf32>
    %cst_3 = arith.constant 0.000000e+00 : f32
    %2 = vector.broadcast %cst_3 : f32 to vector<2x3x20x2xf32>
    %c0_4 = arith.constant 0 : index
    %c0_5 = arith.constant 0 : index
    %c0_6 = arith.constant 0 : index
    %c0_7 = arith.constant 0 : index
    %3 = vector.load %arg5[%c0_4, %c0_5, %c0_6, %c0_7] : memref<2x3x20x20xf32, #tpu.memory_space<vmem>>, vector<2x3x2x20xf32>
    tpu.vector_store %arg5[%c0_4, %c0_5, %c0_6, %c0_7], %1 {strides = array<i32>} : memref<2x3x20x20xf32, #tpu.memory_space<vmem>>, vector<2x3x2x20xf32>,
    %c0_8 = arith.constant 0 : index
    %c0_9 = arith.constant 0 : index
    %c18 = arith.constant 18 : index
    %c0_10 = arith.constant 0 : index
    %4 = vector.load %arg5[%c0_8, %c0_9, %c18, %c0_10] : memref<2x3x20x20xf32, #tpu.memory_space<vmem>>, vector<2x3x2x20xf32>
    tpu.vector_store %arg5[%c0_8, %c0_9, %c18, %c0_10], %1 {strides = array<i32>} : memref<2x3x20x20xf32, #tpu.memory_space<vmem>>, vector<2x3x2x20xf32>,
    %c0_11 = arith.constant 0 : index
    %c0_12 = arith.constant 0 : index
    %c0_13 = arith.constant 0 : index
    %c0_14 = arith.constant 0 : index
    %5 = vector.load %arg5[%c0_11, %c0_12, %c0_13, %c0_14] : memref<2x3x20x20xf32, #tpu.memory_space<vmem>>, vector<2x3x20x2xf32>
    tpu.vector_store %arg5[%c0_11, %c0_12, %c0_13, %c0_14], %2 {strides = array<i32>} : memref<2x3x20x20xf32, #tpu.memory_space<vmem>>, vector<2x3x20x2xf32>,
    %c0_15 = arith.constant 0 : index
    %c0_16 = arith.constant 0 : index
    %c0_17 = arith.constant 0 : index
    %c18_18 = arith.constant 18 : index
    %6 = vector.load %arg5[%c0_15, %c0_16, %c0_17, %c18_18] : memref<2x3x20x20xf32, #tpu.memory_space<vmem>>, vector<2x3x20x2xf32>
    tpu.vector_store %arg5[%c0_15, %c0_16, %c0_17, %c18_18], %2 {strides = array<i32>} : memref<2x3x20x20xf32, #tpu.memory_space<vmem>>, vector<2x3x20x2xf32>,
    %c0_19 = arith.constant 0 : index
    %c0_20 = arith.constant 0 : index
    %c2 = arith.constant 2 : index
    %c2_21 = arith.constant 2 : index
    %7 = vector.load %arg5[%c0_19, %c0_20, %c2, %c2_21] : memref<2x3x20x20xf32, #tpu.memory_space<vmem>>, vector<2x3x16x16xf32>
    tpu.vector_store %arg5[%c0_19, %c0_20, %c2, %c2_21], %0 {strides = array<i32>} : memref<2x3x20x20xf32, #tpu.memory_space<vmem>>, vector<2x3x16x16xf32>,
    %c0_22 = arith.constant 0 : index
    %c0_23 = arith.constant 0 : index
    %c0_24 = arith.constant 0 : index
    %c0_25 = arith.constant 0 : index
    %8 = vector.load %arg5[%c0_22, %c0_23, %c0_24, %c0_25] : memref<2x3x20x20xf32, #tpu.memory_space<vmem>>, vector<2x3x18x18xf32>
    %9 = vector.shape_cast %8 : vector<2x3x18x18xf32> to vector<2x3x324xf32>
    %c0_26 = arith.constant 0 : index
    %c0_27 = arith.constant 0 : index
    %c0_28 = arith.constant 0 : index
    %10 = vector.load %arg6[%c0_26, %c0_27, %c0_28] : memref<2x27x324xf32, #tpu.memory_space<vmem>>, vector<2x3x324xf32>
    tpu.vector_store %arg6[%c0_26, %c0_27, %c0_28], %9 {strides = array<i32>} : memref<2x27x324xf32, #tpu.memory_space<vmem>>, vector<2x3x324xf32>,
    %c0_29 = arith.constant 0 : index
    %c0_30 = arith.constant 0 : index
    %c0_31 = arith.constant 0 : index
    %c1 = arith.constant 1 : index
    %11 = vector.load %arg5[%c0_29, %c0_30, %c0_31, %c1] : memref<2x3x20x20xf32, #tpu.memory_space<vmem>>, vector<2x3x18x18xf32>
    %12 = vector.shape_cast %11 : vector<2x3x18x18xf32> to vector<2x3x324xf32>
    %c0_32 = arith.constant 0 : index
    %c3 = arith.constant 3 : index
    %c0_33 = arith.constant 0 : index
    %13 = vector.load %arg6[%c0_32, %c3, %c0_33] : memref<2x27x324xf32, #tpu.memory_space<vmem>>, vector<2x3x324xf32>
    tpu.vector_store %arg6[%c0_32, %c3, %c0_33], %12 {strides = array<i32>} : memref<2x27x324xf32, #tpu.memory_space<vmem>>, vector<2x3x324xf32>,
    %c0_34 = arith.constant 0 : index
    %c0_35 = arith.constant 0 : index
    %c0_36 = arith.constant 0 : index
    %c2_37 = arith.constant 2 : index
    %14 = vector.load %arg5[%c0_34, %c0_35, %c0_36, %c2_37] : memref<2x3x20x20xf32, #tpu.memory_space<vmem>>, vector<2x3x18x18xf32>
    %15 = vector.shape_cast %14 : vector<2x3x18x18xf32> to vector<2x3x324xf32>
    %c0_38 = arith.constant 0 : index
    %c6 = arith.constant 6 : index
    %c0_39 = arith.constant 0 : index
    %16 = vector.load %arg6[%c0_38, %c6, %c0_39] : memref<2x27x324xf32, #tpu.memory_space<vmem>>, vector<2x3x324xf32>
    tpu.vector_store %arg6[%c0_38, %c6, %c0_39], %15 {strides = array<i32>} : memref<2x27x324xf32, #tpu.memory_space<vmem>>, vector<2x3x324xf32>,
    %c0_40 = arith.constant 0 : index
    %c0_41 = arith.constant 0 : index
    %c1_42 = arith.constant 1 : index
    %c0_43 = arith.constant 0 : index
    %17 = vector.load %arg5[%c0_40, %c0_41, %c1_42, %c0_43] : memref<2x3x20x20xf32, #tpu.memory_space<vmem>>, vector<2x3x18x18xf32>
    %18 = vector.shape_cast %17 : vector<2x3x18x18xf32> to vector<2x3x324xf32>
    %c0_44 = arith.constant 0 : index
    %c9 = arith.constant 9 : index
    %c0_45 = arith.constant 0 : index
    %19 = vector.load %arg6[%c0_44, %c9, %c0_45] : memref<2x27x324xf32, #tpu.memory_space<vmem>>, vector<2x3x324xf32>
    tpu.vector_store %arg6[%c0_44, %c9, %c0_45], %18 {strides = array<i32>} : memref<2x27x324xf32, #tpu.memory_space<vmem>>, vector<2x3x324xf32>,
    %c0_46 = arith.constant 0 : index
    %c0_47 = arith.constant 0 : index
    %c1_48 = arith.constant 1 : index
    %c1_49 = arith.constant 1 : index
    %20 = vector.load %arg5[%c0_46, %c0_47, %c1_48, %c1_49] : memref<2x3x20x20xf32, #tpu.memory_space<vmem>>, vector<2x3x18x18xf32>
    %21 = vector.shape_cast %20 : vector<2x3x18x18xf32> to vector<2x3x324xf32>
    %c0_50 = arith.constant 0 : index
    %c12 = arith.constant 12 : index
    %c0_51 = arith.constant 0 : index
    %22 = vector.load %arg6[%c0_50, %c12, %c0_51] : memref<2x27x324xf32, #tpu.memory_space<vmem>>, vector<2x3x324xf32>
    tpu.vector_store %arg6[%c0_50, %c12, %c0_51], %21 {strides = array<i32>} : memref<2x27x324xf32, #tpu.memory_space<vmem>>, vector<2x3x324xf32>,
    %c0_52 = arith.constant 0 : index
    %c0_53 = arith.constant 0 : index
    %c1_54 = arith.constant 1 : index
    %c2_55 = arith.constant 2 : index
    %23 = vector.load %arg5[%c0_52, %c0_53, %c1_54, %c2_55] : memref<2x3x20x20xf32, #tpu.memory_space<vmem>>, vector<2x3x18x18xf32>
    %24 = vector.shape_cast %23 : vector<2x3x18x18xf32> to vector<2x3x324xf32>
    %c0_56 = arith.constant 0 : index
    %c15 = arith.constant 15 : index
    %c0_57 = arith.constant 0 : index
    %25 = vector.load %arg6[%c0_56, %c15, %c0_57] : memref<2x27x324xf32, #tpu.memory_space<vmem>>, vector<2x3x324xf32>
    tpu.vector_store %arg6[%c0_56, %c15, %c0_57], %24 {strides = array<i32>} : memref<2x27x324xf32, #tpu.memory_space<vmem>>, vector<2x3x324xf32>,
    %c0_58 = arith.constant 0 : index
    %c0_59 = arith.constant 0 : index
    %c2_60 = arith.constant 2 : index
    %c0_61 = arith.constant 0 : index
    %26 = vector.load %arg5[%c0_58, %c0_59, %c2_60, %c0_61] : memref<2x3x20x20xf32, #tpu.memory_space<vmem>>, vector<2x3x18x18xf32>
    %27 = vector.shape_cast %26 : vector<2x3x18x18xf32> to vector<2x3x324xf32>
    %c0_62 = arith.constant 0 : index
    %c18_63 = arith.constant 18 : index
    %c0_64 = arith.constant 0 : index
    %28 = vector.load %arg6[%c0_62, %c18_63, %c0_64] : memref<2x27x324xf32, #tpu.memory_space<vmem>>, vector<2x3x324xf32>
    tpu.vector_store %arg6[%c0_62, %c18_63, %c0_64], %27 {strides = array<i32>} : memref<2x27x324xf32, #tpu.memory_space<vmem>>, vector<2x3x324xf32>,
    %c0_65 = arith.constant 0 : index
    %c0_66 = arith.constant 0 : index
    %c2_67 = arith.constant 2 : index
    %c1_68 = arith.constant 1 : index
    %29 = vector.load %arg5[%c0_65, %c0_66, %c2_67, %c1_68] : memref<2x3x20x20xf32, #tpu.memory_space<vmem>>, vector<2x3x18x18xf32>
    %30 = vector.shape_cast %29 : vector<2x3x18x18xf32> to vector<2x3x324xf32>
    %c0_69 = arith.constant 0 : index
    %c21 = arith.constant 21 : index
    %c0_70 = arith.constant 0 : index
    %31 = vector.load %arg6[%c0_69, %c21, %c0_70] : memref<2x27x324xf32, #tpu.memory_space<vmem>>, vector<2x3x324xf32>
    tpu.vector_store %arg6[%c0_69, %c21, %c0_70], %30 {strides = array<i32>} : memref<2x27x324xf32, #tpu.memory_space<vmem>>, vector<2x3x324xf32>,
    %c0_71 = arith.constant 0 : index
    %c0_72 = arith.constant 0 : index
    %c2_73 = arith.constant 2 : index
    %c2_74 = arith.constant 2 : index
    %32 = vector.load %arg5[%c0_71, %c0_72, %c2_73, %c2_74] : memref<2x3x20x20xf32, #tpu.memory_space<vmem>>, vector<2x3x18x18xf32>
    %33 = vector.shape_cast %32 : vector<2x3x18x18xf32> to vector<2x3x324xf32>
    %c0_75 = arith.constant 0 : index
    %c24 = arith.constant 24 : index
    %c0_76 = arith.constant 0 : index
    %34 = vector.load %arg6[%c0_75, %c24, %c0_76] : memref<2x27x324xf32, #tpu.memory_space<vmem>>, vector<2x3x324xf32>
    tpu.vector_store %arg6[%c0_75, %c24, %c0_76], %33 {strides = array<i32>} : memref<2x27x324xf32, #tpu.memory_space<vmem>>, vector<2x3x324xf32>,
    %c0_77 = arith.constant 0 : index
    %c0_78 = arith.constant 0 : index
    %35 = vector.load %arg2[%c0_77, %c0_78] : memref<16x27xf32, #tpu.memory_space<vmem>>, vector<16x27xf32>
    %c0_79 = arith.constant 0 : index
    %c0_80 = arith.constant 0 : index
    %36 = vector.load %arg3[%c0_79, %c0_80] : memref<16x1xf32, #tpu.memory_space<vmem>>, vector<16x1xf32>
    %c0_81 = arith.constant 0 : index
    %c0_82 = arith.constant 0 : index
    %c0_83 = arith.constant 0 : index
    %37 = vector.load %arg6[%c0_81, %c0_82, %c0_83] : memref<2x27x324xf32, #tpu.memory_space<vmem>>, vector<1x27x324xf32>
    %38 = vector.shape_cast %37 : vector<1x27x324xf32> to vector<27x324xf32>
    %cst_84 = arith.constant dense<0.000000e+00> : vector<16x324xf32>
    %39 = tpu.matmul %35, %38, %cst_84 {dimension_numbers = #tpu.dot_dimension_numbers<[1], [0], [0], [1], [0, 0, 1, 1], [], []>} : vector<16x27xf32>, vector<27x324xf32>, vector<16x324xf32> -> vector<16x324xf32>
    %40 = vector.broadcast %36 : vector<16x1xf32> to vector<16x324xf32>
    %41 = arith.addf %39, %40 : vector<16x324xf32>
    %42 = math.tanh %41 : vector<16x324xf32>
    %c0_85 = arith.constant 0 : index
    %c0_86 = arith.constant 0 : index
    %c0_87 = arith.constant 0 : index
    %43 = vector.load %arg4[%c0_85, %c0_86, %c0_87] : memref<2x16x324xf32, #tpu.memory_space<vmem>>, vector<1x16x324xf32>
    %44 = vector.shape_cast %43 : vector<1x16x324xf32> to vector<16x324xf32>
    %45 = vector.shape_cast %42 : vector<16x324xf32> to vector<1x16x324xf32>
    tpu.vector_store %arg4[%c0_85, %c0_86, %c0_87], %45 {strides = array<i32>} : memref<2x16x324xf32, #tpu.memory_space<vmem>>, vector<1x16x324xf32>,
    %c1_88 = arith.constant 1 : index
    %c0_89 = arith.constant 0 : index
    %c0_90 = arith.constant 0 : index
    %46 = vector.load %arg6[%c1_88, %c0_89, %c0_90] : memref<2x27x324xf32, #tpu.memory_space<vmem>>, vector<1x27x324xf32>
    %47 = vector.shape_cast %46 : vector<1x27x324xf32> to vector<27x324xf32>
    %cst_91 = arith.constant dense<0.000000e+00> : vector<16x324xf32>
    %48 = tpu.matmul %35, %47, %cst_91 {dimension_numbers = #tpu.dot_dimension_numbers<[1], [0], [0], [1], [0, 0, 1, 1], [], []>} : vector<16x27xf32>, vector<27x324xf32>, vector<16x324xf32> -> vector<16x324xf32>
    %49 = vector.broadcast %36 : vector<16x1xf32> to vector<16x324xf32>
    %50 = arith.addf %48, %49 : vector<16x324xf32>
    %51 = math.tanh %50 : vector<16x324xf32>
    %c1_92 = arith.constant 1 : index
    %c0_93 = arith.constant 0 : index
    %c0_94 = arith.constant 0 : index
    %52 = vector.load %arg4[%c1_92, %c0_93, %c0_94] : memref<2x16x324xf32, #tpu.memory_space<vmem>>, vector<1x16x324xf32>
    %53 = vector.shape_cast %52 : vector<1x16x324xf32> to vector<16x324xf32>
    %54 = vector.shape_cast %51 : vector<16x324xf32> to vector<1x16x324xf32>
    tpu.vector_store %arg4[%c1_92, %c0_93, %c0_94], %54 {strides = array<i32>} : memref<2x16x324xf32, #tpu.memory_space<vmem>>, vector<1x16x324xf32>,
    return
  }
  func.func @transform_0(%arg0: i32) -> (i32, i32, i32, i32) {
    %c0_i32 = arith.constant 0 : i32
    %c0_i32_0 = arith.constant 0 : i32
    %c0_i32_1 = arith.constant 0 : i32
    %c0_i32_2 = arith.constant 0 : i32
    return %arg0, %c0_i32, %c0_i32_0, %c0_i32_1 : i32, i32, i32, i32
  }
  func.func @transform_1(%arg0: i32) -> (i32, i32) {
    %c0_i32 = arith.constant 0 : i32
    %c0_i32_0 = arith.constant 0 : i32
    %c0_i32_1 = arith.constant 0 : i32
    return %c0_i32, %c0_i32_0 : i32, i32
  }
  func.func @transform_2(%arg0: i32) -> (i32, i32) {
    %c0_i32 = arith.constant 0 : i32
    %c0_i32_0 = arith.constant 0 : i32
    %c0_i32_1 = arith.constant 0 : i32
    return %c0_i32, %c0_i32_0 : i32, i32
  }
  func.func @transform_3(%arg0: i32) -> (i32, i32, i32) {
    %c0_i32 = arith.constant 0 : i32
    %c0_i32_0 = arith.constant 0 : i32
    %c0_i32_1 = arith.constant 0 : i32
    return %arg0, %c0_i32, %c0_i32_0 : i32, i32, i32
  }
}

</mosaic_0001>

<bundles_post_ra>
// kernel: conv2d_tanh.1
= control target key start
LH: loop header
LB: loop body
LE: loop exit
PB: predicated region body
PF: predicated region fallthrough
CT: control target
= control target key end

     0   :  { %vm26_vm0 = vcmask 156672   ;;  %vm39_vm1 = vcmask 15360   ;;  %vm59_vm2 = vcmask 162960   ;;  %v8659_v2 = vmov 0.0   ;;  %s5732_s16 = smov 2   ;;  %s5736_s10 = smov 126   ;;  %s8639_s0 = inlined_call_operand.vmem [shape: f32[2,3,16,16], index: 0, kind: input, shape index: {}]   ;;  %s8640_s1 = inlined_call_operand.vmem [shape: f32[16,27], index: 1, kind: input, shape index: {}]   ;;  %s8641_s2 = inlined_call_operand.vmem [shape: f32[16,1], index: 2, kind: input, shape index: {}]   ;;  %s8642_s3 = inlined_call_operand.vmem [shape: f32[2,16,324], index: 3, kind: output, shape index: {}]  }
   0x1   :  { %v16_v0 = vld [vmem:[%s8639_s0 + $0x10] sm:$0xff]  ;;  %v14_v1 = vld [vmem:[%s8639_s0] sm:$0xff]  ;;  %28 = vst.msk [vmem:[#allocation2 + $0x18] sm:$0x3] %vm26_vm0, %v8659_v2  ;;  %27 = vst.msk [vmem:[#allocation2] sm:$0x3] %vm26_vm0, %v8659_v2  ;;  %5308 = vmatprep.mubr.f32.mxu0 %v8659_v2  ;;  %v161_v40 = vlaneseq }
   0x2   :  { %45 = vst.msk [vmem:[#allocation2 + $0x20] sm:$0xff] %vm39_vm1, %v8659_v2  ;;  %41 = vst.msk [vmem:[#allocation2 + $0x8] sm:$0xff] %vm39_vm1, %v8659_v2  ;;  %vm42_vm3 = vcmask 11264   ;;  %vm62_vm4 = vcmask 158864   ;;  %95 = vrot.lane.b32.xlu1 %v16_v0, %s5732_s16  ;;  %91 = vrot.lane.b32.xlu0 %v14_v1, %s5732_s16  ;;  %v17_v3 = vld [vmem:[%s8639_s0 + $0x18] sm:$0xff]  ;;  %v15_v4 = vld [vmem:[%s8639_s0 + $0x8] sm:$0xff] }
   0x3   :  { %29 = vst.msk [vmem:[#allocation2 + $0x30] sm:$0x3] %vm26_vm0, %v8659_v2  ;;  %30 = vst.msk [vmem:[#allocation2 + $0x48] sm:$0x3] %vm26_vm0, %v8659_v2  ;;  %v19_v5 = vld [vmem:[%s8639_s0 + $0x28] sm:$0xff]  ;;  %v18_v6 = vld [vmem:[%s8639_s0 + $0x20] sm:$0xff] }
   0x4   :  { %31 = vst.msk [vmem:[#allocation2 + $0x60] sm:$0x3] %vm26_vm0, %v8659_v2  ;;  %32 = vst.msk [vmem:[#allocation2 + $0x78] sm:$0x3] %vm26_vm0, %v8659_v2  ;;  %v21_v7 = vld [vmem:[%s8639_s0 + $0x38] sm:$0xff]  ;;  %v20_v8 = vld [vmem:[%s8639_s0 + $0x30] sm:$0xff] }
   0x5   :  { %33 = vst.msk [vmem:[#allocation2 + $0x12] sm:$0x3] %vm26_vm0, %v8659_v2  ;;  %34 = vst.msk [vmem:[#allocation2 + $0x2a] sm:$0x3] %vm26_vm0, %v8659_v2  ;;  %v23_v9 = vld [vmem:[%s8639_s0 + $0x48] sm:$0xff]  ;;  %v22_v10 = vld [vmem:[%s8639_s0 + $0x40] sm:$0xff] }
   0x6   :  { %35 = vst.msk [vmem:[#allocation2 + $0x42] sm:$0x3] %vm26_vm0, %v8659_v2  ;;  %36 = vst.msk [vmem:[#allocation2 + $0x5a] sm:$0x3] %vm26_vm0, %v8659_v2  ;;  %97 = vrot.lane.b32.xlu1 %v17_v3, %s5732_s16  ;;  %93 = vrot.lane.b32.xlu0 %v15_v4, %s5732_s16  ;;  %v25_v11 = vld [vmem:[%s8639_s0 + $0x58] sm:$0xff]  ;;  %v24_v12 = vld [vmem:[%s8639_s0 + $0x50] sm:$0xff] }
   0x7   :  { %37 = vst.msk [vmem:[#allocation2 + $0x72] sm:$0x3] %vm26_vm0, %v8659_v2  ;;  %38 = vst.msk [vmem:[#allocation2 + $0x8a] sm:$0x3] %vm26_vm0, %v8659_v2  ;;  %vm127_vm5 = vcmask 146448   ;;  %s5733_s0 = smov 127  }
   0x8   :  { %48 = vst.msk [vmem:[#allocation2 + $0x38] sm:$0xff] %vm39_vm1, %v8659_v2  ;;  %51 = vst.msk [vmem:[#allocation2 + $0x50] sm:$0xff] %vm39_vm1, %v8659_v2  ;;  %v5734_v38 = vmov 1983009808   ;;  %v162_v44 = vshrl.u32 %v161_v40, 7  ;;  %s5737_s11 = smov 36  }
   0x9   :  { %54 = vst.msk [vmem:[#allocation2 + $0x68] sm:$0xff] %vm39_vm1, %v8659_v2  ;;  %57 = vst.msk [vmem:[#allocation2 + $0x80] sm:$0xff] %vm39_vm1, %v8659_v2  ;;  %v159_v39 = vunpack.c.l.s4 %v5734_v38  ;;  %v5735_v46 = vmov 1934713408   ;;  %s5738_s12 = smov 72   ;;  %s5739_s13 = smov 108  }
   0xa   :  { %44 = vst.msk [vmem:[#allocation2 + $0x18] sm:$0xff] %vm39_vm1, %v8659_v2  ;;  %40 = vst.msk [vmem:[#allocation2] sm:$0xff] %vm39_vm1, %v8659_v2  ;;  %101 = vrot.lane.b32.xlu1 %v19_v5, %s5732_s16  ;;  %99 = vrot.lane.b32.xlu0 %v18_v6, %s5732_s16  ;;  %v190_v47 = vunpack.c.l.s4 %v5735_v46  ;;  %s5740_s14 = smov 16   ;;  %s5741_s15 = smov 52   ;;  %vm596_vm6 = vcmask 146432   ;;  %vm599_vm7 = vcmask 293888  }
   0xb   :  { %65 = vst.msk [vmem:[#allocation2 + $0x20] sm:$0xff] %vm59_vm2, %v8659_v2  ;;  %61 = vst.msk [vmem:[#allocation2 + $0x8] sm:$0xff] %vm59_vm2, %v8659_v2  ;;  %v160_v43 = vunpack.c.0.s8 %v159_v39  ;;  %s5743_s17 = smov 124   ;;  %s5744_s18 = smov 32   ;;  %vm8651_vm8 = vcmask 441344   ;;  %vm605_vm9 = vcmask 588800  }
   0xc   :  { %47 = vst.msk [vmem:[#allocation2 + $0x30] sm:$0xff] %vm39_vm1, %v8659_v2  ;;  %50 = vst.msk [vmem:[#allocation2 + $0x48] sm:$0xff] %vm39_vm1, %v8659_v2  ;;  %v191_v53 = vunpack.c.0.s8 %v190_v47  ;;  %s5745_s19 = smov 18   ;;  %s5746_s20 = smov 54   ;;  %vm8650_vm10 = vcmask 736256   ;;  %vm8649_vm11 = vcmask 883712  }
   0xd   :  { %53 = vst.msk [vmem:[#allocation2 + $0x60] sm:$0xff] %vm39_vm1, %v8659_v2  ;;  %56 = vst.msk [vmem:[#allocation2 + $0x78] sm:$0xff] %vm39_vm1, %v8659_v2  ;;  %v5982_v50 = vsub.s32 %v160_v43, %v162_v44  ;;  %s5747_s21 = smov 90   ;;  %s5748_s22 = smov 34   ;;  %vm8647_vm12 = vcmask 1031168   ;;  %vm8648_vm13 = vcmask 130048  }
   0xe   :  { %68 = vst.msk [vmem:[#allocation2 + $0x38] sm:$0xff] %vm59_vm2, %v8659_v2  ;;  %71 = vst.msk [vmem:[#allocation2 + $0x50] sm:$0xff] %vm59_vm2, %v8659_v2  ;;  %105 = vrot.lane.b32.xlu1 %v21_v7, %s5732_s16  ;;  %103 = vrot.lane.b32.xlu0 %v20_v8, %s5732_s16  ;;  %v6006_v59 = vsub.s32 %v191_v53, %v162_v44  ;;  %s5749_s23 = smov 70   ;;  %s5750_s24 = smov 106   ;;  %vm8646_vm14 = vcmask 277504   ;;  %vm8644_vm15 = vcmask 424960  }
   0xf   :  { %74 = vst.msk [vmem:[#allocation2 + $0x68] sm:$0xff] %vm59_vm2, %v8659_v2  ;;  %77 = vst.msk [vmem:[#allocation2 + $0x80] sm:$0xff] %vm59_vm2, %v8659_v2  ;;  %s5751_s25 = smov 14   ;;  %s5752_s26 = smov 50   ;;  %vm8643_vm0 = vcmask 572416   ;;  %vm629_vm1 = vcmask 719872  }
  0x10   :  { %46 = vst.msk [vmem:[#allocation2 + $0x28] sm:$0xf] %vm42_vm3, %v8659_v2  ;;  %43 = vst.msk [vmem:[#allocation2 + $0x10] sm:$0xf] %vm42_vm3, %v8659_v2 }
  0x11   :  { %49 = vst.msk [vmem:[#allocation2 + $0x40] sm:$0xf] %vm42_vm3, %v8659_v2  ;;  %52 = vst.msk [vmem:[#allocation2 + $0x58] sm:$0xf] %vm42_vm3, %v8659_v2 }
  0x12   :  { %55 = vst.msk [vmem:[#allocation2 + $0x70] sm:$0xf] %vm42_vm3, %v8659_v2  ;;  %58 = vst.msk [vmem:[#allocation2 + $0x88] sm:$0xf] %vm42_vm3, %v8659_v2  ;;  %109 = vrot.lane.b32.xlu1 %v23_v9, %s5732_s16  ;;  %107 = vrot.lane.b32.xlu0 %v22_v10, %s5732_s16  ;;  %vm635_vm3 = vcmask 1014784  }
  0x13   :  { %64 = vst.msk [vmem:[#allocation2 + $0x18] sm:$0xff] %vm59_vm2, %v8659_v2  ;;  %60 = vst.msk [vmem:[#allocation2] sm:$0xff] %vm59_vm2, %v8659_v2 }
  0x14   :  { %66 = vst.msk [vmem:[#allocation2 + $0x28] sm:$0xf] %vm62_vm4, %v8659_v2  ;;  %63 = vst.msk [vmem:[#allocation2 + $0x10] sm:$0xf] %vm62_vm4, %v8659_v2 }
  0x15   :  { %67 = vst.msk [vmem:[#allocation2 + $0x30] sm:$0xff] %vm59_vm2, %v8659_v2  ;;  %70 = vst.msk [vmem:[#allocation2 + $0x48] sm:$0xff] %vm59_vm2, %v8659_v2 }
  0x16   :  { %73 = vst.msk [vmem:[#allocation2 + $0x60] sm:$0xff] %vm59_vm2, %v8659_v2  ;;  %76 = vst.msk [vmem:[#allocation2 + $0x78] sm:$0xff] %vm59_vm2, %v8659_v2  ;;  %113 = vrot.lane.b32.xlu1 %v25_v11, %s5732_s16  ;;  %111 = vrot.lane.b32.xlu0 %v24_v12, %s5732_s16  ;;  %s5742_s16 = smov 88   ;;  %vm632_vm2 = vcmask 867328  }
  0x17   :  { %69 = vst.msk [vmem:[#allocation2 + $0x40] sm:$0xf] %vm62_vm4, %v8659_v2  ;;  %72 = vst.msk [vmem:[#allocation2 + $0x58] sm:$0xf] %vm62_vm4, %v8659_v2 }
  0x18   :  { %75 = vst.msk [vmem:[#allocation2 + $0x70] sm:$0xf] %vm62_vm4, %v8659_v2  ;;  %78 = vst.msk [vmem:[#allocation2 + $0x88] sm:$0xf] %vm62_vm4, %v8659_v2  ;;  %vm638_vm4 = vcmask 113664  }
  0x74   :  { %v96_v13 = vpop.permute.xlu1 %95  ;;  %v92_v14 = vpop.permute.xlu0 %91 }
  0x75   :  { %130 = vst.msk [vmem:[#allocation2 + $0x1a] sm:$0xff] %vm127_vm5, %v96_v13  ;;  %128 = vst.msk [vmem:[#allocation2 + $0x2] sm:$0xff] %vm127_vm5, %v92_v14 }
  0x78   :  { %v98_v15 = vpop.permute.xlu1 %97  ;;  %v94_v16 = vpop.permute.xlu0 %93 }
  0x79   :  { %131 = vst.msk [vmem:[#allocation2 + $0x22] sm:$0xff] %vm127_vm5, %v98_v15  ;;  %129 = vst.msk [vmem:[#allocation2 + $0xa] sm:$0xff] %vm127_vm5, %v94_v16 }
  0x7c   :  { %v102_v17 = vpop.permute.xlu1 %101  ;;  %v100_v18 = vpop.permute.xlu0 %99  ;;  %v5923_v19 = vld [vmem:[#allocation2] sm:$0xff]  ;;  %v5938_v25 = vld [vmem:[#allocation2 + $0x18] sm:$0xff] }
  0x7d   :  { %133 = vst.msk [vmem:[#allocation2 + $0x3a] sm:$0xff] %vm127_vm5, %v102_v17  ;;  %132 = vst.msk [vmem:[#allocation2 + $0x32] sm:$0xff] %vm127_vm5, %v100_v18  ;;  %690 = vrot.lane.b32.xlu0 %v5923_v19, %s5733_s0  ;;  %v172_v55 = vcombine.high %v5938_v25, %v8659_v2  ;;  %v5999_v57 = vrot.slane %v5938_v25, %v5982_v50  ;;  %v4636_v3 = vld [vmem:[#allocation2 + $0x1a] sm:$0xff]  ;;  %v4046_v16 = vld [vmem:[#allocation2 + $0x2] sm:$0xff] }
  0x7e   :  { %v3563_v7 = vcombine.high %v4636_v3, %v8659_v2 }
  0x7f   :  { %v186_v61 = vrot.slane %v172_v55, %v5982_v50 }
  0x80   :  { %v106_v20 = vpop.permute.xlu1 %105  ;;  %v104_v21 = vpop.permute.xlu0 %103  ;;  %v656_v22 = vld [vmem:[#allocation2 + $0x10] sm:$0x3]  ;;  %v5929_v23 = vld [vmem:[#allocation2 + $0x8] sm:$0xff]  ;;  %v5936_v24 = vld [vmem:[#allocation2 + $0x20] sm:$0xff]  ;;  %v6043_v17 = vrot.slane %v3563_v7, %v5982_v50 }
  0x81   :  { %135 = vst.msk [vmem:[#allocation2 + $0x52] sm:$0xff] %vm127_vm5, %v106_v20  ;;  %134 = vst.msk [vmem:[#allocation2 + $0x4a] sm:$0xff] %vm127_vm5, %v104_v21  ;;  %694 = vrot.lane.b32.xlu0 %v656_v22, %s5733_s0  ;;  %692 = vrot.lane.b32.xlu1 %v5929_v23, %s5733_s0  ;;  %v659_v28 = vld [vmem:[#allocation2 + $0x28] sm:$0x3]  ;;  %v1243_v4 = vld [vmem:[#allocation2 + $0x10] sm:$0x3]  ;;  %v246_v22 = vrot.slane %v5936_v24, %v5982_v50 }
  0x84   :  { %v110_v26 = vpop.permute.xlu1 %109  ;;  %v108_v27 = vpop.permute.xlu0 %107  ;;  %v5946_v31 = vld [vmem:[#allocation2 + $0x30] sm:$0xff]  ;;  %v662_v32 = vld [vmem:[#allocation2 + $0x40] sm:$0x3]  ;;  %v5953_v33 = vld [vmem:[#allocation2 + $0x38] sm:$0xff] }
  0x85   :  { %137 = vst.msk [vmem:[#allocation2 + $0x6a] sm:$0xff] %vm127_vm5, %v110_v26  ;;  %136 = vst.msk [vmem:[#allocation2 + $0x62] sm:$0xff] %vm127_vm5, %v108_v27  ;;  %698 = vrot.lane.b32.xlu0 %v5936_v24, %s5733_s0  ;;  %696 = vrot.lane.b32.xlu1 %v5938_v25, %s5733_s0  ;;  %v156_v45 = vcombine.low %v5923_v19, %v5946_v31  ;;  %v157_v54 = vcombine.high %v5923_v19, %v5946_v31  ;;  %v4052_v12 = vld [vmem:[#allocation2 + $0x32] sm:$0xff] }
  0x86   :  { %v223_v6 = vcombine.low %v5929_v23, %v5953_v33  ;;  %v3548_v21 = vcombine.high %v4046_v16, %v4052_v12 }
  0x87   :  { %v5989_v52 = vrot.slane %v156_v45, %v5982_v50  ;;  %v171_v60 = vrot.slane %v157_v54, %v5982_v50 }
  0x88   :  { %v114_v29 = vpop.permute.xlu1 %113  ;;  %v112_v30 = vpop.permute.xlu0 %111  ;;  %v5958_v34 = vld [vmem:[#allocation2 + $0x50] sm:$0xff]  ;;  %v5960_v35 = vld [vmem:[#allocation2 + $0x48] sm:$0xff]  ;;  %v665_v36 = vld [vmem:[#allocation2 + $0x58] sm:$0x3]  ;;  %v231_v15 = vrot.slane %v223_v6, %v5982_v50  ;;  %v6059_v26 = vrot.slane %v3548_v21, %v5982_v50 }
  0x89   :  { %139 = vst.msk [vmem:[#allocation2 + $0x82] sm:$0xff] %vm127_vm5, %v114_v29  ;;  %138 = vst.msk [vmem:[#allocation2 + $0x7a] sm:$0xff] %vm127_vm5, %v112_v30  ;;  %700 = vrot.lane.b32.xlu1 %v659_v28, %s5733_s0  ;;  %702 = vrot.lane.b32.xlu0 %v5946_v31, %s5733_s0  ;;  %v188_v58 = vcombine.high %v5989_v52, %v5999_v57  ;;  %v203_v5 = vcombine.low %v171_v60, %v186_v61  ;;  %vm641_vm5 = vcmask 261120  }
  0x8a   :  { %v204_v14 = vcombine.high %v171_v60, %v186_v61  ;;  %v254_v28 = vcombine.low %v231_v15, %v246_v22  ;;  %v224_v30 = vcombine.high %v5929_v23, %v5953_v33  ;;  %v255_v40 = vcombine.high %v231_v15, %v246_v22 }
  0x8b   :  { %v6028_v8 = vrot.slane %v188_v58, %v6006_v59  ;;  %v6039_v13 = vrot.slane %v203_v5, %v6006_v59  ;;  %v187_v21 = vcombine.low %v5989_v52, %v5999_v57 }
  0x8c   :  { %v5966_v37 = vld [vmem:[#allocation2 + $0x60] sm:$0xff]  ;;  %v668_v41 = vld [vmem:[#allocation2 + $0x70] sm:$0x3]  ;;  %v5971_v42 = vld [vmem:[#allocation2 + $0x68] sm:$0xff]  ;;  %v6062_v27 = vrot.slane %v204_v14, %v6006_v59  ;;  %v6083_v44 = vrot.slane %v254_v28, %v6006_v59  ;;  %v6095_v53 = vrot.slane %v255_v40, %v6006_v59 }
  0x8d   :  { %704 = vrot.lane.b32.xlu1 %v5953_v33, %s5733_s0  ;;  %706 = vrot.lane.b32.xlu0 %v662_v32, %s5733_s0  ;;  %v6015_v63 = vrot.slane %v5966_v37, %v5982_v50  ;;  %v324_v1 = vcombine.high %v5966_v37, %v8659_v2  ;;  %v398_v29 = vrot.slane %v5971_v42, %v5982_v50 }
  0x8e   :  { %v391_v43 = vcombine.high %v5971_v42, %v8659_v2 }
  0x8f   :  { %v338_v11 = vrot.slane %v324_v1, %v5982_v50 }
  0x90   :  { %v5978_v48 = vld [vmem:[#allocation2 + $0x80] sm:$0xff]  ;;  %v5980_v49 = vld [vmem:[#allocation2 + $0x78] sm:$0xff]  ;;  %v671_v51 = vld [vmem:[#allocation2 + $0x88] sm:$0x3]  ;;  %v405_v55 = vrot.slane %v391_v43, %v5982_v50 }
  0x91   :  { %710 = vrot.lane.b32.xlu0 %v5958_v34, %s5733_s0  ;;  %708 = vrot.lane.b32.xlu1 %v5960_v35, %s5733_s0  ;;  %v308_v56 = vcombine.low %v5960_v35, %v5980_v49  ;;  %v309_v0 = vcombine.high %v5960_v35, %v5980_v49  ;;  %v375_v20 = vcombine.low %v5958_v34, %v5978_v48  ;;  %v5694_v58 = vld [vmem:[#allocation2 + $0x4e] ss:$48 sps:$4 sm:$0xff]   ;;  %v5684_v12 = vld [vmem:[#allocation2 + $0x58] ss:$48 sps:$4 sm:$0x33]  }
  0x92   :  { %v376_v47 = vcombine.high %v5958_v34, %v5978_v48  ;;  %v6109_v5 = vrot.slane %v5694_v58, %v5982_v50  ;;  %v449_v22 = vrot.slane %v5684_v12, %v5982_v50 }
  0x93   :  { %v6011_v62 = vrot.slane %v308_v56, %v5982_v50  ;;  %v323_v10 = vrot.slane %v309_v0, %v5982_v50  ;;  %v383_v38 = vrot.slane %v375_v20, %v5982_v50  ;;  %v5683_v56 = vld [vmem:[#allocation2 + $0x10] ss:$48 sps:$4 sm:$0x33]  }
  0x94   :  { %v390_v0 = vrot.slane %v376_v47, %v5982_v50  ;;  %8683 = vst [vmem:[#allocation4_spill] sm:$0xff] %v6109_v5 }
  0x95   :  { %712 = vrot.lane.b32.xlu1 %v665_v36, %s5733_s0  ;;  %714 = vrot.lane.b32.xlu0 %v5966_v37, %s5733_s0  ;;  %v340_v9 = vcombine.high %v6011_v62, %v6015_v63  ;;  %v356_v36 = vcombine.high %v323_v10, %v338_v11  ;;  %v406_v46 = vcombine.low %v383_v38, %v398_v29 }
  0x96   :  { %v407_v61 = vcombine.high %v383_v38, %v398_v29  ;;  %v423_v20 = vcombine.high %v390_v0, %v405_v55  ;;  %v339_v38 = vcombine.low %v6011_v62, %v6015_v63  ;;  %v220_v62 = vcombine.high %v6028_v8, %v8659_v2 }
  0x97   :  { %v6046_v18 = vrot.slane %v340_v9, %v6006_v59  ;;  %v6086_v45 = vrot.slane %v356_v36, %v6006_v59  ;;  %v6099_v60 = vrot.slane %v406_v46, %v6006_v59 }
  0x98   :  { %v421_v9 = vrot.slane %v407_v61, %v6006_v59  ;;  %v437_v29 = vrot.slane %v423_v20, %v6006_v59  ;;  %v6140_v40 = vrot.slane %v339_v38, %v6006_v59  ;;  %v1249_v61 = vld [vmem:[#allocation2 + $0x40] sm:$0x3] }
  0x99   :  { %716 = vrot.lane.b32.xlu1 %v5971_v42, %s5733_s0  ;;  %718 = vrot.lane.b32.xlu0 %v668_v41, %s5733_s0  ;;  %v238_v41 = vrot.slane %v224_v30, %v5982_v50  ;;  %v6130_v30 = vrot.slane %v187_v21, %v6006_v59 }
  0x9a   :  { %v371_v63 = vcombine.high %v6140_v40, %v8659_v2 }
  0x9b   :  { %v219_v52 = vcombine.high %v6130_v30, %v8659_v2 }
  0x9d   :  { %722 = vrot.lane.b32.xlu0 %v5978_v48, %s5733_s0  ;;  %720 = vrot.lane.b32.xlu1 %v5980_v49, %s5733_s0 }
  0xa1   :  { %1277 = vrot.lane.b32.xlu0 %v5923_v19, %s5736_s10  ;;  %724 = vrot.lane.b32.xlu1 %v671_v51, %s5733_s0  ;;  %v355_v19 = vcombine.low %v323_v10, %v338_v11  ;;  %v3542_v51 = vld [vmem:[#allocation2 + $0x62] sm:$0xff]  ;;  %v422_v10 = vcombine.low %v390_v0, %v405_v55 }
  0xa2   :  { %v3715_v1 = vcombine.high %v3542_v51, %v8659_v2  ;;  %v298_v11 = vld [vmem:[#allocation2 + $0x28] sm:$0x3] }
  0xa3   :  { %v6069_v32 = vrot.slane %v355_v19, %v6006_v59  ;;  %v430_v19 = vrot.slane %v422_v10, %v6006_v59 }
  0xa4   :  { %v6112_v6 = vrot.slane %v3715_v1, %v5982_v50 }
  0xa5   :  { %1281 = vrot.lane.b32.xlu0 %v1243_v4, %s5736_s10  ;;  %1279 = vrot.lane.b32.xlu1 %v5929_v23, %s5736_s10  ;;  %v297_v4 = vrot.slane %v5683_v56, %v5982_v50  ;;  %v373_v43 = vcombine.high %v6069_v32, %v8659_v2  ;;  %v440_v47 = vcombine.high %v430_v19, %v8659_v2  ;;  %v1246_v56 = vld [vmem:[#allocation2 + $0x28] sm:$0x3] }
  0xa6   :  { %8684 = vst [vmem:[#allocation5_spill] sm:$0xff] %v6112_v6 }
  0xa7   :  { %v299_v15 = vcombine.low %v297_v4, %v298_v11  ;;  %v1252_v4 = vld [vmem:[#allocation2 + $0x58] sm:$0x3]  ;;  %v1255_v11 = vld [vmem:[#allocation2 + $0x70] sm:$0x3] }
  0xa9   :  { %470 = vrot.lane.b32.xlu0 %v6028_v8, %s5737_s11  ;;  %1283 = vrot.lane.b32.xlu1 %v5938_v25, %s5736_s10  ;;  %v239_v25 = vcombine.high %v5936_v24, %v8659_v2  ;;  %v306_v28 = vrot.slane %v299_v15, %v6006_v59  ;;  %v222_v8 = vcombine.high %v6062_v27, %v8659_v2 }
  0xab   :  { %v253_v23 = vrot.slane %v239_v25, %v5982_v50  ;;  %v450_v25 = vld [vmem:[#allocation2 + $0x70] sm:$0x3]  ;;  %v307_v51 = vcombine.high %v306_v28, %v8659_v2 }
  0xac   :  { %v451_v36 = vcombine.low %v449_v22, %v450_v25 }
  0xad   :  { %486 = vrot.lane.b32.xlu0 %v6039_v13, %s5738_s12  ;;  %472 = vrot.lane.b32.xlu1 %v6046_v18, %s5737_s11  ;;  %v270_v54 = vcombine.low %v238_v41, %v253_v23  ;;  %v271_v3 = vcombine.high %v238_v41, %v253_v23  ;;  %v221_v41 = vcombine.high %v6039_v13, %v8659_v2 }
  0xae   :  { %v458_v57 = vrot.slane %v451_v36, %v6006_v59  ;;  %v372_v23 = vcombine.high %v6046_v18, %v8659_v2  ;;  %v286_v13 = vcombine.high %v6083_v44, %v8659_v2  ;;  %v374_v18 = vcombine.high %v6086_v45, %v8659_v2 }
  0xaf   :  { %v278_v7 = vrot.slane %v270_v54, %v6006_v59  ;;  %v285_v14 = vrot.slane %v271_v3, %v6006_v59 }
  0xb0   :  { %v459_v54 = vcombine.high %v458_v57, %v8659_v2 }
  0xb1   :  { %502 = vrot.lane.b32.xlu0 %v6062_v27, %s5739_s13  ;;  %488 = vrot.lane.b32.xlu1 %v6069_v32, %s5738_s12  ;;  %v287_v27 = vcombine.high %v6095_v53, %v8659_v2  ;;  %v438_v32 = vcombine.high %v6099_v60, %v8659_v2  ;;  %v289_v46 = vcombine.high %v285_v14, %v8659_v2 }
  0xb5   :  { %518 = vrot.lane.b32.xlu0 %v6083_v44, %s5740_s14  ;;  %504 = vrot.lane.b32.xlu1 %v6086_v45, %s5739_s13  ;;  %v288_v44 = vcombine.high %v278_v7, %v8659_v2  ;;  %v439_v45 = vcombine.high %v421_v9, %v8659_v2 }
  0xb9   :  { %534 = vrot.lane.b32.xlu0 %v6095_v53, %s5741_s15  ;;  %520 = vrot.lane.b32.xlu1 %v6099_v60, %s5740_s14  ;;  %v441_v53 = vcombine.high %v437_v29, %v8659_v2 }
  0xbd   :  { %550 = vrot.lane.b32.xlu0 %v278_v7, %s5742_s16  ;;  %536 = vrot.lane.b32.xlu1 %v421_v9, %s5741_s15 }
  0xc1   :  { %566 = vrot.lane.b32.xlu0 %v285_v14, %s5743_s17  ;;  %552 = vrot.lane.b32.xlu1 %v430_v19, %s5742_s16 }
  0xc5   :  { %582 = vrot.lane.b32.xlu0 %v306_v28, %s5744_s18  ;;  %568 = vrot.lane.b32.xlu1 %v437_v29, %s5743_s17  ;;  %v1258_v29 = vld [vmem:[#allocation2 + $0x88] sm:$0x3] }
  0xc9   :  { %462 = vrot.lane.b32.xlu0 %v219_v52, %s5745_s19  ;;  %584 = vrot.lane.b32.xlu1 %v458_v57, %s5744_s18 }
  0xcd   :  { %478 = vrot.lane.b32.xlu0 %v220_v62, %s5746_s20  ;;  %464 = vrot.lane.b32.xlu1 %v371_v63, %s5745_s19 }
  0xd1   :  { %494 = vrot.lane.b32.xlu0 %v221_v41, %s5747_s21  ;;  %480 = vrot.lane.b32.xlu1 %v372_v23, %s5746_s20 }
  0xd5   :  { %510 = vrot.lane.b32.xlu0 %v222_v8, %s5736_s10  ;;  %496 = vrot.lane.b32.xlu1 %v373_v43, %s5747_s21 }
  0xd9   :  { %526 = vrot.lane.b32.xlu0 %v286_v13, %s5748_s22  ;;  %512 = vrot.lane.b32.xlu1 %v374_v18, %s5736_s10 }
  0xdd   :  { %542 = vrot.lane.b32.xlu0 %v287_v27, %s5749_s23  ;;  %528 = vrot.lane.b32.xlu1 %v438_v32, %s5748_s22 }
  0xe1   :  { %558 = vrot.lane.b32.xlu0 %v288_v44, %s5750_s24  ;;  %544 = vrot.lane.b32.xlu1 %v439_v45, %s5749_s23 }
  0xe5   :  { %574 = vrot.lane.b32.xlu0 %v289_v46, %s5751_s25  ;;  %560 = vrot.lane.b32.xlu1 %v440_v47, %s5750_s24 }
  0xe9   :  { %590 = vrot.lane.b32.xlu0 %v307_v51, %s5752_s26  ;;  %576 = vrot.lane.b32.xlu1 %v441_v53, %s5751_s25 }
  0xed   :  { %1285 = vrot.lane.b32.xlu0 %v5936_v24, %s5736_s10  ;;  %592 = vrot.lane.b32.xlu1 %v459_v54, %s5752_s26 }
  0xef   :  { %v691_v55 = vpop.permute.xlu0 %690 }
  0xf1   :  { %1289 = vrot.lane.b32.xlu0 %v5946_v31, %s5736_s10  ;;  %1287 = vrot.lane.b32.xlu1 %v1246_v56, %s5736_s10 }
  0xf3   :  { %v693_v58 = vpop.permute.xlu1 %692  ;;  %v6193_v60 = vpop.permute.xlu0 %694 }
  0xf5   :  { %1293 = vrot.lane.b32.xlu0 %v1249_v61, %s5736_s10  ;;  %1291 = vrot.lane.b32.xlu1 %v5953_v33, %s5736_s10 }
  0xf7   :  { %v697_v0 = vpop.permute.xlu1 %696  ;;  %v699_v24 = vpop.permute.xlu0 %698 }
  0xf8   :  { %v6208_v33 = vrot.slane %v697_v0, %v5982_v50  ;;  %v758_v12 = vcombine.high %v697_v0, %v8659_v2  ;;  %v832_v57 = vrot.slane %v699_v24, %v5982_v50  ;;  %v825_v27 = vcombine.high %v699_v24, %v8659_v2 }
  0xf9   :  { %1297 = vrot.lane.b32.xlu0 %v5958_v34, %s5736_s10  ;;  %1295 = vrot.lane.b32.xlu1 %v5960_v35, %s5736_s10 }
  0xfa   :  { %v772_v20 = vrot.slane %v758_v12, %v5982_v50  ;;  %v839_v61 = vrot.slane %v825_v27, %v5982_v50 }
  0xfb   :  { %v6202_v31 = vpop.permute.xlu1 %700  ;;  %v703_v1 = vpop.permute.xlu0 %702 }
  0xfc   :  { %v742_v3 = vcombine.low %v691_v55, %v703_v1  ;;  %v743_v34 = vcombine.high %v691_v55, %v703_v1 }
  0xfd   :  { %1301 = vrot.lane.b32.xlu0 %v5966_v37, %s5736_s10  ;;  %1299 = vrot.lane.b32.xlu1 %v1252_v4, %s5736_s10 }
  0xfe   :  { %v6211_v7 = vrot.slane %v742_v3, %v5982_v50  ;;  %v757_v37 = vrot.slane %v743_v34, %v5982_v50 }
  0xff   :  { %v705_v9 = vpop.permute.xlu1 %704  ;;  %v6213_v10 = vpop.permute.xlu0 %706 }
 0x100   :  { %v773_v35 = vcombine.low %v6211_v7, %v6208_v33  ;;  %v774_v19 = vcombine.high %v6211_v7, %v6208_v33  ;;  %v809_v21 = vcombine.low %v693_v58, %v705_v9  ;;  %v789_v28 = vcombine.low %v757_v37, %v772_v20 }
 0x101   :  { %1305 = vrot.lane.b32.xlu0 %v1255_v11, %s5736_s10  ;;  %1303 = vrot.lane.b32.xlu1 %v5971_v42, %s5736_s10  ;;  %v790_v52 = vcombine.high %v757_v37, %v772_v20  ;;  %v810_v62 = vcombine.high %v693_v58, %v705_v9  ;;  %v876_v3 = vcombine.low %v6193_v60, %v6213_v10 }
 0x102   :  { %v6234_v25 = vrot.slane %v774_v19, %v6006_v59  ;;  %v817_v36 = vrot.slane %v809_v21, %v5982_v50 }
 0x103   :  { %v709_v14 = vpop.permute.xlu1 %708  ;;  %v6222_v15 = vpop.permute.xlu0 %710  ;;  %v6249_v23 = vrot.slane %v790_v52, %v6006_v59  ;;  %v824_v46 = vrot.slane %v810_v62, %v5982_v50  ;;  %v883_v10 = vrot.slane %v876_v3, %v5982_v50 }
 0x104   :  { %v840_v8 = vcombine.low %v817_v36, %v832_v57  ;;  %v841_v54 = vcombine.high %v817_v36, %v832_v57 }
 0x105   :  { %1309 = vrot.lane.b32.xlu0 %v5978_v48, %s5736_s10  ;;  %1307 = vrot.lane.b32.xlu1 %v5980_v49, %s5736_s10  ;;  %v6243_v49 = vrot.slane %v789_v28, %v6006_v59  ;;  %v856_v11 = vcombine.low %v824_v46, %v839_v61  ;;  %v857_v21 = vcombine.high %v824_v46, %v839_v61 }
 0x106   :  { %v6266_v53 = vrot.slane %v840_v8, %v6006_v59  ;;  %v6287_v9 = vrot.slane %v841_v54, %v6006_v59  ;;  %v885_v52 = vcombine.low %v883_v10, %v6202_v31 }
 0x107   :  { %v6231_v22 = vpop.permute.xlu1 %712  ;;  %v715_v42 = vpop.permute.xlu0 %714  ;;  %v6301_v20 = vrot.slane %v856_v11, %v6006_v59 }
 0x108   :  { %v910_v43 = vcombine.high %v715_v42, %v8659_v2  ;;  %v6256_v32 = vrot.slane %v715_v42, %v5982_v50 }
 0x109   :  { %1311 = vrot.lane.b32.xlu1 %v1258_v29, %s5736_s10  ;;  %1056 = vrot.lane.b32.xlu0 %v6234_v25, %s5737_s11 }
 0x10a   :  { %v924_v55 = vrot.slane %v910_v43, %v5982_v50 }
 0x10b   :  { %v717_v48 = vpop.permute.xlu1 %716  ;;  %v6240_v38 = vpop.permute.xlu0 %718 }
 0x10c   :  { %v984_v42 = vrot.slane %v717_v48, %v5982_v50  ;;  %v977_v8 = vcombine.high %v717_v48, %v8659_v2 }
 0x10d   :  { %1072 = vrot.lane.b32.xlu0 %v6243_v49, %s5738_s12 }
 0x10e   :  { %v991_v27 = vrot.slane %v977_v8, %v5982_v50 }
 0x10f   :  { %v721_v63 = vpop.permute.xlu1 %720  ;;  %v723_v41 = vpop.permute.xlu0 %722 }
 0x110   :  { %v894_v13 = vcombine.low %v709_v14, %v721_v63  ;;  %v895_v18 = vcombine.high %v709_v14, %v721_v63  ;;  %v961_v0 = vcombine.low %v6222_v15, %v723_v41  ;;  %v962_v28 = vcombine.high %v6222_v15, %v723_v41 }
 0x111   :  { %1088 = vrot.lane.b32.xlu0 %v6249_v23, %s5739_s13  ;;  %v6314_v63 = vrot.slane %v857_v21, %v6006_v59 }
 0x112   :  { %v6259_v44 = vrot.slane %v894_v13, %v5982_v50  ;;  %v909_v45 = vrot.slane %v895_v18, %v5982_v50  ;;  %v969_v12 = vrot.slane %v961_v0, %v5982_v50  ;;  %v976_v15 = vrot.slane %v962_v28, %v5982_v50 }
 0x113   :  { %v725_v47 = vpop.permute.xlu1 %724  ;;  %v6263_v51 = vpop.permute.xlu0 %1277  ;;  %v6326_v18 = vrot.slane %v885_v52, %v6006_v59 }
 0x114   :  { %v925_v56 = vcombine.low %v6259_v44, %v6256_v32  ;;  %v926_v58 = vcombine.high %v6259_v44, %v6256_v32  ;;  %v941_v1 = vcombine.low %v909_v45, %v924_v55  ;;  %v942_v60 = vcombine.high %v909_v45, %v924_v55 }
 0x115   :  { %1104 = vrot.lane.b32.xlu0 %v6266_v53, %s5740_s14  ;;  %v992_v36 = vcombine.low %v969_v12, %v984_v42  ;;  %v993_v43 = vcombine.high %v969_v12, %v984_v42  ;;  %v1028_v48 = vcombine.low %v6231_v22, %v725_v47  ;;  %v1008_v46 = vcombine.low %v976_v15, %v991_v27 }
 0x116   :  { %v6278_v24 = vrot.slane %v926_v58, %v6006_v59  ;;  %v6295_v37 = vrot.slane %v941_v1, %v6006_v59  ;;  %v6310_v29 = vrot.slane %v942_v60, %v6006_v59  ;;  %v1009_v0 = vcombine.high %v976_v15, %v991_v27 }
 0x117   :  { %v6282_v4 = vpop.permute.xlu1 %1279  ;;  %v6284_v34 = vpop.permute.xlu0 %1281  ;;  %v6323_v41 = vrot.slane %v992_v36, %v6006_v59  ;;  %v6335_v45 = vrot.slane %v993_v43, %v6006_v59  ;;  %v1035_v58 = vrot.slane %v1028_v48, %v5982_v50  ;;  %v6341_v61 = vrot.slane %v1008_v46, %v6006_v59 }
 0x118   :  { %1058 = vrot.lane.b32.xlu1 %v6278_v24, %s5737_s11  ;;  %v6347_v47 = vrot.slane %v1009_v0, %v6006_v59  ;;  %v958_v32 = vcombine.high %v6278_v24, %v8659_v2  ;;  %v874_v44 = vcombine.high %v6301_v20, %v8659_v2  ;;  %v960_v24 = vcombine.high %v6310_v29, %v8659_v2 }
 0x119   :  { %1120 = vrot.lane.b32.xlu0 %v6287_v9, %s5741_s15  ;;  %v1037_v22 = vcombine.low %v1035_v58, %v6240_v38 }
 0x11b   :  { %v6298_v14 = vpop.permute.xlu1 %1283  ;;  %v471_v19 = vpop.permute.xlu0 %470  ;;  %v6352_v60 = vrot.slane %v1037_v22, %v6006_v59 }
 0x11c   :  { %1074 = vrot.lane.b32.xlu1 %v6295_v37, %s5738_s12 }
 0x11d   :  { %1136 = vrot.lane.b32.xlu0 %v6301_v20, %s5742_s16  ;;  %v893_v20 = vcombine.high %v6326_v18, %v8659_v2 }
 0x11f   :  { %v473_v57 = vpop.permute.xlu1 %472  ;;  %v487_v62 = vpop.permute.xlu0 %486 }
 0x120   :  { %1090 = vrot.lane.b32.xlu1 %v6310_v29, %s5739_s13  ;;  %v1025_v29 = vcombine.high %v6335_v45, %v8659_v2 }
 0x121   :  { %1152 = vrot.lane.b32.xlu0 %v6314_v63, %s5743_s17 }
 0x123   :  { %v489_v31 = vpop.permute.xlu1 %488  ;;  %v503_v13 = vpop.permute.xlu0 %502 }
 0x124   :  { %1106 = vrot.lane.b32.xlu1 %v6323_v41, %s5740_s14 }
 0x125   :  { %1168 = vrot.lane.b32.xlu0 %v6326_v18, %s5744_s18 }
 0x127   :  { %v505_v54 = vpop.permute.xlu1 %504  ;;  %v519_v55 = vpop.permute.xlu0 %518 }
 0x128   :  { %1122 = vrot.lane.b32.xlu1 %v6335_v45, %s5741_s15  ;;  %v1027_v45 = vcombine.high %v6347_v47, %v8659_v2 }
 0x12b   :  { %v521_v1 = vpop.permute.xlu1 %520  ;;  %v535_v3 = vpop.permute.xlu0 %534 }
 0x12c   :  { %1138 = vrot.lane.b32.xlu1 %v6341_v61, %s5742_s16 }
 0x12f   :  { %v537_v11 = vpop.permute.xlu1 %536  ;;  %v551_v12 = vpop.permute.xlu0 %550 }
 0x130   :  { %1154 = vrot.lane.b32.xlu1 %v6347_v47, %s5743_s17 }
 0x133   :  { %v6354_v10 = vpop.permute.xlu1 %552  ;;  %v6356_v21 = vpop.permute.xlu0 %566 }
 0x134   :  { %1170 = vrot.lane.b32.xlu1 %v6352_v60, %s5744_s18 }
 0x137   :  { %v6360_v42 = vpop.permute.xlu1 %568  ;;  %v6362_v38 = vpop.permute.xlu0 %582 }
 0x13b   :  { %v6364_v28 = vpop.permute.xlu1 %584  ;;  %v463_v36 = vpop.permute.xlu0 %462 }
 0x13c   :  { %v597_v52 = vsel %vm596_vm6, %v6130_v30, %v463_v36 }
 0x13d   :  { %v600_v15 = vsel %vm599_vm7, %v597_v52, %v471_v19 }
 0x13f   :  { %v465_v8 = vpop.permute.xlu1 %464  ;;  %v479_v43 = vpop.permute.xlu0 %478 }
 0x140   :  { %v598_v27 = vsel %vm596_vm6, %v6140_v40, %v465_v8  ;;  %v603_v48 = vsel %vm8651_vm8, %v600_v15, %v479_v43 }
 0x141   :  { %v601_v46 = vsel %vm599_vm7, %v598_v27, %v473_v57  ;;  %v606_v0 = vsel %vm605_vm9, %v603_v48, %v487_v62 }
 0x143   :  { %v481_v58 = vpop.permute.xlu1 %480  ;;  %v495_v22 = vpop.permute.xlu0 %494 }
 0x144   :  { %v604_v30 = vsel %vm8651_vm8, %v601_v46, %v481_v58  ;;  %v609_v36 = vsel %vm8650_vm10, %v606_v0, %v495_v22 }
 0x145   :  { %v612_v19 = vsel %vm8649_vm11, %v609_v36, %v503_v13  ;;  %v607_v40 = vsel %vm605_vm9, %v604_v30, %v489_v31 }
 0x147   :  { %v497_v52 = vpop.permute.xlu1 %496  ;;  %v511_v8 = vpop.permute.xlu0 %510 }
 0x148   :  { %v610_v15 = vsel %vm8650_vm10, %v607_v40, %v497_v52  ;;  %v615_v57 = vsel %vm8647_vm12, %v612_v19, %v511_v8  ;;  %v618_v43 = vsel %vm8648_vm13, %v511_v8, %v519_v55 }
 0x149   :  { %647 = vst [vmem:[#allocation3] sm:$0x7] %v615_v57  ;;  %v613_v62 = vsel %vm8649_vm11, %v610_v15, %v505_v54 }
 0x14b   :  { %v513_v27 = vpop.permute.xlu1 %512  ;;  %v527_v48 = vpop.permute.xlu0 %526 }
 0x14c   :  { %v616_v46 = vsel %vm8647_vm12, %v613_v62, %v513_v27  ;;  %v621_v13 = vsel %vm8646_vm14, %v618_v43, %v527_v48  ;;  %v619_v31 = vsel %vm8648_vm13, %v513_v27, %v521_v1 }
 0x14d   :  { %651 = vst [vmem:[#allocation3 + $0x60] sm:$0x7] %v616_v46  ;;  %v624_v0 = vsel %vm8644_vm15, %v621_v13, %v535_v3 }
 0x14f   :  { %v529_v58 = vpop.permute.xlu1 %528  ;;  %v543_v22 = vpop.permute.xlu0 %542 }
 0x150   :  { %v622_v30 = vsel %vm8646_vm14, %v619_v31, %v529_v58  ;;  %v627_v54 = vsel %vm8643_vm0, %v624_v0, %v543_v22 }
 0x151   :  { %v625_v55 = vsel %vm8644_vm15, %v622_v30, %v537_v11  ;;  %v630_v19 = vsel %vm629_vm1, %v627_v54, %v551_v12  ;;  %vm8645_vm15 = vcmask 550912  }
 0x153   :  { %v545_v36 = vpop.permute.xlu1 %544  ;;  %v559_v40 = vpop.permute.xlu0 %558 }
 0x154   :  { %v628_v52 = vsel %vm8643_vm0, %v625_v55, %v545_v36  ;;  %v633_v1 = vsel %vm632_vm2, %v630_v19, %v559_v40  ;;  %vm644_vm0 = vcmask 408576  }
 0x155   :  { %v636_v3 = vsel %vm635_vm3, %v633_v1, %v6356_v21  ;;  %v631_v8 = vsel %vm629_vm1, %v628_v52, %v6354_v10 }
 0x156   :  { %648 = vst [vmem:[#allocation3 + $0x8] sm:$0x7] %v636_v3 }
 0x157   :  { %v561_v15 = vpop.permute.xlu1 %560  ;;  %v575_v57 = vpop.permute.xlu0 %574 }
 0x158   :  { %v634_v11 = vsel %vm632_vm2, %v631_v8, %v561_v15  ;;  %v639_v12 = vsel %vm638_vm4, %v6356_v21, %v575_v57  ;;  %v6441_v8 = vrot.slane %v773_v35, %v6006_v59 }
 0x159   :  { %v637_v62 = vsel %vm635_vm3, %v634_v11, %v6360_v42  ;;  %v642_v27 = vsel %vm641_vm5, %v639_v12, %v6362_v38 }
 0x15a   :  { %652 = vst [vmem:[#allocation3 + $0x68] sm:$0x7] %v637_v62  ;;  %v805_v11 = vcombine.high %v6441_v8, %v8659_v2 }
 0x15b   :  { %v577_v43 = vpop.permute.xlu1 %576  ;;  %v591_v48 = vpop.permute.xlu0 %590 }
 0x15c   :  { %v640_v10 = vsel %vm638_vm4, %v6360_v42, %v577_v43  ;;  %v645_v46 = vsel %vm644_vm0, %v642_v27, %v591_v48  ;;  %v1345_v42 = vcombine.high %v6298_v14, %v8659_v2  ;;  %v806_v43 = vcombine.high %v6234_v25, %v8659_v2 }
 0x15d   :  { %650 = vst.msk [vmem:[#allocation3 + $0x10] sm:$0x7] %vm8645_vm15, %v645_v46  ;;  %v643_v21 = vsel %vm641_vm5, %v640_v10, %v6364_v28  ;;  %v1352_v28 = vrot.slane %v6298_v14, %v5982_v50  ;;  %v807_v48 = vcombine.high %v6243_v49, %v8659_v2 }
 0x15e   :  { %v6428_v19 = vrot.slane %v1345_v42, %v5982_v50  ;;  %v872_v42 = vcombine.high %v6266_v53, %v8659_v2 }
 0x15f   :  { %v593_v13 = vpop.permute.xlu1 %592  ;;  %v6409_v31 = vpop.permute.xlu0 %1285 }
 0x160   :  { %v646_v58 = vsel %vm644_vm0, %v643_v21, %v593_v13 }
 0x161   :  { %653 = vst.msk [vmem:[#allocation3 + $0x70] sm:$0x7] %vm8645_vm15, %v646_v58  ;;  %v808_v58 = vcombine.high %v6249_v23, %v8659_v2  ;;  %v6484_v23 = vrot.slane %v925_v56, %v6006_v59  ;;  %v959_v56 = vcombine.high %v6295_v37, %v8659_v2  ;;  %v1024_v37 = vcombine.high %v6323_v41, %v8659_v2 }
 0x162   :  { %vm8685_vm15 = vcmask 424960  }
 0x163   :  { %v6413_v0 = vpop.permute.xlu1 %1287  ;;  %v1290_v38 = vpop.permute.xlu0 %1289  ;;  %v957_v53 = vcombine.high %v6484_v23, %v8659_v2 }
 0x164   :  { %v1329_v22 = vcombine.low %v6263_v51, %v1290_v38  ;;  %v1330_v30 = vcombine.high %v6263_v51, %v1290_v38 }
 0x166   :  { %v1337_v54 = vrot.slane %v1329_v22, %v5982_v50  ;;  %v6423_v55 = vrot.slane %v1330_v30, %v5982_v50  ;;  %v873_v30 = vcombine.high %v6287_v9, %v8659_v2  ;;  %v875_v9 = vcombine.high %v6314_v63, %v8659_v2 }
 0x167   :  { %v6425_v36 = vpop.permute.xlu1 %1291  ;;  %v6430_v52 = vpop.permute.xlu0 %1293 }
 0x168   :  { %v1361_v40 = vcombine.high %v1337_v54, %v1352_v28  ;;  %v1376_v1 = vcombine.low %v6423_v55, %v6428_v19  ;;  %v1377_v41 = vcombine.high %v6423_v55, %v6428_v19  ;;  %v1419_v55 = vrot.slane %v6409_v31, %v5982_v50 }
 0x16a   :  { %v1375_v51 = vrot.slane %v1361_v40, %v6006_v59  ;;  %v1384_v14 = vrot.slane %v1376_v1, %v6006_v59  ;;  %v1360_v40 = vcombine.low %v1337_v54, %v1352_v28  ;;  %v1026_v28 = vcombine.high %v6341_v61, %v8659_v2 }
 0x16b   :  { %v1296_v3 = vpop.permute.xlu1 %1295  ;;  %v6443_v15 = vpop.permute.xlu0 %1297  ;;  %v1396_v54 = vcombine.low %v6282_v4, %v6425_v36  ;;  %v1391_v61 = vrot.slane %v1377_v41, %v6006_v59 }
 0x16c   :  { %1643 = vrot.lane.b32.xlu0 %v1375_v51, %s5737_s11  ;;  %v6512_v1 = vrot.slane %v1360_v40, %v6006_v59  ;;  %v1393_v18 = vcombine.high %v1375_v51, %v8659_v2  ;;  %v1463_v40 = vcombine.low %v6284_v34, %v6430_v52 }
 0x16d   :  { %v1404_v51 = vrot.slane %v1396_v54, %v5982_v50  ;;  %v1395_v47 = vcombine.high %v1391_v61, %v8659_v2 }
 0x16e   :  { %v1392_v63 = vcombine.high %v6512_v1, %v8659_v2 }
 0x16f   :  { %v6445_v57 = vpop.permute.xlu1 %1299  ;;  %v1302_v62 = vpop.permute.xlu0 %1301 }
 0x170   :  { %1659 = vrot.lane.b32.xlu0 %v1384_v14, %s5738_s12  ;;  %v1497_v7 = vcombine.high %v1302_v62, %v8659_v2  ;;  %v1504_v10 = vrot.slane %v1302_v62, %v5982_v50  ;;  %v1427_v62 = vcombine.low %v1404_v51, %v1419_v55 }
 0x172   :  { %v6465_v13 = vrot.slane %v1497_v7, %v5982_v50  ;;  %v1435_v7 = vrot.slane %v1427_v62, %v6006_v59 }
 0x173   :  { %v6450_v12 = vpop.permute.xlu1 %1303  ;;  %v6542_v19 = vpop.permute.xlu0 %1305 }
 0x174   :  { %1048 = vrot.lane.b32.xlu0 %v805_v11, %s5745_s19 }
 0x177   :  { %v1308_v33 = vpop.permute.xlu1 %1307 }
 0x178   :  { %v1481_v35 = vcombine.low %v1296_v3, %v1308_v33  ;;  %v1482_v27 = vcombine.high %v1296_v3, %v1308_v33  ;;  %1064 = vrot.lane.b32.xlu0 %v806_v43, %s5746_s20  ;;  %v1394_v3 = vcombine.high %v1384_v14, %v8659_v2  ;;  %v1045_v14 = vcombine.high %v6352_v60, %v8659_v2  ;;  %v1310_v33 = vpop.permute.xlu0 %1309 }
 0x179   :  { %v1397_v60 = vcombine.high %v6282_v4, %v6425_v36  ;;  %v1548_v4 = vcombine.low %v6443_v15, %v1310_v33  ;;  %v1549_v34 = vcombine.high %v6443_v15, %v1310_v33 }
 0x17a   :  { %v1489_v46 = vrot.slane %v1481_v35, %v5982_v50  ;;  %v6462_v21 = vrot.slane %v1482_v27, %v5982_v50  ;;  %v1428_v27 = vcombine.high %v1404_v51, %v1419_v55  ;;  %v1564_v51 = vcombine.high %v6450_v12, %v8659_v2 }
 0x17c   :  { %v1513_v25 = vcombine.high %v1489_v46, %v1504_v10  ;;  %1080 = vrot.lane.b32.xlu0 %v807_v48, %s5747_s21  ;;  %v1528_v38 = vcombine.low %v6462_v21, %v6465_v13  ;;  %v1512_v11 = vcombine.low %v1489_v46, %v1504_v10  ;;  %v1459_v48 = vcombine.high %v1435_v7, %v8659_v2 }
 0x17d   :  { %v1412_v46 = vcombine.high %v6409_v31, %v8659_v2  ;;  %v1442_v36 = vrot.slane %v1428_v27, %v6006_v59 }
 0x17e   :  { %v1527_v49 = vrot.slane %v1513_v25, %v6006_v59  ;;  %v6478_v22 = vrot.slane %v1528_v38, %v6006_v59  ;;  %v6550_v43 = vrot.slane %v1512_v11, %v6006_v59  ;;  %v6565_v25 = vpop.permute.xlu0 %1056  ;;  %v1529_v38 = vcombine.high %v6462_v21, %v6465_v13 }
 0x17f   :  { %v1426_v31 = vrot.slane %v1412_v46, %v5982_v50  ;;  %v1460_v21 = vcombine.high %v1442_v36, %v8659_v2 }
 0x180   :  { %1096 = vrot.lane.b32.xlu0 %v808_v58, %s5736_s10  ;;  %1645 = vrot.lane.b32.xlu1 %v1527_v49, %s5737_s11  ;;  %v1544_v35 = vcombine.high %v6550_v43, %v8659_v2  ;;  %v1545_v10 = vcombine.high %v1527_v49, %v8659_v2  ;;  %v1411_v58 = vrot.slane %v1397_v60, %v5982_v50 }
 0x181   :  { %v1546_v49 = vcombine.high %v6478_v22, %v8659_v2  ;;  %v1543_v13 = vrot.slane %v1529_v38, %v6006_v59 }
 0x184   :  { %1112 = vrot.lane.b32.xlu0 %v872_v42, %s5748_s22  ;;  %1661 = vrot.lane.b32.xlu1 %v6478_v22, %s5738_s12  ;;  %v1443_v42 = vcombine.low %v1411_v58, %v1426_v31 }
 0x188   :  { %1128 = vrot.lane.b32.xlu0 %v873_v30, %s5749_s23  ;;  %1050 = vrot.lane.b32.xlu1 %v957_v53, %s5745_s19  ;;  %v1556_v30 = vrot.slane %v1548_v4, %v5982_v50  ;;  %v6580_v53 = vpop.permute.xlu0 %1072 }
 0x18c   :  { %1144 = vrot.lane.b32.xlu0 %v874_v44, %s5750_s24  ;;  %1066 = vrot.lane.b32.xlu1 %v958_v32, %s5746_s20  ;;  %v1571_v32 = vrot.slane %v6450_v12, %v5982_v50  ;;  %v1451_v44 = vrot.slane %v1443_v42, %v6006_v59  ;;  %v1578_v12 = vrot.slane %v1564_v51, %v5982_v50 }
 0x18e   :  { %v1579_v22 = vcombine.low %v1556_v30, %v1571_v32  ;;  %v1580_v52 = vcombine.high %v1556_v30, %v1571_v32  ;;  %v6657_v32 = vld [vmem:[#allocation2 + $0x49] sm:$0xff] }
 0x190   :  { %1160 = vrot.lane.b32.xlu0 %v875_v9, %s5751_s25  ;;  %1082 = vrot.lane.b32.xlu1 %v959_v56, %s5747_s21  ;;  %v1547_v56 = vcombine.high %v1543_v13, %v8659_v2  ;;  %v6590_v9 = vpop.permute.xlu0 %1088 }
 0x194   :  { %1176 = vrot.lane.b32.xlu0 %v893_v20, %s5752_s26  ;;  %1098 = vrot.lane.b32.xlu1 %v960_v24, %s5736_s10  ;;  %v1444_v24 = vcombine.high %v1411_v58, %v1426_v31  ;;  %v1461_v20 = vcombine.high %v1451_v44, %v8659_v2  ;;  %v6608_v54 = vpop.permute.xlu0 %1104 }
 0x198   :  { %1635 = vrot.lane.b32.xlu0 %v1392_v63, %s5745_s19  ;;  %1114 = vrot.lane.b32.xlu1 %v1024_v37, %s5748_s22  ;;  %v1587_v37 = vrot.slane %v1579_v22, %v6006_v59  ;;  %v6598_v63 = vld [vmem:[#allocation2 + $0x31] sm:$0xff]  ;;  %v6626_v33 = vpop.permute.xlu0 %1120  ;;  %v6659_v22 = vld [vmem:[#allocation2 + $0x79] sm:$0xff] }
 0x19c   :  { %1651 = vrot.lane.b32.xlu0 %v1393_v18, %s5746_s20  ;;  %1130 = vrot.lane.b32.xlu1 %v1025_v29, %s5749_s23  ;;  %v1312_v29 = vpop.permute.xlu1 %1311  ;;  %v6602_v18 = vld [vmem:[#allocation2 + $0x1] sm:$0xff] }
 0x19d   :  { %v1851_v41 = vcombine.low %v6602_v18, %v6598_v63  ;;  %v1615_v30 = vcombine.low %v6445_v57, %v1312_v29  ;;  %v2003_v29 = vcombine.low %v6657_v32, %v6659_v22 }
 0x19f   :  { %v1859_v15 = vrot.slane %v1851_v41, %v5982_v50  ;;  %v1622_v57 = vrot.slane %v1615_v30, %v5982_v50 }
 0x1a0   :  { %1667 = vrot.lane.b32.xlu0 %v1394_v3, %s5747_s21  ;;  %1146 = vrot.lane.b32.xlu1 %v1026_v28, %s5750_s24  ;;  %v1470_v28 = vrot.slane %v1463_v40, %v5982_v50  ;;  %v1458_v3 = vrot.slane %v1444_v24, %v6006_v59  ;;  %v6614_v11 = vpop.permute.xlu1 %1058 }
 0x1a2   :  { %v1472_v55 = vcombine.low %v1470_v28, %v6413_v0  ;;  %v1462_v62 = vcombine.high %v1458_v3, %v8659_v2  ;;  %v6676_v28 = vld [vmem:[#allocation2 + $0x61] sm:$0xff] }
 0x1a4   :  { %1675 = vrot.lane.b32.xlu0 %v1391_v61, %s5739_s13  ;;  %1162 = vrot.lane.b32.xlu1 %v1027_v45, %s5751_s25  ;;  %v1611_v45 = vcombine.high %v1587_v37, %v8659_v2  ;;  %v6618_v61 = vld [vmem:[#allocation2 + $0x19] sm:$0xff]  ;;  %v6632_v60 = vpop.permute.xlu1 %1074  ;;  %v1479_v0 = vrot.slane %v1472_v55, %v6006_v59 }
 0x1a5   :  { %v1867_v31 = vcombine.high %v6618_v61, %v8659_v2 }
 0x1a6   :  { %v1480_v46 = vcombine.high %v1479_v0, %v8659_v2 }
 0x1a7   :  { %v1881_v40 = vrot.slane %v1867_v31, %v5982_v50 }
 0x1a8   :  { %1683 = vrot.lane.b32.xlu0 %v1395_v47, %s5736_s10  ;;  %1178 = vrot.lane.b32.xlu1 %v1045_v14, %s5752_s26  ;;  %v1563_v14 = vrot.slane %v1549_v34, %v5982_v50  ;;  %v1594_v47 = vrot.slane %v1580_v52, %v6006_v59  ;;  %v6645_v4 = vpop.permute.xlu1 %1090  ;;  %v2026_v34 = vrot.slane %v6676_v28, %v5982_v50 }
 0x1a9   :  { %v1624_v52 = vcombine.low %v1622_v57, %v6542_v19 }
 0x1aa   :  { %v1612_v27 = vcombine.high %v1594_v47, %v8659_v2  ;;  %v1596_v42 = vcombine.high %v1563_v14, %v1578_v12 }
 0x1ab   :  { %v1631_v19 = vrot.slane %v1624_v52, %v6006_v59 }
 0x1ac   :  { %1691 = vrot.lane.b32.xlu0 %v1435_v7, %s5740_s14  ;;  %1637 = vrot.lane.b32.xlu1 %v1544_v35, %s5745_s19  ;;  %v1874_v7 = vrot.slane %v6618_v61, %v5982_v50  ;;  %v1595_v35 = vcombine.low %v1563_v14, %v1578_v12  ;;  %v6668_v24 = vpop.permute.xlu1 %1106  ;;  %v6694_v12 = vld [vmem:[#allocation2 + $0x39] sm:$0xff] }
 0x1ae   :  { %v1603_v58 = vrot.slane %v1595_v35, %v6006_v59 }
 0x1b0   :  { %1699 = vrot.lane.b32.xlu0 %v1459_v48, %s5748_s22  ;;  %1653 = vrot.lane.b32.xlu1 %v1545_v10, %s5746_s20  ;;  %v1882_v48 = vcombine.low %v1859_v15, %v1874_v7  ;;  %v6638_v10 = vpop.permute.xlu0 %1136  ;;  %v6686_v55 = vpop.permute.xlu1 %1122 }
 0x1b2   :  { %v6643_v38 = vrot.slane %v1882_v48, %v6006_v59 }
 0x1b4   :  { %1707 = vrot.lane.b32.xlu0 %v1442_v36, %s5741_s15  ;;  %1669 = vrot.lane.b32.xlu1 %v1546_v49, %s5747_s21  ;;  %v1883_v36 = vcombine.high %v1859_v15, %v1874_v7  ;;  %v1852_v49 = vcombine.high %v6602_v18, %v6598_v63  ;;  %v2011_v15 = vrot.slane %v2003_v29, %v5982_v50  ;;  %v6698_v7 = vld [vmem:[#allocation2 + $0x9] sm:$0xff] }
 0x1b8   :  { %1715 = vrot.lane.b32.xlu0 %v1460_v21, %s5749_s23  ;;  %1677 = vrot.lane.b32.xlu1 %v1543_v13, %s5739_s13  ;;  %v1914_v21 = vcombine.high %v6643_v38, %v8659_v2  ;;  %v1613_v13 = vcombine.high %v1603_v58, %v8659_v2 }
 0x1bc   :  { %1723 = vrot.lane.b32.xlu0 %v1451_v44, %s5742_s16  ;;  %1685 = vrot.lane.b32.xlu1 %v1547_v56, %s5736_s10  ;;  %v6661_v44 = vpop.permute.xlu0 %1152  ;;  %v1866_v56 = vrot.slane %v1852_v49, %v5982_v50  ;;  %v6713_v49 = vld [vmem:[#allocation2 + $0x21] sm:$0xff] }
 0x1be   :  { %v1898_v41 = vcombine.low %v1866_v56, %v1881_v40  ;;  %v1899_v35 = vcombine.high %v1866_v56, %v1881_v40  ;;  %v2004_v56 = vcombine.high %v6657_v32, %v6659_v22  ;;  %v2019_v40 = vcombine.high %v6676_v28, %v8659_v2 }
 0x1c0   :  { %1731 = vrot.lane.b32.xlu0 %v1461_v20, %s5750_s24  ;;  %1693 = vrot.lane.b32.xlu1 %v1587_v37, %s5740_s14  ;;  %v1897_v20 = vrot.slane %v1883_v36, %v6006_v59  ;;  %v1610_v37 = vrot.slane %v1596_v42, %v6006_v59  ;;  %v1913_v31 = vrot.slane %v1899_v35, %v6006_v59 }
 0x1c2   :  { %v1614_v51 = vcombine.high %v1610_v37, %v8659_v2  ;;  %v1917_v29 = vcombine.high %v1913_v31, %v8659_v2 }
 0x1c4   :  { %1739 = vrot.lane.b32.xlu0 %v1458_v3, %s5743_s17  ;;  %1701 = vrot.lane.b32.xlu1 %v1611_v45, %s5748_s22  ;;  %v6681_v3 = vpop.permute.xlu0 %1168  ;;  %v1915_v45 = vcombine.high %v1897_v20, %v8659_v2 }
 0x1c8   :  { %1747 = vrot.lane.b32.xlu0 %v1462_v62, %s5751_s25  ;;  %1709 = vrot.lane.b32.xlu1 %v1594_v47, %s5741_s15  ;;  %v1906_v62 = vrot.slane %v1898_v41, %v6006_v59  ;;  %v2034_v47 = vcombine.low %v2011_v15, %v2026_v34 }
 0x1ca   :  { %v6709_v36 = vrot.slane %v2034_v47, %v6006_v59 }
 0x1cc   :  { %1755 = vrot.lane.b32.xlu0 %v1479_v0, %s5744_s18  ;;  %1717 = vrot.lane.b32.xlu1 %v1612_v27, %s5749_s23  ;;  %v1918_v0 = vcombine.low %v6698_v7, %v6694_v12  ;;  %v6702_v27 = vpop.permute.xlu1 %1138 }
 0x1ce   :  { %v1926_v42 = vrot.slane %v1918_v0, %v5982_v50 }
 0x1d0   :  { %1763 = vrot.lane.b32.xlu0 %v1480_v46, %s5752_s26  ;;  %1725 = vrot.lane.b32.xlu1 %v1603_v58, %s5742_s16  ;;  %v1916_v46 = vcombine.high %v1906_v62, %v8659_v2  ;;  %v1632_v58 = vcombine.high %v1631_v19, %v8659_v2 }
 0x1d4   :  { %2157 = vrot.lane.b32.xlu0 %v1914_v21, %s5745_s19  ;;  %1733 = vrot.lane.b32.xlu1 %v1613_v13, %s5750_s24  ;;  %v2066_v21 = vcombine.high %v6709_v36, %v8659_v2  ;;  %v2035_v13 = vcombine.high %v2011_v15, %v2026_v34 }
 0x1d8   :  { %2165 = vrot.lane.b32.xlu0 %v1897_v20, %s5737_s11  ;;  %1741 = vrot.lane.b32.xlu1 %v1610_v37, %s5743_s17  ;;  %v1941_v20 = vrot.slane %v6713_v49, %v5982_v50  ;;  %v6727_v37 = vpop.permute.xlu1 %1154 }
 0x1da   :  { %v1949_v41 = vcombine.low %v1926_v42, %v1941_v20 }
 0x1dc   :  { %2173 = vrot.lane.b32.xlu0 %v1915_v45, %s5746_s20  ;;  %1749 = vrot.lane.b32.xlu1 %v1614_v51, %s5751_s25  ;;  %v2049_v45 = vrot.slane %v2035_v13, %v6006_v59  ;;  %v2033_v51 = vrot.slane %v2019_v40, %v5982_v50  ;;  %v1950_v40 = vcombine.high %v1926_v42, %v1941_v20 }
 0x1de   :  { %v6690_v14 = vpop.permute.xlu0 %1643  ;;  %v2067_v35 = vcombine.high %v2049_v45, %v8659_v2 }
 0x1e0   :  { %2181 = vrot.lane.b32.xlu0 %v1906_v62, %s5738_s12  ;;  %1757 = vrot.lane.b32.xlu1 %v1631_v19, %s5744_s18  ;;  %v6740_v62 = vpop.permute.xlu1 %1170 }
 0x1e2   :  { %v6704_v48 = vpop.permute.xlu0 %1659 }
 0x1e4   :  { %2189 = vrot.lane.b32.xlu0 %v1916_v46, %s5747_s21  ;;  %1765 = vrot.lane.b32.xlu1 %v1632_v58, %s5752_s26  ;;  %v1919_v58 = vcombine.high %v6698_v7, %v6694_v12 }
 0x1e6   :  { %v1049_v30 = vpop.permute.xlu0 %1048 }
 0x1e7   :  { %v1182_v57 = vsel %vm596_vm6, %v6441_v8, %v1049_v30  ;;  %v2018_v8 = vrot.slane %v2004_v56, %v5982_v50 }
 0x1e8   :  { %2197 = vrot.lane.b32.xlu0 %v1913_v31, %s5739_s13  ;;  %2159 = vrot.lane.b32.xlu1 %v2066_v21, %s5745_s19  ;;  %v1184_v34 = vsel %vm599_vm7, %v1182_v57, %v6565_v25  ;;  %v1957_v25 = vrot.slane %v1949_v41, %v6006_v59  ;;  %v1934_v31 = vcombine.high %v6713_v49, %v8659_v2  ;;  %v6759_v57 = vld [vmem:[#allocation2 + $0x51] sm:$0xff] }
 0x1e9   :  { %v2050_v0 = vcombine.low %v2018_v8, %v2033_v51 }
 0x1ea   :  { %v1065_v52 = vpop.permute.xlu0 %1064  ;;  %v1981_v13 = vcombine.high %v1957_v25, %v8659_v2 }
 0x1eb   :  { %v1186_v15 = vsel %vm8651_vm8, %v1184_v34, %v1065_v52  ;;  %v2058_v56 = vrot.slane %v2050_v0, %v6006_v59  ;;  %v1948_v52 = vrot.slane %v1934_v31, %v5982_v50  ;;  %v6779_v0 = vld [vmem:[#allocation2 + $0x69] sm:$0xff] }
 0x1ec   :  { %2205 = vrot.lane.b32.xlu0 %v1917_v29, %s5736_s10  ;;  %2167 = vrot.lane.b32.xlu1 %v2049_v45, %s5737_s11  ;;  %v1188_v19 = vsel %vm605_vm9, %v1186_v15, %v6580_v53  ;;  %v6761_v29 = vld [vmem:[#allocation2 + $0x81] sm:$0xff] }
 0x1ed   :  { %v2070_v45 = vcombine.low %v6759_v57, %v6761_v29 }
 0x1ee   :  { %v1081_v47 = vpop.permute.xlu0 %1080 }
 0x1ef   :  { %v1190_v46 = vsel %vm8650_vm10, %v1188_v19, %v1081_v47  ;;  %v1964_v19 = vrot.slane %v1950_v40, %v6006_v59  ;;  %v2068_v47 = vcombine.high %v2058_v56, %v8659_v2 }
 0x1f0   :  { %2213 = vrot.lane.b32.xlu0 %v1957_v25, %s5740_s14  ;;  %2175 = vrot.lane.b32.xlu1 %v2067_v35, %s5746_s20  ;;  %v1192_v53 = vsel %vm8649_vm11, %v1190_v46, %v6590_v9  ;;  %v1933_v9 = vrot.slane %v1919_v58, %v5982_v50  ;;  %v2051_v25 = vcombine.high %v2018_v8, %v2033_v51 }
 0x1f1   :  { %v2078_v51 = vrot.slane %v2070_v45, %v5982_v50 }
 0x1f2   :  { %v6755_v30 = vpop.permute.xlu1 %1645  ;;  %v1097_v21 = vpop.permute.xlu0 %1096  ;;  %v1965_v46 = vcombine.low %v1933_v9, %v1948_v52  ;;  %v2065_v8 = vrot.slane %v2051_v25, %v6006_v59  ;;  %v1966_v25 = vcombine.high %v1933_v9, %v1948_v52 }
 0x1f3   :  { %v1194_v41 = vsel %vm8647_vm12, %v1192_v53, %v1097_v21  ;;  %v1196_v42 = vsel %vm8648_vm13, %v1097_v21, %v6608_v54  ;;  %v2093_v54 = vrot.slane %v6779_v0, %v5982_v50  ;;  %v1982_v21 = vcombine.high %v1964_v19, %v8659_v2 }
 0x1f4   :  { %v1222_v34 = vrot.slane %v1194_v41, 5  ;;  %2221 = vrot.lane.b32.xlu0 %v1981_v13, %s5748_s22  ;;  %2183 = vrot.lane.b32.xlu1 %v2058_v56, %s5738_s12  ;;  %v1973_v40 = vrot.slane %v1965_v46, %v6006_v59  ;;  %v2069_v45 = vcombine.high %v2065_v8, %v8659_v2  ;;  %v1980_v9 = vrot.slane %v1966_v25, %v6006_v59 }
 0x1f5   :  { %v2102_v52 = vcombine.high %v2078_v51, %v2093_v54 }
 0x1f6   :  { %1234 = vst [vmem:[#allocation3] sm:$0x38] %v1222_v34  ;;  %v6772_v20 = vpop.permute.xlu1 %1661  ;;  %v1113_v15 = vpop.permute.xlu0 %1112 }
 0x1f7   :  { %v1198_v35 = vsel %vm8646_vm14, %v1196_v42, %v1113_v15  ;;  %vm8686_vm14 = vcmask 572416   ;;  %v2101_v15 = vcombine.low %v2078_v51, %v2093_v54 }
 0x1f8   :  { %2229 = vrot.lane.b32.xlu0 %v1964_v19, %s5741_s15  ;;  %2191 = vrot.lane.b32.xlu1 %v2068_v47, %s5747_s21  ;;  %v1200_v31 = vsel %vm8685_vm15, %v1198_v35, %v6626_v33  ;;  %v5692_v35 = vld [vmem:[#allocation2 + $0x11] ss:$48 sps:$4 sm:$0x33]   ;;  %vm8687_vm15 = vcmask 277504  }
 0x1fa   :  { %v1051_v58 = vpop.permute.xlu1 %1050  ;;  %v1129_v53 = vpop.permute.xlu0 %1128 }
 0x1fb   :  { %v1183_v13 = vsel %vm596_vm6, %v6484_v23, %v1051_v58  ;;  %v1202_v56 = vsel %vm8686_vm14, %v1200_v31, %v1129_v53  ;;  %v1983_v31 = vcombine.high %v1973_v40, %v8659_v2  ;;  %v2109_v53 = vrot.slane %v2101_v15, %v6006_v59 }
 0x1fc   :  { %2237 = vrot.lane.b32.xlu0 %v1982_v21, %s5749_s23  ;;  %2199 = vrot.lane.b32.xlu1 %v2065_v8, %s5739_s13  ;;  %v1185_v33 = vsel %vm599_vm7, %v1183_v13, %v6614_v11  ;;  %v1204_v34 = vsel %vm629_vm1, %v1202_v56, %v6638_v10  ;;  %v2071_v13 = vcombine.high %v6759_v57, %v6761_v29  ;;  %vm1236_vm14 = vcmask 553987  }
 0x1fe   :  { %v1067_v41 = vpop.permute.xlu1 %1066  ;;  %v1145_v42 = vpop.permute.xlu0 %1144  ;;  %v2085_v25 = vrot.slane %v2071_v13, %v5982_v50 }
 0x1ff   :  { %v1187_v23 = vsel %vm8651_vm8, %v1185_v33, %v1067_v41  ;;  %v1206_v19 = vsel %vm632_vm2, %v1204_v34, %v1145_v42  ;;  %v2133_v41 = vcombine.high %v2109_v53, %v8659_v2  ;;  %v1993_v34 = vld [vmem:[#allocation2 + $0x29] sm:$0x3]  ;;  %v2086_v42 = vcombine.high %v6779_v0, %v8659_v2 }
 0x200   :  { %v1208_v47 = vsel %vm635_vm3, %v1206_v19, %v6661_v44  ;;  %2245 = vrot.lane.b32.xlu0 %v1973_v40, %s5742_s16  ;;  %2207 = vrot.lane.b32.xlu1 %v2069_v45, %s5736_s10  ;;  %v1189_v10 = vsel %vm605_vm9, %v1187_v23, %v6632_v60  ;;  %v1992_v60 = vrot.slane %v5692_v35, %v5982_v50 }
 0x201   :  { %v1223_v11 = vrot.slane %v1208_v47, 5  ;;  %v2100_v35 = vrot.slane %v2086_v42, %v5982_v50 }
 0x202   :  { %v1083_v46 = vpop.permute.xlu1 %1082  ;;  %v1161_v58 = vpop.permute.xlu0 %1160 }
 0x203   :  { %1235 = vst [vmem:[#allocation3 + $0x8] sm:$0x38] %v1223_v11  ;;  %v1191_v21 = vsel %vm8650_vm10, %v1189_v10, %v1083_v46  ;;  %v1210_v8 = vsel %vm638_vm4, %v6661_v44, %v1161_v58  ;;  %v1984_v11 = vcombine.high %v1980_v9, %v8659_v2 }
 0x204   :  { %2253 = vrot.lane.b32.xlu0 %v1983_v31, %s5750_s24  ;;  %2215 = vrot.lane.b32.xlu1 %v2109_v53, %s5740_s14  ;;  %v1193_v56 = vsel %vm8649_vm11, %v1191_v21, %v6645_v4  ;;  %v1212_v33 = vsel %vm641_vm5, %v1210_v8, %v6681_v3  ;;  %v2116_v4 = vrot.slane %v2102_v52, %v6006_v59 }
 0x205   :  { %v1994_v3 = vcombine.low %v1992_v60, %v1993_v34  ;;  %v2117_v21 = vcombine.low %v2085_v25, %v2100_v35 }
 0x206   :  { %v1099_v40 = vpop.permute.xlu1 %1098  ;;  %v1177_v44 = vpop.permute.xlu0 %1176  ;;  %v2134_v31 = vcombine.high %v2116_v4, %v8659_v2 }
 0x207   :  { %v1195_v54 = vsel %vm8647_vm12, %v1193_v56, %v1099_v40  ;;  %v1214_v51 = vsel %vm644_vm0, %v1212_v33, %v1177_v44  ;;  %v1197_v23 = vsel %vm8648_vm13, %v1099_v40, %v6668_v24  ;;  %vm8688_vm12 = vcmask 424960  }
 0x208   :  { %v1225_v45 = vrot.slane %v1195_v54, 5  ;;  %v1224_v15 = vrot.slane %v1214_v51, 5  ;;  %2261 = vrot.lane.b32.xlu0 %v1980_v9, %s5743_s17  ;;  %2223 = vrot.lane.b32.xlu1 %v2133_v41, %s5748_s22  ;;  %v2001_v53 = vrot.slane %v1994_v3, %v6006_v59  ;;  %vm8689_vm13 = vcmask 572416   ;;  %v5693_v51 = vld [vmem:[#allocation2 + $0x59] ss:$48 sps:$4 sm:$0x33]  }
 0x209   :  { %v2125_v13 = vrot.slane %v2117_v21, %v6006_v59  ;;  %v2118_v54 = vcombine.high %v2085_v25, %v2100_v35  ;;  %v2352_v25 = vld [vmem:[#allocation2 + $0x11] sm:$0x3] }
 0x20a   :  { %1238 = vst [vmem:[#allocation3 + $0x60] sm:$0x38] %v1225_v45  ;;  %1237 = vst.msk [vmem:[#allocation3 + $0x10] sm:$0x38] %vm1236_vm14, %v1224_v15  ;;  %v1115_v19 = vpop.permute.xlu1 %1114  ;;  %v1636_v47 = vpop.permute.xlu0 %1635  ;;  %v2002_v56 = vcombine.high %v2001_v53, %v8659_v2  ;;  %v2145_v35 = vld [vmem:[#allocation2 + $0x71] sm:$0x3] }
 0x20b   :  { %v1199_v10 = vsel %vm8687_vm15, %v1197_v23, %v1115_v19  ;;  %v1769_v9 = vsel %vm596_vm6, %v6512_v1, %v1636_v47  ;;  %v2135_v42 = vcombine.high %v2125_v13, %v8659_v2  ;;  %v2132_v47 = vrot.slane %v2118_v54, %v6006_v59 }
 0x20c   :  { %2231 = vrot.lane.b32.xlu1 %v2116_v4, %s5741_s15  ;;  %2269 = vrot.lane.b32.xlu0 %v1984_v11, %s5751_s25  ;;  %v1201_v24 = vsel %vm8688_vm12, %v1199_v10, %v6686_v55  ;;  %v1771_v33 = vsel %vm599_vm7, %v1769_v9, %v6690_v14  ;;  %vm8690_vm12 = vcmask 1031168  }
 0x20e   :  { %v1131_v46 = vpop.permute.xlu1 %1130  ;;  %v1652_v58 = vpop.permute.xlu0 %1651 }
 0x20f   :  { %v1203_v8 = vsel %vm8689_vm13, %v1201_v24, %v1131_v46  ;;  %v1773_v1 = vsel %vm8651_vm8, %v1771_v33, %v1652_v58  ;;  %v2136_v46 = vcombine.high %v2132_v47, %v8659_v2  ;;  %vm8691_vm13 = vmmov %vm8690_vm12 }
 0x210   :  { %2239 = vrot.lane.b32.xlu1 %v2134_v31, %s5749_s23  ;;  %2277 = vrot.lane.b32.xlu0 %v2001_v53, %s5744_s18  ;;  %v1205_v52 = vsel %vm629_vm1, %v1203_v8, %v6702_v27  ;;  %v1775_v45 = vsel %vm605_vm9, %v1773_v1, %v6704_v48 }
 0x212   :  { %v1147_v55 = vpop.permute.xlu1 %1146  ;;  %v1668_v60 = vpop.permute.xlu0 %1667 }
 0x213   :  { %v1207_v40 = vsel %vm632_vm2, %v1205_v52, %v1147_v55  ;;  %v1777_v15 = vsel %vm8650_vm10, %v1775_v45, %v1668_v60  ;;  %v2358_v60 = vld [vmem:[#allocation2 + $0x41] sm:$0x3] }
 0x214   :  { %v1209_v44 = vsel %vm635_vm3, %v1207_v40, %v6727_v37  ;;  %2247 = vrot.lane.b32.xlu1 %v2125_v13, %s5742_s16  ;;  %2285 = vrot.lane.b32.xlu0 %v2002_v56, %s5752_s26 }
 0x215   :  { %v1226_v27 = vrot.slane %v1209_v44, 5 }
 0x216   :  { %v1163_v41 = vpop.permute.xlu1 %1162  ;;  %v1676_v34 = vpop.permute.xlu0 %1675 }
 0x217   :  { %1239 = vst [vmem:[#allocation3 + $0x68] sm:$0x38] %v1226_v27  ;;  %v1211_v14 = vsel %vm638_vm4, %v6727_v37, %v1163_v41  ;;  %v1779_v4 = vsel %vm8649_vm11, %v1777_v15, %v1676_v34  ;;  %v2144_v37 = vrot.slane %v5693_v51, %v5982_v50  ;;  %v2355_v51 = vld [vmem:[#allocation2 + $0x29] sm:$0x3] }
 0x218   :  { %2255 = vrot.lane.b32.xlu1 %v2135_v42, %s5750_s24  ;;  %2386 = vrot.lane.b32.xlu0 %v6602_v18, %s5733_s0  ;;  %v1213_v3 = vsel %vm641_vm5, %v1211_v14, %v6740_v62  ;;  %v2364_v14 = vld [vmem:[#allocation2 + $0x71] sm:$0x3] }
 0x219   :  { %v2146_v58 = vcombine.low %v2144_v37, %v2145_v35 }
 0x21a   :  { %v1179_v23 = vpop.permute.xlu1 %1178  ;;  %v1684_v19 = vpop.permute.xlu0 %1683 }
 0x21b   :  { %v1215_v48 = vsel %vm644_vm0, %v1213_v3, %v1179_v23  ;;  %v1781_v11 = vsel %vm8690_vm12, %v1779_v4, %v1684_v19  ;;  %v2153_v21 = vrot.slane %v2146_v58, %v6006_v59  ;;  %vm8693_vm12 = vcmask 424960  }
 0x21c   :  { %v1227_v18 = vrot.slane %v1215_v48, 5  ;;  %v1809_v10 = vrot.slane %v1781_v11, 2  ;;  %2263 = vrot.lane.b32.xlu1 %v2132_v47, %s5743_s17  ;;  %2390 = vrot.lane.b32.xlu0 %v2352_v25, %s5733_s0  ;;  %v2361_v11 = vld [vmem:[#allocation2 + $0x59] sm:$0x3] }
 0x21d   :  { %v2154_v55 = vcombine.high %v2153_v21, %v8659_v2 }
 0x21e   :  { %1240 = vst.msk [vmem:[#allocation3 + $0x70] sm:$0x38] %vm1236_vm14, %v1227_v18  ;;  %1821 = vst [vmem:[#allocation3 + $0x18] ss:$-20 sps:$4 sm:$0xc1] %v1809_v10   ;;  %v1638_v62 = vpop.permute.xlu1 %1637  ;;  %v1692_v24 = vpop.permute.xlu0 %1691  ;;  %vm8692_vm14 = vcmask 130048  }
 0x21f   :  { %v1770_v8 = vsel %vm596_vm6, %v6550_v43, %v1638_v62 }
 0x220   :  { %2271 = vrot.lane.b32.xlu1 %v2136_v46, %s5751_s25  ;;  %2394 = vrot.lane.b32.xlu0 %v6713_v49, %s5733_s0  ;;  %v1772_v13 = vsel %vm599_vm7, %v1770_v8, %v6755_v30 }
 0x222   :  { %v1654_v31 = vpop.permute.xlu1 %1653  ;;  %v1700_v53 = vpop.permute.xlu0 %1699 }
 0x223   :  { %v1774_v56 = vsel %vm8651_vm8, %v1772_v13, %v1654_v31 }
 0x224   :  { %2279 = vrot.lane.b32.xlu1 %v2153_v21, %s5744_s18  ;;  %2398 = vrot.lane.b32.xlu0 %v6598_v63, %s5733_s0  ;;  %v1776_v63 = vsel %vm605_vm9, %v1774_v56, %v6772_v20  ;;  %v1783_v20 = vsel %vm8692_vm14, %v1684_v19, %v1692_v24 }
 0x225   :  { %v1785_v34 = vsel %vm8687_vm15, %v1783_v20, %v1700_v53 }
 0x226   :  { %v1670_v9 = vpop.permute.xlu1 %1669  ;;  %v1708_v52 = vpop.permute.xlu0 %1707 }
 0x227   :  { %v1778_v43 = vsel %vm8650_vm10, %v1776_v63, %v1670_v9  ;;  %v1787_v54 = vsel %vm8693_vm12, %v1785_v34, %v1708_v52  ;;  %vm8695_vm10 = vcmask 572416  }
 0x228   :  { %2287 = vrot.lane.b32.xlu1 %v2154_v55, %s5752_s26  ;;  %2402 = vrot.lane.b32.xlu0 %v2358_v60, %s5733_s0  ;;  %v2367_v55 = vld [vmem:[#allocation2 + $0x89] sm:$0x3] }
 0x22a   :  { %v1678_v40 = vpop.permute.xlu1 %1677  ;;  %v1716_v33 = vpop.permute.xlu0 %1715 }
 0x22b   :  { %v1780_v30 = vsel %vm8649_vm11, %v1778_v43, %v1678_v40  ;;  %vm8694_vm11 = vcmask 572416  }
 0x22c   :  { %2388 = vrot.lane.b32.xlu1 %v6698_v7, %s5733_s0  ;;  %2406 = vrot.lane.b32.xlu0 %v6759_v57, %s5733_s0  ;;  %v1789_v45 = vsel %vm8694_vm11, %v1787_v54, %v1716_v33  ;;  %vm1823_vm11 = vcmask 556038  }
 0x22e   :  { %v1686_v44 = vpop.permute.xlu1 %1685  ;;  %v1724_v1 = vpop.permute.xlu0 %1723 }
 0x22f   :  { %v1782_v27 = vsel %vm8691_vm13, %v1780_v30, %v1686_v44  ;;  %vm1827_vm13 = vcmask 548864  }
 0x230   :  { %v1812_v41 = vrot.slane %v1782_v27, 2  ;;  %2392 = vrot.lane.b32.xlu1 %v6618_v61, %s5733_s0  ;;  %2410 = vrot.lane.b32.xlu0 %v6676_v28, %s5733_s0  ;;  %v1791_v61 = vsel %vm629_vm1, %v1789_v45, %v1724_v1 }
 0x232   :  { %1829 = vst [vmem:[#allocation3 + $0x78] ss:$-20 sps:$4 sm:$0xc1] %v1812_v41   ;;  %v1694_v57 = vpop.permute.xlu1 %1693  ;;  %v1732_v42 = vpop.permute.xlu0 %1731 }
 0x233   :  { %v1793_v28 = vsel %vm632_vm2, %v1791_v61, %v1732_v42 }
 0x234   :  { %2396 = vrot.lane.b32.xlu1 %v2355_v51, %s5733_s0  ;;  %2414 = vrot.lane.b32.xlu0 %v2364_v14, %s5733_s0 }
 0x236   :  { %v1702_v15 = vpop.permute.xlu1 %1701  ;;  %v1740_v4 = vpop.permute.xlu0 %1739 }
 0x237   :  { %v1795_v3 = vsel %vm635_vm3, %v1793_v28, %v1740_v4 }
 0x238   :  { %v1810_v23 = vrot.slane %v1795_v3, 2  ;;  %2400 = vrot.lane.b32.xlu1 %v6694_v12, %s5733_s0  ;;  %2418 = vrot.lane.b32.xlu0 %v6761_v29, %s5733_s0 }
 0x23a   :  { %1822 = vst [vmem:[#allocation3 + $0x20] ss:$-20 sps:$4 sm:$0xc1] %v1810_v23   ;;  %v1710_v19 = vpop.permute.xlu1 %1709  ;;  %v1748_v47 = vpop.permute.xlu0 %1747 }
 0x23b   :  { %v1797_v25 = vsel %vm638_vm4, %v1740_v4, %v1748_v47 }
 0x23c   :  { %2404 = vrot.lane.b32.xlu1 %v6657_v32, %s5733_s0  ;;  %v1784_v32 = vsel %vm8692_vm14, %v1686_v44, %v1694_v57  ;;  %vm8697_vm14 = vcmask 883712  }
 0x23d   :  { %v1786_v24 = vsel %vm8687_vm15, %v1784_v32, %v1702_v15  ;;  %vm8698_vm15 = vcmask 1031168  }
 0x23e   :  { %v1718_v37 = vpop.permute.xlu1 %1717  ;;  %v1756_v48 = vpop.permute.xlu0 %1755  ;;  %v1788_v31 = vsel %vm8693_vm12, %v1786_v24, %v1710_v19  ;;  %vm8701_vm12 = vmmov %vm8698_vm15 }
 0x23f   :  { %v1799_v35 = vsel %vm641_vm5, %v1797_v25, %v1756_v48  ;;  %v1790_v53 = vsel %vm8695_vm10, %v1788_v31, %v1718_v37  ;;  %vm8696_vm10 = vcmask 736256  }
 0x240   :  { %2408 = vrot.lane.b32.xlu1 %v2361_v11, %s5733_s0 }
 0x242   :  { %v1726_v18 = vpop.permute.xlu1 %1725  ;;  %v1764_v12 = vpop.permute.xlu0 %1763 }
 0x243   :  { %v1801_v10 = vsel %vm644_vm0, %v1799_v35, %v1764_v12  ;;  %v1792_v21 = vsel %vm629_vm1, %v1790_v53, %v1726_v18 }
 0x244   :  { %v1811_v62 = vrot.slane %v1801_v10, 2  ;;  %2412 = vrot.lane.b32.xlu1 %v6779_v0, %s5733_s0 }
 0x246   :  { %1824 = vst.msk [vmem:[#allocation3 + $0x10] sm:$0xc0] %vm1823_vm11, %v1811_v62  ;;  %v1734_v46 = vpop.permute.xlu1 %1733  ;;  %v2158_v58 = vpop.permute.xlu0 %2157 }
 0x247   :  { %1828 = vst.msk [vmem:[#allocation3 + $0x28] sm:$0x1] %vm1827_vm13, %v1811_v62  ;;  %v1794_v0 = vsel %vm632_vm2, %v1792_v21, %v1734_v46  ;;  %v2291_v27 = vsel %vm596_vm6, %v6643_v38, %v2158_v58 }
 0x248   :  { %2416 = vrot.lane.b32.xlu1 %v6659_v22, %s5733_s0 }
 0x24a   :  { %v1742_v8 = vpop.permute.xlu1 %1741  ;;  %v2166_v9 = vpop.permute.xlu0 %2165 }
 0x24b   :  { %v1796_v52 = vsel %vm635_vm3, %v1794_v0, %v1742_v8  ;;  %v2293_v41 = vsel %vm599_vm7, %v2291_v27, %v2166_v9 }
 0x24c   :  { %v1813_v60 = vrot.slane %v1796_v52, 2  ;;  %2420 = vrot.lane.b32.xlu1 %v2367_v55, %s5733_s0 }
 0x24e   :  { %1830 = vst [vmem:[#allocation3 + $0x80] ss:$-20 sps:$4 sm:$0xc1] %v1813_v60   ;;  %v1750_v13 = vpop.permute.xlu1 %1749  ;;  %v2174_v56 = vpop.permute.xlu0 %2173 }
 0x24f   :  { %v1798_v63 = vsel %vm638_vm4, %v1742_v8, %v1750_v13  ;;  %v2295_v57 = vsel %vm8651_vm8, %v2293_v41, %v2174_v56 }
 0x252   :  { %v1758_v40 = vpop.permute.xlu1 %1757  ;;  %v2182_v33 = vpop.permute.xlu0 %2181 }
 0x253   :  { %v1800_v22 = vsel %vm641_vm5, %v1798_v63, %v1758_v40  ;;  %v2297_v42 = vsel %vm605_vm9, %v2295_v57, %v2182_v33 }
 0x256   :  { %v1766_v43 = vpop.permute.xlu1 %1765  ;;  %v2190_v30 = vpop.permute.xlu0 %2189 }
 0x257   :  { %v1802_v44 = vsel %vm644_vm0, %v1800_v22, %v1766_v43  ;;  %v2299_v54 = vsel %vm8696_vm10, %v2297_v42, %v2190_v30 }
 0x258   :  { %v1814_v1 = vrot.slane %v1802_v44, 2 }
 0x25a   :  { %1831 = vst.msk [vmem:[#allocation3 + $0x70] sm:$0xc0] %vm1823_vm11, %v1814_v1  ;;  %v2160_v20 = vpop.permute.xlu1 %2159  ;;  %v2198_v34 = vpop.permute.xlu0 %2197  ;;  %vm8699_vm11 = vmmov %vm8696_vm10  ;;  %vm8702_vm10 = vcmask 130048  }
 0x25b   :  { %1834 = vst.msk [vmem:[#allocation3 + $0x88] sm:$0x1] %vm1827_vm13, %v1814_v1  ;;  %v2301_v51 = vsel %vm8697_vm14, %v2299_v54, %v2198_v34  ;;  %v2292_v47 = vsel %vm596_vm6, %v6709_v36, %v2160_v20  ;;  %vm8700_vm13 = vmmov %vm8697_vm14  ;;  %vm8703_vm14 = vcmask 277504  }
 0x25e   :  { %v2168_v14 = vpop.permute.xlu1 %2167  ;;  %v2206_v45 = vpop.permute.xlu0 %2205 }
 0x25f   :  { %v2303_v38 = vsel %vm8698_vm15, %v2301_v51, %v2206_v45  ;;  %v2294_v37 = vsel %vm599_vm7, %v2292_v47, %v2168_v14  ;;  %vm8704_vm15 = vcmask 424960  }
 0x260   :  { %v2331_v61 = vrot.slane %v2303_v38, 7 }
 0x262   :  { %2343 = vst [vmem:[#allocation3 + $0x18] sm:$0xe] %v2331_v61  ;;  %v2176_v28 = vpop.permute.xlu1 %2175  ;;  %v2214_v15 = vpop.permute.xlu0 %2213 }
 0x263   :  { %v2296_v25 = vsel %vm8651_vm8, %v2294_v37, %v2176_v28  ;;  %v2305_v46 = vsel %vm8702_vm10, %v2206_v45, %v2214_v15  ;;  %vm8705_vm8 = vcmask 572416  }
 0x266   :  { %v2184_v4 = vpop.permute.xlu1 %2183  ;;  %v2222_v3 = vpop.permute.xlu0 %2221 }
 0x267   :  { %v2298_v35 = vsel %vm605_vm9, %v2296_v25, %v2184_v4  ;;  %v2307_v36 = vsel %vm8703_vm14, %v2305_v46, %v2222_v3 }
 0x26a   :  { %v2192_v23 = vpop.permute.xlu1 %2191  ;;  %v2230_v19 = vpop.permute.xlu0 %2229 }
 0x26b   :  { %v2300_v18 = vsel %vm8699_vm11, %v2298_v35, %v2192_v23  ;;  %v2309_v53 = vsel %vm8704_vm15, %v2307_v36, %v2230_v19  ;;  %vm8706_vm11 = vmmov %vm8702_vm10  ;;  %vm8709_vm10 = vcmask 572416  }
 0x26e   :  { %v2200_v48 = vpop.permute.xlu1 %2199  ;;  %v2238_v11 = vpop.permute.xlu0 %2237 }
 0x26f   :  { %v2302_v12 = vsel %vm8700_vm13, %v2300_v18, %v2200_v48  ;;  %v2311_v21 = vsel %vm8705_vm8, %v2309_v53, %v2238_v11  ;;  %vm2345_vm8 = vcmask 551937   ;;  %vm8707_vm13 = vmmov %vm8703_vm14  ;;  %vm8710_vm14 = vcmask 441344  }
 0x272   :  { %v2208_v10 = vpop.permute.xlu1 %2207  ;;  %v2246_v62 = vpop.permute.xlu0 %2245 }
 0x273   :  { %v2304_v32 = vsel %vm8701_vm12, %v2302_v12, %v2208_v10  ;;  %v2313_v0 = vsel %vm629_vm1, %v2311_v21, %v2246_v62  ;;  %vm8708_vm12 = vmmov %vm8704_vm15  ;;  %vm8711_vm15 = vcmask 736256  }
 0x274   :  { %v2334_v24 = vrot.slane %v2304_v32, 7 }
 0x276   :  { %2347 = vst [vmem:[#allocation3 + $0x78] sm:$0xe] %v2334_v24  ;;  %v2216_v58 = vpop.permute.xlu1 %2215  ;;  %v2254_v31 = vpop.permute.xlu0 %2253 }
 0x277   :  { %v2315_v8 = vsel %vm632_vm2, %v2313_v0, %v2254_v31  ;;  %v2306_v27 = vsel %vm8706_vm11, %v2208_v10, %v2216_v58  ;;  %vm8713_vm11 = vcmask 1031168  }
 0x27a   :  { %v2224_v9 = vpop.permute.xlu1 %2223  ;;  %v2262_v52 = vpop.permute.xlu0 %2261 }
 0x27b   :  { %v2317_v55 = vsel %vm635_vm3, %v2315_v8, %v2262_v52  ;;  %v2308_v41 = vsel %vm8707_vm13, %v2306_v27, %v2224_v9  ;;  %vm8715_vm13 = vcmask 130048  }
 0x27c   :  { %v2332_v60 = vrot.slane %v2317_v55, 7 }
 0x27e   :  { %2344 = vst [vmem:[#allocation3 + $0x20] sm:$0xe] %v2332_v60  ;;  %v2232_v13 = vpop.permute.xlu1 %2231  ;;  %v2270_v56 = vpop.permute.xlu0 %2269 }
 0x27f   :  { %v2319_v63 = vsel %vm638_vm4, %v2262_v52, %v2270_v56  ;;  %v2310_v57 = vsel %vm8708_vm12, %v2308_v41, %v2232_v13  ;;  %vm8716_vm12 = vmmov %vm8710_vm14 }
 0x282   :  { %v2240_v40 = vpop.permute.xlu1 %2239  ;;  %v2278_v33 = vpop.permute.xlu0 %2277 }
 0x283   :  { %v2321_v22 = vsel %vm641_vm5, %v2319_v63, %v2278_v33  ;;  %v2312_v42 = vsel %vm8709_vm10, %v2310_v57, %v2240_v40  ;;  %vm8717_vm10 = vcmask 277504  }
 0x286   :  { %v2248_v43 = vpop.permute.xlu1 %2247  ;;  %v2286_v30 = vpop.permute.xlu0 %2285 }
 0x287   :  { %v2323_v44 = vsel %vm644_vm0, %v2321_v22, %v2286_v30  ;;  %v2314_v54 = vsel %vm629_vm1, %v2312_v42, %v2248_v43 }
 0x288   :  { %v2333_v1 = vrot.slane %v2323_v44, 7 }
 0x28a   :  { %2346 = vst.msk [vmem:[#allocation3 + $0x28] sm:$0xe] %vm2345_vm8, %v2333_v1  ;;  %v2256_v20 = vpop.permute.xlu1 %2255  ;;  %v2387_v34 = vpop.permute.xlu0 %2386 }
 0x28b   :  { %v2316_v51 = vsel %vm632_vm2, %v2314_v54, %v2256_v20 }
 0x28e   :  { %v2264_v14 = vpop.permute.xlu1 %2263  ;;  %v6980_v61 = vpop.permute.xlu0 %2390 }
 0x28f   :  { %v2318_v45 = vsel %vm635_vm3, %v2316_v51, %v2264_v14 }
 0x290   :  { %v2335_v38 = vrot.slane %v2318_v45, 7 }
 0x292   :  { %2348 = vst [vmem:[#allocation3 + $0x80] sm:$0xe] %v2335_v38  ;;  %v2272_v28 = vpop.permute.xlu1 %2271  ;;  %v6982_v15 = vpop.permute.xlu0 %2394 }
 0x293   :  { %v2320_v3 = vsel %vm638_vm4, %v2264_v14, %v2272_v28 }
 0x296   :  { %v2280_v4 = vpop.permute.xlu1 %2279  ;;  %v2399_v37 = vpop.permute.xlu0 %2398 }
 0x297   :  { %v2322_v23 = vsel %vm641_vm5, %v2320_v3, %v2280_v4  ;;  %v2438_v25 = vcombine.low %v2387_v34, %v2399_v37  ;;  %v2439_v31 = vcombine.high %v2387_v34, %v2399_v37  ;;  %v2528_v34 = vrot.slane %v6982_v15, %v5982_v50 }
 0x299   :  { %v2446_v18 = vrot.slane %v2438_v25, %v5982_v50  ;;  %v2453_v9 = vrot.slane %v2439_v31, %v5982_v50  ;;  %v2521_v25 = vcombine.high %v6982_v15, %v8659_v2 }
 0x29a   :  { %v2288_v19 = vpop.permute.xlu1 %2287  ;;  %v7003_v0 = vpop.permute.xlu0 %2402 }
 0x29b   :  { %v2324_v47 = vsel %vm644_vm0, %v2322_v23, %v2288_v19 }
 0x29c   :  { %v2336_v48 = vrot.slane %v2324_v47, 7 }
 0x29e   :  { %2349 = vst.msk [vmem:[#allocation3 + $0x88] sm:$0xe] %vm2345_vm8, %v2336_v48  ;;  %v6988_v11 = vpop.permute.xlu1 %2388  ;;  %v7011_v13 = vpop.permute.xlu0 %2406  ;;  %vm8712_vm8 = vcmask 883712  }
 0x2a2   :  { %v2393_v35 = vpop.permute.xlu1 %2392  ;;  %v2411_v43 = vpop.permute.xlu0 %2410 }
 0x2a3   :  { %v2461_v12 = vrot.slane %v2393_v35, %v5982_v50  ;;  %v2454_v24 = vcombine.high %v2393_v35, %v8659_v2  ;;  %v2613_v1 = vrot.slane %v2411_v43, %v5982_v50  ;;  %v2606_v28 = vcombine.high %v2411_v43, %v8659_v2 }
 0x2a5   :  { %v2469_v10 = vcombine.low %v2446_v18, %v2461_v12  ;;  %v2470_v46 = vcombine.high %v2446_v18, %v2461_v12  ;;  %v2468_v53 = vrot.slane %v2454_v24, %v5982_v50  ;;  %v2620_v19 = vrot.slane %v2606_v28, %v5982_v50 }
 0x2a6   :  { %v6992_v62 = vpop.permute.xlu1 %2396  ;;  %v7048_v12 = vpop.permute.xlu0 %2414  ;;  %v2535_v24 = vrot.slane %v2521_v25, %v5982_v50 }
 0x2a7   :  { %v6995_v32 = vrot.slane %v2469_v10, %v6006_v59  ;;  %v2484_v21 = vrot.slane %v2470_v46, %v6006_v59  ;;  %v2485_v52 = vcombine.low %v2453_v9, %v2468_v53  ;;  %v2486_v33 = vcombine.high %v2453_v9, %v2468_v53 }
 0x2a9   :  { %v2501_v36 = vcombine.high %v6995_v32, %v8659_v2  ;;  %v2502_v55 = vcombine.high %v2484_v21, %v8659_v2  ;;  %v2493_v56 = vrot.slane %v2485_v52, %v6006_v59  ;;  %v2500_v20 = vrot.slane %v2486_v33, %v6006_v59 }
 0x2aa   :  { %v2401_v58 = vpop.permute.xlu1 %2400 }
 0x2ab   :  { %2744 = vrot.lane.b32.xlu0 %v2501_v36, %s5745_s19  ;;  %v2505_v63 = vcombine.low %v6988_v11, %v2401_v58  ;;  %v2503_v22 = vcombine.high %v2493_v56, %v8659_v2  ;;  %v2504_v54 = vcombine.high %v2500_v20, %v8659_v2  ;;  %v2506_v47 = vcombine.high %v6988_v11, %v2401_v58  ;;  %v2419_v58 = vpop.permute.xlu0 %2418 }
 0x2ad   :  { %v2513_v27 = vrot.slane %v2505_v63, %v5982_v50  ;;  %v2520_v10 = vrot.slane %v2506_v47, %v5982_v50  ;;  %v2572_v63 = vcombine.low %v6980_v61, %v7003_v0 }
 0x2ae   :  { %v2405_v8 = vpop.permute.xlu1 %2404 }
 0x2af   :  { %2752 = vrot.lane.b32.xlu0 %v2484_v21, %s5737_s11  ;;  %v2536_v42 = vcombine.low %v2513_v27, %v2528_v34  ;;  %v2537_v37 = vcombine.high %v2513_v27, %v2528_v34  ;;  %v2552_v15 = vcombine.low %v2520_v10, %v2535_v24  ;;  %v2657_v21 = vcombine.low %v7011_v13, %v2419_v58 }
 0x2b1   :  { %v2544_v4 = vrot.slane %v2536_v42, %v6006_v59  ;;  %v2551_v11 = vrot.slane %v2537_v37, %v6006_v59 }
 0x2b2   :  { %v7008_v60 = vpop.permute.xlu1 %2408 }
 0x2b3   :  { %2760 = vrot.lane.b32.xlu0 %v2502_v55, %s5746_s20  ;;  %v2568_v48 = vcombine.high %v2544_v4, %v8659_v2  ;;  %v2569_v36 = vcombine.high %v2551_v11, %v8659_v2  ;;  %v2553_v55 = vcombine.high %v2520_v10, %v2535_v24  ;;  %v7126_v10 = vld [vmem:[#allocation2 + $0x1a] sm:$0xff] }
 0x2b4   :  { %v2940_v24 = vld [vmem:[#allocation2 + $0x19] sm:$0xff] }
 0x2b6   :  { %v7014_v40 = vpop.permute.xlu1 %2412 }
 0x2b7   :  { %2768 = vrot.lane.b32.xlu0 %v2493_v56, %s5738_s12  ;;  %v2680_v9 = vrot.slane %v7014_v40, %v5982_v50  ;;  %v2665_v56 = vrot.slane %v2657_v21, %v5982_v50  ;;  %v2673_v0 = vcombine.high %v7014_v40, %v8659_v2 }
 0x2ba   :  { %v2417_v30 = vpop.permute.xlu1 %2416 }
 0x2bb   :  { %v2590_v44 = vcombine.low %v2405_v8, %v2417_v30  ;;  %2776 = vrot.lane.b32.xlu0 %v2503_v22, %s5747_s21  ;;  %v2591_v14 = vcombine.high %v2405_v8, %v2417_v30  ;;  %v2560_v8 = vrot.slane %v2552_v15, %v6006_v59  ;;  %v2688_v22 = vcombine.low %v2665_v56, %v2680_v9  ;;  %v7140_v15 = vld [vmem:[#allocation2 + $0x22] sm:$0xff] }
 0x2bc   :  { %v2567_v30 = vrot.slane %v2553_v55, %v6006_v59  ;;  %v4648_v55 = vld [vmem:[#allocation2 + $0x7a] sm:$0xff] }
 0x2bd   :  { %v2598_v41 = vrot.slane %v2590_v44, %v5982_v50  ;;  %v2605_v3 = vrot.slane %v2591_v14, %v5982_v50  ;;  %v2570_v33 = vcombine.high %v2560_v8, %v8659_v2  ;;  %v2579_v44 = vrot.slane %v2572_v63, %v5982_v50  ;;  %v7166_v63 = vld [vmem:[#allocation2 + $0x82] sm:$0xff] }
 0x2be   :  { %v2571_v61 = vcombine.high %v2567_v30, %v8659_v2  ;;  %v2421_v28 = vpop.permute.xlu1 %2420 }
 0x2bf   :  { %v2621_v57 = vcombine.low %v2598_v41, %v2613_v1  ;;  %2784 = vrot.lane.b32.xlu0 %v2500_v20, %s5739_s13  ;;  %v2622_v45 = vcombine.high %v2598_v41, %v2613_v1  ;;  %v2637_v35 = vcombine.low %v2605_v3, %v2620_v19  ;;  %v2638_v31 = vcombine.high %v2605_v3, %v2620_v19 }
 0x2c0   :  { %v2696_v1 = vrot.slane %v2688_v22, %v6006_v59  ;;  %v2581_v27 = vcombine.low %v2579_v44, %v6992_v62  ;;  %v2689_v41 = vcombine.high %v2665_v56, %v2680_v9  ;;  %v2687_v62 = vrot.slane %v2673_v0, %v5982_v50  ;;  %v7155_v9 = vld [vmem:[#allocation2 + $0x3a] sm:$0xff] }
 0x2c1   :  { %v7029_v51 = vrot.slane %v2621_v57, %v6006_v59  ;;  %v2636_v23 = vrot.slane %v2622_v45, %v6006_v59  ;;  %v2645_v46 = vrot.slane %v2637_v35, %v6006_v59  ;;  %v2652_v52 = vrot.slane %v2638_v31, %v6006_v59  ;;  %v7114_v35 = vld [vmem:[#allocation2 + $0x2] sm:$0xff] }
 0x2c2   :  { %v2720_v20 = vcombine.high %v2696_v1, %v8659_v2  ;;  %v2588_v34 = vrot.slane %v2581_v27, %v6006_v59  ;;  %v2658_v57 = vcombine.high %v7011_v13, %v2419_v58  ;;  %v2703_v42 = vrot.slane %v2689_v41, %v6006_v59  ;;  %v2937_v13 = vld [vmem:[#allocation2 + $0x1] sm:$0xff]  ;;  %v2952_v58 = vld [vmem:[#allocation2 + $0x79] sm:$0xff] }
 0x2c3   :  { %2792 = vrot.lane.b32.xlu0 %v2504_v54, %s5736_s10  ;;  %v2653_v38 = vcombine.high %v7029_v51, %v8659_v2  ;;  %v2654_v18 = vcombine.high %v2636_v23, %v8659_v2  ;;  %v2655_v53 = vcombine.high %v2645_v46, %v8659_v2  ;;  %v2656_v43 = vcombine.high %v2652_v52, %v8659_v2 }
 0x2c4   :  { %v2589_v54 = vcombine.high %v2588_v34, %v8659_v2  ;;  %v2672_v40 = vrot.slane %v2658_v57, %v5982_v50  ;;  %v2721_v45 = vcombine.high %v2703_v42, %v8659_v2  ;;  %v4635_v57 = vld [vmem:[#allocation2 + $0x12] sm:$0x3] }
 0x2c5   :  { %2746 = vrot.lane.b32.xlu1 %v2653_v38, %s5745_s19 }
 0x2c6   :  { %v2704_v14 = vcombine.low %v2672_v40, %v2687_v62  ;;  %v2705_v3 = vcombine.high %v2672_v40, %v2687_v62  ;;  %v2950_v40 = vld [vmem:[#allocation2 + $0x69] sm:$0xff] }
 0x2c7   :  { %2800 = vrot.lane.b32.xlu0 %v2544_v4, %s5740_s14  ;;  %v2939_v4 = vld [vmem:[#allocation2 + $0x11] sm:$0x3] }
 0x2c8   :  { %v2712_v38 = vrot.slane %v2704_v14, %v6006_v59  ;;  %v2719_v37 = vrot.slane %v2705_v3, %v6006_v59  ;;  %v4638_v3 = vld [vmem:[#allocation2 + $0x2a] sm:$0x3] }
 0x2c9   :  { %2754 = vrot.lane.b32.xlu1 %v2636_v23, %s5737_s11  ;;  %v2724_v23 = vcombine.low %v7008_v60, %v2421_v28 }
 0x2ca   :  { %v2722_v19 = vcombine.high %v2712_v38, %v8659_v2  ;;  %v2723_v60 = vcombine.high %v2719_v37, %v8659_v2 }
 0x2cb   :  { %2808 = vrot.lane.b32.xlu0 %v2568_v48, %s5748_s22  ;;  %v2731_v47 = vrot.slane %v2724_v23, %v5982_v50  ;;  %v2943_v48 = vld [vmem:[#allocation2 + $0x31] sm:$0xff] }
 0x2cd   :  { %2762 = vrot.lane.b32.xlu1 %v2654_v18, %s5746_s20  ;;  %v2733_v25 = vcombine.low %v2731_v47, %v7048_v12  ;;  %v7120_v18 = vld [vmem:[#allocation2 + $0x32] sm:$0xff] }
 0x2cf   :  { %2816 = vrot.lane.b32.xlu0 %v2551_v11, %s5741_s15  ;;  %v7132_v11 = vld [vmem:[#allocation2 + $0xa] sm:$0xff] }
 0x2d1   :  { %2770 = vrot.lane.b32.xlu1 %v2645_v46, %s5738_s12  ;;  %v2942_v46 = vld [vmem:[#allocation2 + $0x29] sm:$0x3] }
 0x2d3   :  { %2824 = vrot.lane.b32.xlu0 %v2569_v36, %s5749_s23  ;;  %v2946_v36 = vld [vmem:[#allocation2 + $0x49] sm:$0xff] }
 0x2d5   :  { %2778 = vrot.lane.b32.xlu1 %v2655_v53, %s5747_s21  ;;  %v4058_v53 = vld [vmem:[#allocation2 + $0x62] sm:$0xff] }
 0x2d7   :  { %2832 = vrot.lane.b32.xlu0 %v2560_v8, %s5742_s16  ;;  %v4642_v8 = vld [vmem:[#allocation2 + $0x4a] sm:$0xff] }
 0x2d9   :  { %2786 = vrot.lane.b32.xlu1 %v2652_v52, %s5739_s13 }
 0x2db   :  { %2840 = vrot.lane.b32.xlu0 %v2570_v33, %s5750_s24 }
 0x2dd   :  { %2794 = vrot.lane.b32.xlu1 %v2656_v43, %s5736_s10  ;;  %v2949_v43 = vld [vmem:[#allocation2 + $0x61] sm:$0xff] }
 0x2df   :  { %2848 = vrot.lane.b32.xlu0 %v2567_v30, %s5743_s17 }
 0x2e1   :  { %2802 = vrot.lane.b32.xlu1 %v2696_v1, %s5740_s14 }
 0x2e3   :  { %2856 = vrot.lane.b32.xlu0 %v2571_v61, %s5751_s25  ;;  %v4048_v61 = vld [vmem:[#allocation2 + $0x12] sm:$0x3] }
 0x2e5   :  { %2810 = vrot.lane.b32.xlu1 %v2720_v20, %s5748_s22 }
 0x2e7   :  { %2864 = vrot.lane.b32.xlu0 %v2588_v34, %s5744_s18 }
 0x2e9   :  { %2818 = vrot.lane.b32.xlu1 %v2703_v42, %s5741_s15 }
 0x2eb   :  { %2872 = vrot.lane.b32.xlu0 %v2589_v54, %s5752_s26 }
 0x2ed   :  { %2826 = vrot.lane.b32.xlu1 %v2721_v45, %s5749_s23  ;;  %v2947_v45 = vld [vmem:[#allocation2 + $0x51] sm:$0xff] }
 0x2ef   :  { %2973 = vrot.lane.b32.xlu0 %v2937_v13, %s5736_s10 }
 0x2f1   :  { %2834 = vrot.lane.b32.xlu1 %v2712_v38, %s5742_s16  ;;  %v7188_v38 = vld [vmem:[#allocation2 + $0x6a] sm:$0xff] }
 0x2f2   :  { %8714 = vst [vmem:[#allocation6_spill] sm:$0xff] %v7188_v38 }
 0x2f3   :  { %2977 = vrot.lane.b32.xlu0 %v2939_v4, %s5736_s10  ;;  %v7192_v4 = vld [vmem:[#allocation2 + $0x52] sm:$0xff] }
 0x2f5   :  { %2842 = vrot.lane.b32.xlu1 %v2722_v19, %s5750_s24 }
 0x2f7   :  { %2981 = vrot.lane.b32.xlu0 %v6713_v49, %s5736_s10  ;;  %v2740_v49 = vrot.slane %v2733_v25, %v6006_v59 }
 0x2f9   :  { %2850 = vrot.lane.b32.xlu1 %v2719_v37, %s5743_s17  ;;  %v2741_v12 = vcombine.high %v2740_v49, %v8659_v2 }
 0x2fb   :  { %2985 = vrot.lane.b32.xlu0 %v2943_v48, %s5736_s10  ;;  %v2954_v48 = vld [vmem:[#allocation2 + $0x89] sm:$0x3] }
 0x2fd   :  { %2858 = vrot.lane.b32.xlu1 %v2723_v60, %s5751_s25 }
 0x2ff   :  { %4082 = vrot.lane.b32.xlu0 %v7114_v35, %s5733_s0 }
 0x301   :  { %2866 = vrot.lane.b32.xlu1 %v2740_v49, %s5744_s18 }
 0x303   :  { %4094 = vrot.lane.b32.xlu0 %v7120_v18, %s5733_s0 }
 0x305   :  { %2874 = vrot.lane.b32.xlu1 %v2741_v12, %s5752_s26 }
 0x307   :  { %4675 = vrot.lane.b32.xlu0 %v7126_v10, %s5736_s10 }
 0x309   :  { %2975 = vrot.lane.b32.xlu1 %v6698_v7, %s5736_s10  ;;  %v2944_v7 = vld [vmem:[#allocation2 + $0x39] sm:$0xff] }
 0x30b   :  { %4084 = vrot.lane.b32.xlu0 %v7132_v11, %s5733_s0 }
 0x30d   :  { %2979 = vrot.lane.b32.xlu1 %v2940_v24, %s5736_s10  ;;  %v2945_v24 = vld [vmem:[#allocation2 + $0x41] sm:$0x3] }
 0x30f   :  { %4671 = vrot.lane.b32.xlu0 %v7132_v11, %s5736_s10 }
 0x311   :  { %2983 = vrot.lane.b32.xlu1 %v2942_v46, %s5736_s10  ;;  %v4063_v46 = vld [vmem:[#allocation2 + $0x8a] sm:$0x3] }
 0x313   :  { %4090 = vrot.lane.b32.xlu0 %v7140_v15, %s5733_s0 }
 0x315   :  { %2987 = vrot.lane.b32.xlu1 %v2944_v7, %s5736_s10 }
 0x317   :  { %2991 = vrot.lane.b32.xlu0 %v2946_v36, %s5736_s10 }
 0x319   :  { %4088 = vrot.lane.b32.xlu1 %v7126_v10, %s5733_s0 }
 0x31b   :  { %3003 = vrot.lane.b32.xlu0 %v2952_v58, %s5736_s10 }
 0x31d   :  { %4669 = vrot.lane.b32.xlu1 %v7114_v35, %s5736_s10  ;;  %v2745_v31 = vpop.permute.xlu0 %2744 }
 0x31e   :  { %v2878_v22 = vsel %vm596_vm6, %v6995_v32, %v2745_v31 }
 0x31f   :  { %4106 = vrot.lane.b32.xlu0 %v4058_v53, %s5733_s0 }
 0x321   :  { %4681 = vrot.lane.b32.xlu1 %v7120_v18, %s5736_s10  ;;  %v2753_v21 = vpop.permute.xlu0 %2752 }
 0x322   :  { %v2880_v30 = vsel %vm599_vm7, %v2878_v22, %v2753_v21 }
 0x323   :  { %4687 = vrot.lane.b32.xlu0 %v4642_v8, %s5736_s10 }
 0x325   :  { %4096 = vrot.lane.b32.xlu1 %v7155_v9, %s5733_s0  ;;  %v2761_v52 = vpop.permute.xlu0 %2760 }
 0x327   :  { %4699 = vrot.lane.b32.xlu0 %v4648_v55, %s5736_s10 }
 0x329   :  { %4683 = vrot.lane.b32.xlu1 %v7155_v9, %s5736_s10  ;;  %v2769_v56 = vpop.permute.xlu0 %2768 }
 0x32b   :  { %3005 = vrot.lane.b32.xlu0 %v6761_v29, %s5736_s10  ;;  %v2882_v29 = vsel %vm8710_vm14, %v2880_v30, %v2761_v52  ;;  %vm8718_vm14 = vcmask 424960  }
 0x32c   :  { %v2884_v1 = vsel %vm605_vm9, %v2882_v29, %v2769_v56  ;;  %v4641_v29 = vld [vmem:[#allocation2 + $0x42] sm:$0x3] }
 0x32d   :  { %4677 = vrot.lane.b32.xlu1 %v7140_v15, %s5736_s10  ;;  %v2777_v33 = vpop.permute.xlu0 %2776 }
 0x32e   :  { %v2886_v27 = vsel %vm8711_vm15, %v2884_v1, %v2777_v33  ;;  %v4650_v33 = vld [vmem:[#allocation2 + $0x8a] sm:$0x3] }
 0x32f   :  { %4114 = vrot.lane.b32.xlu0 %v7166_v63, %s5733_s0 }
 0x331   :  { %2997 = vrot.lane.b32.xlu1 %v2949_v43, %s5736_s10  ;;  %v2785_v44 = vpop.permute.xlu0 %2784 }
 0x332   :  { %v2888_v0 = vsel %vm8712_vm8, %v2886_v27, %v2785_v44  ;;  %vm8719_vm8 = vcmask 572416  }
 0x333   :  { %4701 = vrot.lane.b32.xlu0 %v7166_v63, %s5736_s10 }
 0x335   :  { %4100 = vrot.lane.b32.xlu1 %v4642_v8, %s5733_s0  ;;  %v2793_v32 = vpop.permute.xlu0 %2792 }
 0x336   :  { %v2890_v41 = vsel %vm8713_vm11, %v2888_v0, %v2793_v32  ;;  %vm8720_vm11 = vcmask 883712  }
 0x337   :  { %v2918_v20 = vrot.slane %v2890_v41, 4  ;;  %4086 = vrot.lane.b32.xlu0 %v4048_v61, %s5733_s0  ;;  %v2747_v34 = vpop.permute.xlu1 %2746  ;;  %v4060_v61 = vld [vmem:[#allocation2 + $0x72] sm:$0x3] }
 0x338   :  { %v2879_v37 = vsel %vm596_vm6, %v7029_v51, %v2747_v34 }
 0x339   :  { %2930 = vst [vmem:[#allocation3 + $0x18] sm:$0x70] %v2918_v20  ;;  %4112 = vrot.lane.b32.xlu1 %v4648_v55, %s5733_s0  ;;  %v2801_v62 = vpop.permute.xlu0 %2800  ;;  %v4051_v20 = vld [vmem:[#allocation2 + $0x2a] sm:$0x3] }
 0x33a   :  { %v2892_v49 = vsel %vm8715_vm13, %v2793_v32, %v2801_v62  ;;  %vm8721_vm13 = vcmask 1031168  }
 0x33b   :  { %4673 = vrot.lane.b32.xlu0 %v4635_v57, %s5736_s10  ;;  %v2755_v42 = vpop.permute.xlu1 %2754 }
 0x33c   :  { %v2881_v25 = vsel %vm599_vm7, %v2879_v37, %v2755_v42 }
 0x33d   :  { %4693 = vrot.lane.b32.xlu1 %v4058_v53, %s5736_s10  ;;  %v2809_v54 = vpop.permute.xlu0 %2808  ;;  %v4054_v53 = vld [vmem:[#allocation2 + $0x42] sm:$0x3] }
 0x33e   :  { %v2894_v7 = vsel %vm8717_vm10, %v2892_v49, %v2809_v54  ;;  %vm8723_vm10 = vcmask 130048  }
 0x33f   :  { %2999 = vrot.lane.b32.xlu0 %v2950_v40, %s5736_s10  ;;  %v2763_v14 = vpop.permute.xlu1 %2762 }
 0x340   :  { %v2883_v12 = vsel %vm8716_vm12, %v2881_v25, %v2763_v14  ;;  %vm2932_vm12 = vcmask 555012  }
 0x341   :  { %2993 = vrot.lane.b32.xlu1 %v2947_v45, %s5736_s10  ;;  %v2817_v13 = vpop.permute.xlu0 %2816  ;;  %v2948_v45 = vld [vmem:[#allocation2 + $0x59] sm:$0x3] }
 0x342   :  { %v2896_v51 = vsel %vm8718_vm14, %v2894_v7, %v2817_v13  ;;  %vm8724_vm14 = vcmask 277504  }
 0x343   :  { %4695 = vrot.lane.b32.xlu0 %v7188_v38, %s5736_s10  ;;  %v2771_v28 = vpop.permute.xlu1 %2770 }
 0x344   :  { %v2885_v36 = vsel %vm605_vm9, %v2883_v12, %v2771_v28  ;;  %v4057_v28 = vld [vmem:[#allocation2 + $0x5a] sm:$0x3] }
 0x345   :  { %4102 = vrot.lane.b32.xlu1 %v7192_v4, %s5733_s0  ;;  %v2825_v23 = vpop.permute.xlu0 %2824 }
 0x346   :  { %v2898_v21 = vsel %vm8719_vm8, %v2896_v51, %v2825_v23 }
 0x347   :  { %4679 = vrot.lane.b32.xlu0 %v4638_v3, %s5736_s10  ;;  %v2779_v19 = vpop.permute.xlu1 %2778 }
 0x348   :  { %v2887_v31 = vsel %vm8711_vm15, %v2885_v36, %v2779_v19  ;;  %vm8725_vm15 = vcmask 424960   ;;  %v2951_v36 = vld [vmem:[#allocation2 + $0x71] sm:$0x3] }
 0x349   :  { %4689 = vrot.lane.b32.xlu1 %v7192_v4, %s5736_s10  ;;  %v2833_v47 = vpop.permute.xlu0 %2832 }
 0x34a   :  { %v2900_v55 = vsel %vm629_vm1, %v2898_v21, %v2833_v47  ;;  %v4644_v47 = vld [vmem:[#allocation2 + $0x5a] sm:$0x3] }
 0x34b   :  { %3007 = vrot.lane.b32.xlu0 %v2954_v48, %s5736_s10  ;;  %v2787_v60 = vpop.permute.xlu1 %2786 }
 0x34c   :  { %v2889_v8 = vsel %vm8720_vm11, %v2887_v31, %v2787_v60  ;;  %v4647_v31 = vld [vmem:[#allocation2 + $0x72] sm:$0x3]  ;;  %vm8779_vm11 = vcmask 441344  }
 0x34d   :  { %2989 = vrot.lane.b32.xlu1 %v2945_v24, %s5736_s10  ;;  %v2841_v58 = vpop.permute.xlu0 %2840 }
 0x34e   :  { %v2902_v22 = vsel %vm632_vm2, %v2900_v55, %v2841_v58 }
 0x34f   :  { %v2795_v52 = vpop.permute.xlu1 %2794  ;;  %4116 = vrot.lane.b32.xlu0 %v4063_v46, %s5733_s0 }
 0x350   :  { %v2891_v56 = vsel %vm8721_vm13, %v2889_v8, %v2795_v52  ;;  %vm8781_vm13 = vcmask 736256  }
 0x351   :  { %v2921_v43 = vrot.slane %v2891_v56, 4  ;;  %4098 = vrot.lane.b32.xlu1 %v4054_v53, %s5733_s0  ;;  %v2849_v30 = vpop.permute.xlu0 %2848 }
 0x352   :  { %v2904_v44 = vsel %vm635_vm3, %v2902_v22, %v2849_v30 }
 0x353   :  { %2934 = vst [vmem:[#allocation3 + $0x78] sm:$0x70] %v2921_v43  ;;  %v2919_v1 = vrot.slane %v2904_v44, 4  ;;  %v2803_v27 = vpop.permute.xlu1 %2802  ;;  %4703 = vrot.lane.b32.xlu0 %v4650_v33, %s5736_s10 }
 0x354   :  { %v2893_v19 = vsel %vm8723_vm10, %v2795_v52, %v2803_v27 }
 0x355   :  { %2931 = vst [vmem:[#allocation3 + $0x20] sm:$0x70] %v2919_v1  ;;  %4685 = vrot.lane.b32.xlu1 %v4641_v29, %s5736_s10  ;;  %v2857_v0 = vpop.permute.xlu0 %2856 }
 0x356   :  { %v2906_v57 = vsel %vm638_vm4, %v2849_v30, %v2857_v0 }
 0x357   :  { %v2811_v32 = vpop.permute.xlu1 %2810  ;;  %4110 = vrot.lane.b32.xlu0 %v4060_v61, %s5733_s0 }
 0x358   :  { %v2895_v37 = vsel %vm8724_vm14, %v2893_v19, %v2811_v32  ;;  %vm8784_vm14 = vmmov %vm8779_vm11 }
 0x359   :  { %4108 = vrot.lane.b32.xlu1 %v7188_v38, %s5733_s0  ;;  %v2865_v41 = vpop.permute.xlu0 %2864 }
 0x35a   :  { %v2908_v62 = vsel %vm641_vm5, %v2906_v57, %v2865_v41  ;;  %v3595_v57 = vcombine.high %v6059_v26, %v6043_v17 }
 0x35b   :  { %v2819_v34 = vpop.permute.xlu1 %2818 }
 0x35c   :  { %v2897_v25 = vsel %vm8725_vm15, %v2895_v37, %v2819_v34  ;;  %v7308_v37 = vrot.slane %v7140_v15, %v5982_v50  ;;  %vm8785_vm15 = vcmask 1031168  }
 0x35d   :  { %4092 = vrot.lane.b32.xlu1 %v4051_v20, %s5733_s0  ;;  %v2873_v42 = vpop.permute.xlu0 %2872 }
 0x35e   :  { %v2910_v54 = vsel %vm644_vm0, %v2908_v62, %v2873_v42  ;;  %v3614_v42 = vcombine.low %v7132_v11, %v7155_v9 }
 0x35f   :  { %v2920_v40 = vrot.slane %v2910_v54, 4  ;;  %v2827_v14 = vpop.permute.xlu1 %2826 }
 0x360   :  { %v2899_v60 = vsel %vm8719_vm8, %v2897_v25, %v2827_v14  ;;  %vm8787_vm8 = vcmask 277504  }
 0x361   :  { %2933 = vst.msk [vmem:[#allocation3 + $0x28] sm:$0x70] %vm2932_vm12, %v2920_v40  ;;  %2995 = vrot.lane.b32.xlu1 %v2948_v45, %s5736_s10  ;;  %v7229_v13 = vpop.permute.xlu0 %2973 }
 0x363   :  { %v2835_v3 = vpop.permute.xlu1 %2834 }
 0x364   :  { %v2901_v12 = vsel %vm629_vm1, %v2899_v60, %v2835_v3 }
 0x365   :  { %4104 = vrot.lane.b32.xlu1 %v4057_v28, %s5733_s0  ;;  %v7232_v23 = vpop.permute.xlu0 %2977  ;;  %v7293_v28 = vrot.slane %v3595_v57, %v6006_v59 }
 0x366   :  { %8722 = vst [vmem:[#allocation7_spill] sm:$0xff] %v7232_v23 }
 0x367   :  { %v2843_v48 = vpop.permute.xlu1 %2842 }
 0x368   :  { %v2903_v24 = vsel %vm632_vm2, %v2901_v12, %v2843_v48  ;;  %v3613_v12 = vcombine.high %v7293_v28, %v8659_v2 }
 0x369   :  { %4691 = vrot.lane.b32.xlu1 %v4644_v47, %s5736_s10  ;;  %v7239_v49 = vpop.permute.xlu0 %2981  ;;  %v7304_v47 = vrot.slane %v3614_v42, %v5982_v50 }
 0x36a   :  { %v7297_v3 = vrot.slane %v7239_v49, %v5982_v50 }
 0x36b   :  { %v2851_v46 = vpop.permute.xlu1 %2850 }
 0x36c   :  { %v2905_v7 = vsel %vm635_vm3, %v2903_v24, %v2851_v46 }
 0x36d   :  { %v2922_v58 = vrot.slane %v2905_v7, 4  ;;  %3001 = vrot.lane.b32.xlu1 %v2951_v36, %s5736_s10  ;;  %v7245_v51 = vpop.permute.xlu0 %2985  ;;  %v3645_v36 = vcombine.low %v7304_v47, %v7308_v37 }
 0x36e   :  { %v3026_v29 = vcombine.high %v7229_v13, %v7245_v51 }
 0x36f   :  { %2935 = vst [vmem:[#allocation3 + $0x80] sm:$0x70] %v2922_v58  ;;  %v2859_v53 = vpop.permute.xlu1 %2858 }
 0x370   :  { %v2907_v52 = vsel %vm638_vm4, %v2851_v46, %v2859_v53  ;;  %v7264_v61 = vrot.slane %v3026_v29, %v5982_v50 }
 0x371   :  { %v7247_v21 = vpop.permute.xlu0 %4082  ;;  %4697 = vrot.lane.b32.xlu1 %v4647_v31, %s5736_s10 }
 0x373   :  { %v2867_v8 = vpop.permute.xlu1 %2866 }
 0x374   :  { %v2909_v56 = vsel %vm641_vm5, %v2907_v52, %v2867_v8 }
 0x375   :  { %v7251_v55 = vpop.permute.xlu0 %4094 }
 0x376   :  { %v4135_v48 = vcombine.high %v7247_v21, %v7251_v55 }
 0x377   :  { %v2875_v33 = vpop.permute.xlu1 %2874 }
 0x378   :  { %v2911_v22 = vsel %vm644_vm0, %v2909_v56, %v2875_v33  ;;  %v7326_v58 = vrot.slane %v4135_v48, %v5982_v50  ;;  %v7340_v33 = vrot.slane %v3645_v36, %v6006_v59 }
 0x379   :  { %v2923_v43 = vrot.slane %v2911_v22, 4  ;;  %v7258_v44 = vpop.permute.xlu0 %4675  ;;  %v3025_v22 = vcombine.low %v7229_v13, %v7245_v51 }
 0x37a   :  { %v4737_v56 = vcombine.high %v7258_v44, %v8659_v2  ;;  %v4744_v23 = vrot.slane %v7258_v44, %v5982_v50 }
 0x37b   :  { %2936 = vst.msk [vmem:[#allocation3 + $0x88] sm:$0x70] %vm2932_vm12, %v2923_v43  ;;  %v7256_v30 = vpop.permute.xlu1 %2975  ;;  %vm8783_vm12 = vcmask 883712  }
 0x37c   :  { %v7359_v13 = vrot.slane %v4737_v56, %v5982_v50 }
 0x37d   :  { %v7266_v0 = vpop.permute.xlu0 %4084 }
 0x37f   :  { %v2980_v1 = vpop.permute.xlu1 %2979 }
 0x380   :  { %v3041_v27 = vcombine.high %v2980_v1, %v8659_v2  ;;  %v7352_v57 = vrot.slane %v2980_v1, %v5982_v50 }
 0x381   :  { %v7286_v40 = vpop.permute.xlu0 %4671 }
 0x382   :  { %v7269_v32 = vrot.slane %v3041_v27, %v5982_v50 }
 0x383   :  { %v7271_v41 = vpop.permute.xlu1 %2983 }
 0x384   :  { %8726 = vst [vmem:[#allocation8_spill] sm:$0xff] %v7271_v41  ;;  %v3073_v34 = vcombine.high %v7264_v61, %v7269_v32 }
 0x385   :  { %v7317_v46 = vpop.permute.xlu0 %4090 }
 0x386   :  { %v7280_v62 = vrot.slane %v3073_v34, %v6006_v59 }
 0x387   :  { %v7284_v54 = vpop.permute.xlu1 %2987 }
 0x388   :  { %v3092_v14 = vcombine.low %v7256_v30, %v7284_v54  ;;  %v3091_v45 = vcombine.high %v7280_v62, %v8659_v2 }
 0x389   :  { %v7347_v27 = vpop.permute.xlu0 %2991 }
 0x38a   :  { %v7300_v19 = vrot.slane %v3092_v14, %v5982_v50  ;;  %3379 = vrot.lane.b32.xlu0 %v3091_v45, %s5736_s10  ;;  %8727 = vst [vmem:[#allocation9_spill] sm:$0xff] %v7347_v27  ;;  %v3547_v14 = vcombine.low %v7114_v35, %v7120_v18  ;;  %v7365_v45 = vrot.slane %v3025_v22, %v5982_v50 }
 0x38b   :  { %v4089_v25 = vpop.permute.xlu1 %4088 }
 0x38c   :  { %v3123_v60 = vcombine.low %v7300_v19, %v7297_v3  ;;  %v4150_v24 = vcombine.high %v4089_v25, %v8659_v2  ;;  %v3056_v35 = vcombine.low %v7365_v45, %v7352_v57  ;;  %v7411_v1 = vrot.slane %v4089_v25, %v5982_v50 }
 0x38e   :  { %3901 = vrot.lane.b32.xlu0 %v3613_v12, %s5736_s10  ;;  %v7321_v7 = vrot.slane %v3123_v60, %v6006_v59  ;;  %v7329_v31 = vrot.slane %v4150_v24, %v5982_v50  ;;  %v7379_v12 = vrot.slane %v3547_v14, %v5982_v50  ;;  %v7381_v24 = vpop.permute.xlu0 %3003 }
 0x38f   :  { %v4670_v53 = vpop.permute.xlu1 %4669  ;;  %8728 = vst [vmem:[#allocation10_spill] sm:$0xff] %v7381_v24 }
 0x390   :  { %3387 = vrot.lane.b32.xlu1 %v7321_v7, %s5740_s14  ;;  %v4182_v52 = vcombine.high %v7326_v58, %v7329_v31 }
 0x392   :  { %v7345_v29 = vrot.slane %v4182_v52, %v6006_v59  ;;  %v7388_v52 = vrot.slane %v7317_v46, %v5982_v50  ;;  %v7421_v39 = vpop.permute.xlu0 %4106 }
 0x393   :  { %v4682_v43 = vpop.permute.xlu1 %4681  ;;  %8730 = vst [vmem:[#allocation12_spill] sm:$0xff] %v7421_v39 }
 0x394   :  { %v4722_v34 = vcombine.high %v4670_v53, %v4682_v43  ;;  %3909 = vrot.lane.b32.xlu1 %v7340_v33, %s5740_s14  ;;  %v4200_v42 = vcombine.high %v7345_v29, %v8659_v2 }
 0x396   :  { %v7362_v51 = vrot.slane %v4722_v34, %v5982_v50  ;;  %4488 = vrot.lane.b32.xlu0 %v4200_v42, %s5736_s10  ;;  %v7397_v34 = vrot.slane %v7126_v10, %v5982_v50  ;;  %v4134_v42 = vcombine.low %v7247_v21, %v7251_v55  ;;  %v4721_v10 = vcombine.low %v4670_v53, %v4682_v43  ;;  %v7460_v6 = vpop.permute.xlu0 %4687 }
 0x397   :  { %v7368_v48 = vpop.permute.xlu1 %4096 }
 0x398   :  { %v4769_v60 = vcombine.high %v7362_v51, %v7359_v13  ;;  %v4201_v18 = vcombine.low %v7266_v0, %v7368_v48 }
 0x39a   :  { %v7384_v36 = vrot.slane %v4769_v60, %v6006_v59  ;;  %v7391_v56 = vrot.slane %v4201_v18, %v5982_v50  ;;  %v7404_v60 = vrot.slane %v3056_v35, %v6006_v59  ;;  %v3578_v18 = vcombine.low %v7379_v12, %v7397_v34  ;;  %v7483_v38 = vpop.permute.xlu0 %4699 }
 0x39b   :  { %v7393_v22 = vpop.permute.xlu1 %4683  ;;  %v7419_v35 = vrot.slane %v4134_v42, %v5982_v50  ;;  %v3178_v42 = vcombine.high %v7347_v27, %v7381_v24 }
 0x39c   :  { %v4788_v14 = vcombine.low %v7286_v40, %v7393_v22  ;;  %8729 = vst [vmem:[#allocation11_spill] sm:$0xff] %v7404_v60  ;;  %v4232_v16 = vcombine.low %v7391_v56, %v7388_v52  ;;  %v4787_v8 = vcombine.high %v7384_v36, %v8659_v2  ;;  %v3088_v53 = vcombine.high %v7404_v60, %v8659_v2 }
 0x39d   :  { %v4165_v43 = vcombine.low %v7419_v35, %v7411_v1  ;;  %v7458_v24 = vrot.slane %v3178_v42, %v5982_v50 }
 0x39e   :  { %v4240_v55 = vrot.slane %v4232_v16, %v6006_v59  ;;  %v7424_v20 = vrot.slane %v4788_v14, %v5982_v50  ;;  %5075 = vrot.lane.b32.xlu0 %v4787_v8, %s5736_s10  ;;  %v7435_v16 = vrot.slane %v3578_v18, %v6006_v59  ;;  %v4729_v8 = vrot.slane %v4721_v10, %v5982_v50 }
 0x39f   :  { %v7415_v21 = vpop.permute.xlu1 %4677  ;;  %v7455_v10 = vrot.slane %v4165_v43, %v6006_v59  ;;  %v8734_v43 = vmov 0.0  }
 0x3a0   :  { %v7429_v25 = vrot.slane %v7415_v21, %v5982_v50  ;;  %4496 = vrot.lane.b32.xlu1 %v4240_v55, %s5740_s14  ;;  %8731 = vst [vmem:[#allocation13_spill] sm:$0xff] %v7435_v16  ;;  %v3610_v60 = vcombine.high %v7435_v16, %v8659_v2  ;;  %v4752_v5 = vcombine.low %v4729_v8, %v4744_v23 }
 0x3a1   :  { %8733 = vst [vmem:[#allocation15_spill] sm:$0xff] %v7455_v10  ;;  %v4302_v42 = vcombine.high %v7421_v39, %v8734_v43  ;;  %v4197_v16 = vcombine.high %v7455_v10, %v8734_v43 }
 0x3a2   :  { %v4819_v14 = vcombine.low %v7424_v20, %v7429_v25  ;;  %3331 = vrot.lane.b32.xlu0 %v3088_v53, %s5745_s19 }
 0x3a3   :  { %v7444_v41 = vpop.permute.xlu1 %2997 }
 0x3a4   :  { %8732 = vst [vmem:[#allocation14_spill] sm:$0xff] %v7444_v41  ;;  %v3193_v18 = vcombine.high %v7444_v41, %v8659_v2  ;;  %v4827_v27 = vrot.slane %v4819_v14, %v6006_v59  ;;  %v3155_v14 = vcombine.high %v7321_v7, %v8734_v43  ;;  %v3057_v2 = vcombine.high %v7365_v45, %v7352_v57 }
 0x3a5   :  { %v4264_v45 = vcombine.high %v4240_v55, %v8734_v43 }
 0x3a6   :  { %v7463_v44 = vrot.slane %v3193_v18, %v5982_v50  ;;  %5083 = vrot.lane.b32.xlu1 %v4827_v27, %s5740_s14  ;;  %3853 = vrot.lane.b32.xlu0 %v3610_v60, %s5745_s19  ;;  %v7478_v18 = vrot.slane %v4752_v5, %v6006_v59  ;;  %v3677_v60 = vcombine.high %v7340_v33, %v8734_v43 }
 0x3a7   :  { %v7466_v53 = vpop.permute.xlu1 %4100  ;;  %v7493_v5 = vrot.slane %v4302_v42, %v5982_v50  ;;  %v3071_v42 = vrot.slane %v3057_v2, %v6006_v59  ;;  %v4851_v2 = vcombine.high %v4827_v27, %v8734_v43  ;;  %v4233_v27 = vcombine.high %v7391_v56, %v7388_v52 }
 0x3a8   :  { %8735 = vst [vmem:[#allocation16_spill] sm:$0xff] %v7478_v18  ;;  %v4784_v10 = vcombine.high %v7478_v18, %v8734_v43 }
 0x3aa   :  { %3395 = vrot.lane.b32.xlu1 %v3155_v14, %s5748_s22  ;;  %4440 = vrot.lane.b32.xlu0 %v4197_v16, %s5745_s19  ;;  %v4874_v16 = vcombine.high %v7460_v6, %v7483_v38 }
 0x3ab   :  { %v7481_v41 = vpop.permute.xlu1 %4112  ;;  %v8758_v33 = vld [vmem:[#allocation14_spill] sm:$0xff] }
 0x3ac   :  { %v4287_v7 = vcombine.high %v7466_v53, %v7481_v41  ;;  %v7515_v18 = vrot.slane %v4874_v16, %v5982_v50 }
 0x3ae   :  { %v7496_v14 = vrot.slane %v4287_v7, %v5982_v50  ;;  %3917 = vrot.lane.b32.xlu1 %v3677_v60, %s5748_s22  ;;  %5027 = vrot.lane.b32.xlu0 %v4784_v10, %s5745_s19  ;;  %v3579_v7 = vcombine.high %v7379_v12, %v7397_v34  ;;  %v3124_v10 = vcombine.high %v7300_v19, %v7297_v3 }
 0x3af   :  { %v7503_v39 = vpop.permute.xlu1 %4693  ;;  %v4166_v12 = vcombine.high %v7419_v35, %v7411_v1  ;;  %v4753_v3 = vcombine.high %v4729_v8, %v4744_v23  ;;  %v7541_v35 = vpop.permute.xlu0 %3005  ;;  %v4820_v23 = vcombine.high %v7424_v20, %v7429_v25 }
 0x3b0   :  { %v4889_v57 = vcombine.high %v7503_v39, %v8734_v43  ;;  %v3593_v34 = vrot.slane %v3579_v7, %v6006_v59  ;;  %v3138_v16 = vrot.slane %v3124_v10, %v6006_v59 }
 0x3b1   :  { %v4180_v19 = vrot.slane %v4166_v12, %v6006_v59  ;;  %v4834_v8 = vrot.slane %v4820_v23, %v6006_v59  ;;  %v3093_v12 = vcombine.high %v7256_v30, %v7284_v54 }
 0x3b2   :  { %v7518_v60 = vrot.slane %v4889_v57, %v5982_v50  ;;  %4504 = vrot.lane.b32.xlu1 %v4264_v45, %s5748_s22  ;;  %3339 = vrot.lane.b32.xlu0 %v3071_v42, %s5737_s11  ;;  %v3646_v57 = vcombine.high %v7304_v47, %v7308_v37  ;;  %v4767_v45 = vrot.slane %v4753_v3, %v6006_v59 }
 0x3b3   :  { %v7544_v7 = vpop.permute.xlu1 %2993  ;;  %v4247_v47 = vrot.slane %v4233_v27, %v6006_v59  ;;  %v3089_v37 = vcombine.high %v3071_v42, %v8734_v43  ;;  %v7553_v52 = vpop.permute.xlu0 %4114  ;;  %v3611_v10 = vcombine.high %v3593_v34, %v8734_v43  ;;  %v3156_v20 = vcombine.high %v3138_v16, %v8734_v43 }
 0x3b4   :  { %v3660_v1 = vrot.slane %v3646_v57, %v6006_v59  ;;  %v4198_v42 = vcombine.high %v4180_v19, %v8734_v43  ;;  %v4785_v57 = vcombine.high %v4767_v45, %v8734_v43  ;;  %v7583_v27 = vrot.slane %v3093_v12, %v5982_v50 }
 0x3b5   :  { %v4265_v54 = vcombine.high %v4247_v47, %v8734_v43 }
 0x3b6   :  { %5091 = vrot.lane.b32.xlu1 %v4851_v2, %s5748_s22  ;;  %3861 = vrot.lane.b32.xlu0 %v3593_v34, %s5737_s11  ;;  %v3678_v34 = vcombine.high %v3660_v1, %v8734_v43 }
 0x3b7   :  { %v7556_v56 = vpop.permute.xlu1 %4102  ;;  %v7563_v25 = vpop.permute.xlu0 %4701 }
 0x3ba   :  { %3403 = vrot.lane.b32.xlu1 %v3138_v16, %s5741_s15  ;;  %4448 = vrot.lane.b32.xlu0 %v4180_v19, %s5737_s11  ;;  %v3108_v16 = vcombine.high %v7239_v49, %v8734_v43  ;;  %v3615_v19 = vcombine.high %v7132_v11, %v7155_v9  ;;  %v8736_v49 = vcombine.low %v7264_v61, %v7269_v32 }
 0x3bb   :  { %v7566_v2 = vpop.permute.xlu1 %4689  ;;  %v7577_v3 = vpop.permute.xlu0 %4086 }
 0x3bc   :  { %v7595_v23 = vrot.slane %v3108_v16, %v5982_v50  ;;  %v7600_v11 = vrot.slane %v3615_v19, %v5982_v50 }
 0x3be   :  { %3925 = vrot.lane.b32.xlu1 %v3660_v1, %s5741_s15  ;;  %5035 = vrot.lane.b32.xlu0 %v4767_v45, %s5737_s11  ;;  %v3630_v1 = vcombine.high %v7140_v15, %v8734_v43  ;;  %v3080_v45 = vrot.slane %v8736_v49, %v6006_v59  ;;  %v3139_v9 = vcombine.low %v7583_v27, %v7595_v23 }
 0x3bf   :  { %v7585_v30 = vpop.permute.xlu1 %2989  ;;  %v4202_v15 = vcombine.high %v7266_v0, %v7368_v48  ;;  %v7610_v32 = vpop.permute.xlu0 %4673  ;;  %v4804_v48 = vcombine.high %v7415_v21, %v8734_v43 }
 0x3c0   :  { %v7608_v61 = vrot.slane %v3630_v1, %v5982_v50 }
 0x3c1   :  { %v7623_v0 = vrot.slane %v4202_v15, %v5982_v50  ;;  %v7646_v16 = vrot.slane %v4804_v48, %v5982_v50 }
 0x3c2   :  { %4512 = vrot.lane.b32.xlu1 %v4247_v47, %s5741_s15  ;;  %3347 = vrot.lane.b32.xlu0 %v3089_v37, %s5746_s20  ;;  %v4852_v47 = vcombine.high %v4834_v8, %v8734_v43  ;;  %v8737_v37 = vcombine.low %v6059_v26, %v6043_v17  ;;  %v3661_v17 = vcombine.low %v7600_v11, %v7608_v61 }
 0x3c3   :  { %v8738_v26 = vcombine.low %v7326_v58, %v7329_v31 }
 0x3c4   :  { %v3669_v31 = vrot.slane %v3661_v17, %v6006_v59 }
 0x3c6   :  { %5099 = vrot.lane.b32.xlu1 %v4834_v8, %s5741_s15  ;;  %3869 = vrot.lane.b32.xlu0 %v3611_v10, %s5746_s20  ;;  %v3602_v10 = vrot.slane %v8737_v37, %v6006_v59  ;;  %v3147_v8 = vrot.slane %v3139_v9, %v6006_v59  ;;  %v3090_v9 = vcombine.high %v3080_v45, %v8734_v43 }
 0x3c7   :  { %v3679_v48 = vcombine.high %v3669_v31, %v8734_v43 }
 0x3ca   :  { %3411 = vrot.lane.b32.xlu1 %v3156_v20, %s5749_s23  ;;  %4456 = vrot.lane.b32.xlu0 %v4198_v42, %s5746_s20  ;;  %v4217_v20 = vcombine.high %v7317_v46, %v8734_v43  ;;  %v7618_v42 = vpop.permute.xlu1 %4098  ;;  %v4189_v46 = vrot.slane %v8738_v26, %v6006_v59 }
 0x3cc   :  { %v7635_v12 = vrot.slane %v4217_v20, %v5982_v50  ;;  %v4199_v20 = vcombine.high %v4189_v46, %v8734_v43 }
 0x3ce   :  { %3933 = vrot.lane.b32.xlu1 %v3678_v34, %s5749_s23  ;;  %5043 = vrot.lane.b32.xlu0 %v4785_v57, %s5746_s20  ;;  %v4789_v34 = vcombine.high %v7286_v40, %v7393_v22  ;;  %v7640_v57 = vpop.permute.xlu0 %2999  ;;  %v4248_v21 = vcombine.low %v7623_v0, %v7635_v12  ;;  %v7648_v58 = vpop.permute.xlu1 %4685  ;;  %v8739_v40 = vcombine.low %v7362_v51, %v7359_v13 }
 0x3cf   :  { %v3612_v51 = vcombine.high %v3602_v10, %v8734_v43 }
 0x3d0   :  { %v4776_v22 = vrot.slane %v8739_v40, %v6006_v59  ;;  %v7656_v19 = vrot.slane %v4789_v34, %v5982_v50  ;;  %v4256_v1 = vrot.slane %v4248_v21, %v6006_v59 }
 0x3d2   :  { %4520 = vrot.lane.b32.xlu1 %v4265_v54, %s5749_s23  ;;  %3355 = vrot.lane.b32.xlu0 %v3080_v45, %s5738_s12  ;;  %v4835_v54 = vcombine.low %v7656_v19, %v7646_v16  ;;  %v7663_v49 = vpop.permute.xlu0 %4695  ;;  %v7666_v15 = vpop.permute.xlu1 %4108  ;;  %v3157_v45 = vcombine.high %v3147_v8, %v8734_v43 }
 0x3d4   :  { %v4843_v13 = vrot.slane %v4835_v54, %v6006_v59  ;;  %v3662_v54 = vcombine.high %v7600_v11, %v7608_v61  ;;  %v3766_v61 = vcombine.low %v7192_v4, %v7166_v63  ;;  %v8749_v4 = vld [vmem:[#allocation6_spill] sm:$0xff] }
 0x3d6   :  { %5107 = vrot.lane.b32.xlu1 %v4852_v47, %s5749_s23  ;;  %3877 = vrot.lane.b32.xlu0 %v3602_v10, %s5738_s12  ;;  %v7673_v47 = vpop.permute.xlu0 %4679  ;;  %v7676_v37 = vpop.permute.xlu1 %4092  ;;  %v4786_v10 = vcombine.high %v4776_v22, %v8734_v43  ;;  %v7742_v63 = vrot.slane %v3766_v61, %v5982_v50  ;;  %v4940_v61 = vcombine.low %v7566_v2, %v7563_v25 }
 0x3da   :  { %3419 = vrot.lane.b32.xlu1 %v3147_v8, %s5742_s16  ;;  %4464 = vrot.lane.b32.xlu0 %v4189_v46, %s5738_s12  ;;  %v7683_v17 = vpop.permute.xlu0 %3007  ;;  %v7686_v26 = vpop.permute.xlu1 %2995  ;;  %v4266_v8 = vcombine.high %v4256_v1, %v8734_v43  ;;  %v3140_v46 = vcombine.high %v7583_v27, %v7595_v23  ;;  %v4249_v23 = vcombine.high %v7623_v0, %v7635_v12 }
 0x3db   :  { %8740 = vst [vmem:[#allocation17_spill] sm:$0xff] %v7683_v17  ;;  %8741 = vst [vmem:[#allocation18_spill] sm:$0xff] %v7686_v26 }
 0x3de   :  { %3941 = vrot.lane.b32.xlu1 %v3669_v31, %s5742_s16  ;;  %5051 = vrot.lane.b32.xlu0 %v4776_v22, %s5738_s12  ;;  %v7691_v34 = vpop.permute.xlu0 %4116  ;;  %v7698_v21 = vpop.permute.xlu1 %4104  ;;  %v4853_v31 = vcombine.high %v4843_v13, %v8734_v43  ;;  %v3154_v22 = vrot.slane %v3140_v46, %v6006_v59 }
 0x3df   :  { %8742 = vst [vmem:[#allocation19_spill] sm:$0xff] %v7691_v34  ;;  %8743 = vst [vmem:[#allocation20_spill] sm:$0xff] %v7698_v21  ;;  %v8761_v34 = vld [vmem:[#allocation7_spill] sm:$0xff] }
 0x3e0   :  { %v3159_v26 = vcombine.low %v8761_v34, %v7585_v30  ;;  %v4286_v30 = vcombine.low %v7466_v53, %v7481_v41  ;;  %v7873_v41 = vld.sshfl [vmem:[#allocation2 + $0x62] sm:$0xff pattern:$0x76325410] }
 0x3e2   :  { %4528 = vrot.lane.b32.xlu1 %v4256_v1, %s5742_s16  ;;  %3363 = vrot.lane.b32.xlu0 %v3090_v9, %s5747_s21  ;;  %v7702_v40 = vpop.permute.xlu0 %4703  ;;  %v7711_v27 = vpop.permute.xlu1 %4691  ;;  %v3676_v1 = vrot.slane %v3662_v54, %v6006_v59  ;;  %v3158_v54 = vcombine.high %v3154_v22, %v8734_v43  ;;  %v3166_v34 = vrot.slane %v3159_v26, %v5982_v50  ;;  %v8767_v26 = vld [vmem:[#allocation8_spill] sm:$0xff] }
 0x3e3   :  { %8744 = vst [vmem:[#allocation21_spill] sm:$0xff] %v7702_v40  ;;  %8745 = vst [vmem:[#allocation22_spill] sm:$0xff] %v7711_v27  ;;  %v7876_v53 = vrot.slane %v4286_v30, %v5982_v50 }
 0x3e6   :  { %5115 = vrot.lane.b32.xlu1 %v4843_v13, %s5742_s16  ;;  %3885 = vrot.lane.b32.xlu0 %v3612_v51, %s5747_s21  ;;  %v7721_v9 = vpop.permute.xlu0 %4110  ;;  %v7736_v12 = vpop.permute.xlu1 %3001  ;;  %v4263_v13 = vrot.slane %v4249_v23, %v6006_v59 }
 0x3e7   :  { %8746 = vst [vmem:[#allocation23_spill] sm:$0xff] %v7721_v9  ;;  %8748 = vst [vmem:[#allocation25_spill] sm:$0xff] %v7736_v12  ;;  %v7810_v9 = vrot.slane %v4940_v61, %v5982_v50  ;;  %v4921_v61 = vcombine.high %v7515_v18, %v7518_v60 }
 0x3e8   :  { %v4267_v17 = vcombine.high %v4263_v13, %v8734_v43 }
 0x3ea   :  { %3427 = vrot.lane.b32.xlu1 %v3157_v45, %s5750_s24  ;;  %4472 = vrot.lane.b32.xlu0 %v4199_v20, %s5747_s21  ;;  %v7746_v45 = vrot.slane %v8749_v4, %v5982_v50  ;;  %v7758_v20 = vpop.permute.xlu1 %4697  ;;  %v4353_v4 = vcombine.low %v7556_v56, %v7553_v52 }
 0x3eb   :  { %8750 = vst [vmem:[#allocation6_spill] sm:$0xff] %v7758_v20  ;;  %v7807_v20 = vrot.slane %v8758_v33, %v5982_v50  ;;  %v7825_v33 = vrot.slane %v7663_v49, %v5982_v50 }
 0x3ee   :  { %3949 = vrot.lane.b32.xlu1 %v3679_v48, %s5750_s24  ;;  %5059 = vrot.lane.b32.xlu0 %v4786_v10, %s5747_s21  ;;  %v8751_v10 = vld [vmem:[#allocation5_spill] sm:$0xff] }
 0x3f2   :  { %4536 = vrot.lane.b32.xlu1 %v4266_v8, %s5750_s24  ;;  %3371 = vrot.lane.b32.xlu0 %v7280_v62, %s5739_s13  ;;  %v3225_v62 = vcombine.high %v7458_v24, %v7463_v44  ;;  %v8752_v8 = vld [vmem:[#allocation4_spill] sm:$0xff] }
 0x3f3   :  { %v3747_v46 = vcombine.high %v8752_v8, %v8751_v10 }
 0x3f4   :  { %v7724_v11 = vrot.slane %v3225_v62, %v6006_v59  ;;  %v3797_v62 = vcombine.low %v7742_v63, %v7746_v45 }
 0x3f6   :  { %5123 = vrot.lane.b32.xlu1 %v4853_v31, %s5750_s24  ;;  %3893 = vrot.lane.b32.xlu0 %v7293_v28, %s5739_s13  ;;  %v3244_v28 = vcombine.low %v7544_v7, %v7541_v35  ;;  %8747 = vst [vmem:[#allocation24_spill] sm:$0xff] %v7724_v11  ;;  %v3243_v51 = vcombine.high %v7724_v11, %v8734_v43  ;;  %v5696_v11 = vld [vmem:[#allocation2 + $0x4a] ss:$48 sps:$4 sm:$0xff]  }
 0x3f7   :  { %v4334_v31 = vcombine.high %v7496_v14, %v7493_v5 }
 0x3f8   :  { %v7734_v0 = vrot.slane %v3244_v28, %v5982_v50  ;;  %v7777_v28 = vrot.slane %v3747_v46, %v6006_v59  ;;  %v8757_v46 = vld [vmem:[#allocation9_spill] sm:$0xff] }
 0x3fa   :  { %3435 = vrot.lane.b32.xlu1 %v3154_v22, %s5743_s17  ;;  %4480 = vrot.lane.b32.xlu0 %v7345_v29, %s5739_s13  ;;  %v4836_v29 = vcombine.high %v7656_v19, %v7646_v16  ;;  %8753 = vst [vmem:[#allocation5_spill] sm:$0xff] %v7777_v28  ;;  %v7784_v22 = vrot.slane %v3797_v62, %v6006_v59 }
 0x3fb   :  { %v7801_v62 = vrot.slane %v7666_v15, %v5982_v50 }
 0x3fc   :  { %v7753_v16 = vpop.permute.xlu0 %3379  ;;  %v7761_v48 = vrot.slane %v4836_v29, %v6006_v59 }
 0x3fe   :  { %3957 = vrot.lane.b32.xlu1 %v3676_v1, %s5743_s17  ;;  %5067 = vrot.lane.b32.xlu0 %v7384_v36, %s5739_s13  ;;  %v7750_v36 = vrot.slane %v7640_v57, %v5982_v50  ;;  %v4854_v30 = vcombine.high %v7761_v48, %v8734_v43 }
 0x400   :  { %v3275_v19 = vcombine.low %v7734_v0, %v7750_v36  ;;  %v7781_v29 = vpop.permute.xlu0 %3901 }
 0x401   :  { %8754 = vst [vmem:[#allocation4_spill] sm:$0xff] %v7781_v29 }
 0x402   :  { %4544 = vrot.lane.b32.xlu1 %v4263_v13, %s5743_s17  ;;  %3381 = vrot.lane.b32.xlu0 %v3243_v51, %s5736_s10  ;;  %v7774_v23 = vrot.slane %v3275_v19, %v6006_v59  ;;  %v7787_v51 = vrot.slane %v4334_v31, %v6006_v59  ;;  %v8756_v19 = vld [vmem:[#allocation10_spill] sm:$0xff]  ;;  %v3765_v31 = vcombine.high %v7777_v28, %v8734_v43 }
 0x403   :  { %v3177_v55 = vcombine.low %v8757_v46, %v8756_v19  ;;  %v7817_v46 = vrot.slane %v4353_v4, %v5982_v50  ;;  %v3680_v4 = vcombine.high %v3676_v1, %v8734_v43  ;;  %v7852_v28 = vrot.slane %v4921_v61, %v6006_v59 }
 0x404   :  { %8755 = vst [vmem:[#allocation26_spill] sm:$0xff] %v7787_v51  ;;  %v4352_v19 = vcombine.high %v7787_v51, %v8734_v43 }
 0x405   :  { %v7821_v40 = vrot.slane %v3177_v55, %v5982_v50  ;;  %v4384_v12 = vcombine.low %v7817_v46, %v7801_v62  ;;  %8764 = vst [vmem:[#allocation27_spill] sm:$0xff] %v7852_v28  ;;  %v4939_v61 = vcombine.high %v7852_v28, %v8734_v43  ;;  %v8768_v28 = vld [vmem:[#allocation12_spill] sm:$0xff] }
 0x406   :  { %5131 = vrot.lane.b32.xlu1 %v7761_v48, %s5743_s17  ;;  %3443 = vrot.lane.b32.xlu0 %v3158_v54, %s5751_s25  ;;  %v7791_v54 = vpop.permute.xlu1 %3387  ;;  %v3689_v48 = vld [vmem:[#allocation2 + $0x2a] sm:$0x3] }
 0x407   :  { %v3208_v55 = vcombine.low %v7821_v40, %v7807_v20  ;;  %v7849_v1 = vrot.slane %v4384_v12, %v6006_v59 }
 0x408   :  { %v7812_v27 = vpop.permute.xlu0 %4488 }
 0x409   :  { %8759 = vst [vmem:[#allocation10_spill] sm:$0xff] %v7812_v27  ;;  %v7855_v27 = vrot.slane %v3208_v55, %v6006_v59  ;;  %v3168_v55 = vcombine.low %v3166_v34, %v8767_v26 }
 0x40a   :  { %3389 = vrot.lane.b32.xlu1 %v7774_v23, %s5740_s14  ;;  %3911 = vrot.lane.b32.xlu0 %v7784_v22, %s5740_s14  ;;  %v7832_v21 = vpop.permute.xlu1 %3909 }
 0x40b   :  { %8760 = vst [vmem:[#allocation9_spill] sm:$0xff] %v7832_v21  ;;  %8765 = vst [vmem:[#allocation28_spill] sm:$0xff] %v7855_v27  ;;  %v3307_v21 = vcombine.high %v7774_v23, %v8734_v43  ;;  %v7926_v23 = vrot.slane %v7503_v39, %v5982_v50 }
 0x40e   :  { %3903 = vrot.lane.b32.xlu1 %v3765_v31, %s5736_s10  ;;  %4490 = vrot.lane.b32.xlu0 %v4352_v19, %s5736_s10  ;;  %v4971_v31 = vcombine.low %v7810_v9, %v7825_v33 }
 0x410   :  { %v7841_v19 = vpop.permute.xlu0 %5075 }
 0x411   :  { %8762 = vst [vmem:[#allocation14_spill] sm:$0xff] %v7841_v19  ;;  %v3240_v19 = vcombine.high %v7855_v27, %v8734_v43 }
 0x412   :  { %3965 = vrot.lane.b32.xlu1 %v3680_v4, %s5751_s25  ;;  %4552 = vrot.lane.b32.xlu0 %v4267_v17, %s5751_s25  ;;  %v7846_v51 = vpop.permute.xlu1 %4496  ;;  %v4979_v17 = vrot.slane %v4971_v31, %v6006_v59  ;;  %v7871_v4 = vrot.slane %v5696_v11, %v5982_v50 }
 0x413   :  { %8763 = vst [vmem:[#allocation7_spill] sm:$0xff] %v7846_v51  ;;  %v7886_v51 = vrot.slane %v8768_v28, %v5982_v50  ;;  %v3175_v28 = vrot.slane %v3168_v55, %v6006_v59  ;;  %v3829_v55 = vcombine.high %v7784_v22, %v8734_v43 }
 0x414   :  { %v7860_v13 = vpop.permute.xlu0 %3331  ;;  %v3730_v34 = vcombine.low %v7871_v4, %v7873_v41 }
 0x415   :  { %v4317_v26 = vcombine.low %v7876_v53, %v7886_v51 }
 0x416   :  { %4498 = vrot.lane.b32.xlu1 %v7849_v1, %s5740_s14  ;;  %5085 = vrot.lane.b32.xlu0 %v4979_v17, %s5740_s14 }
 0x418   :  { %v7866_v12 = vpop.permute.xlu1 %5083  ;;  %v7879_v31 = vpop.permute.xlu0 %3853 }
 0x419   :  { %8766 = vst [vmem:[#allocation29_spill] sm:$0xff] %v7866_v12  ;;  %v5697_v12 = vld [vmem:[#allocation2 + $0x12] ss:$48 sps:$4 sm:$0x33]  }
 0x41a   :  { %5077 = vrot.lane.b32.xlu1 %v4939_v61, %s5736_s10  ;;  %3333 = vrot.lane.b32.xlu0 %v3240_v19, %s5745_s19  ;;  %v4268_v61 = vcombine.low %v7577_v3, %v7618_v42  ;;  %v3688_v19 = vrot.slane %v5697_v12, %v5982_v50  ;;  %v7918_v12 = vrot.slane %v4317_v26, %v6006_v59 }
 0x41c   :  { %v7889_v11 = vpop.permute.xlu1 %3395  ;;  %v7899_v27 = vpop.permute.xlu0 %4440  ;;  %v4275_v3 = vrot.slane %v4268_v61, %v5982_v50  ;;  %8772 = vst [vmem:[#allocation31_spill] sm:$0xff] %v7918_v12 }
 0x41d   :  { %8769 = vst [vmem:[#allocation8_spill] sm:$0xff] %v7889_v11  ;;  %v7910_v11 = vrot.slane %v3730_v34, %v6006_v59 }
 0x41e   :  { %5139 = vrot.lane.b32.xlu1 %v4854_v30, %s5751_s25  ;;  %3451 = vrot.lane.b32.xlu0 %v3175_v28, %s5744_s18  ;;  %v4873_v30 = vcombine.low %v7460_v6, %v7483_v38  ;;  %v4277_v26 = vcombine.low %v4275_v3, %v7676_v37  ;;  %v4349_v6 = vcombine.high %v7918_v12, %v8734_v43 }
 0x41f   :  { %8771 = vst [vmem:[#allocation30_spill] sm:$0xff] %v7910_v11  ;;  %v3762_v22 = vcombine.high %v7910_v11, %v8734_v43  ;;  %v4855_v37 = vcombine.low %v7610_v32, %v7648_v58  ;;  %v4416_v32 = vcombine.high %v7849_v1, %v8734_v43  ;;  %v3209_v58 = vcombine.high %v7821_v40, %v7807_v20 }
 0x420   :  { %v7905_v29 = vpop.permute.xlu1 %3917  ;;  %v7913_v42 = vpop.permute.xlu0 %5027  ;;  %v7938_v38 = vrot.slane %v4873_v30, %v5982_v50  ;;  %v3276_v40 = vcombine.high %v7734_v0, %v7750_v36  ;;  %v3731_v0 = vcombine.high %v7871_v4, %v7873_v41  ;;  %v4318_v36 = vcombine.high %v7876_v53, %v7886_v51 }
 0x421   :  { %8770 = vst [vmem:[#allocation12_spill] sm:$0xff] %v7905_v29  ;;  %v3690_v29 = vcombine.low %v3688_v19, %v3689_v48  ;;  %v4284_v48 = vrot.slane %v4277_v26, %v6006_v59  ;;  %v5003_v26 = vcombine.high %v4979_v17, %v8734_v43  ;;  %v3223_v1 = vrot.slane %v3209_v58, %v6006_v59 }
 0x422   :  { %3397 = vrot.lane.b32.xlu1 %v3307_v21, %s5748_s22  ;;  %3919 = vrot.lane.b32.xlu0 %v3829_v55, %s5748_s22  ;;  %v4904_v21 = vcombine.low %v7938_v38, %v7926_v23  ;;  %v4862_v55 = vrot.slane %v4855_v37, %v5982_v50  ;;  %v4385_v4 = vcombine.high %v7817_v46, %v7801_v62 }
 0x423   :  { %v3697_v39 = vrot.slane %v3690_v29, %v6006_v59  ;;  %v4972_v53 = vcombine.high %v7810_v9, %v7825_v33 }
 0x424   :  { %v7928_v34 = vpop.permute.xlu1 %4504  ;;  %v7933_v61 = vpop.permute.xlu0 %3339  ;;  %v7955_v29 = vrot.slane %v4904_v21, %v6006_v59  ;;  %v4399_v62 = vrot.slane %v4385_v4, %v6006_v59 }
 0x425   :  { %v3698_v51 = vcombine.high %v3697_v39, %v8734_v43 }
 0x426   :  { %3855 = vrot.lane.b32.xlu1 %v3762_v22, %s5745_s19  ;;  %4442 = vrot.lane.b32.xlu0 %v4349_v6, %s5745_s19  ;;  %8773 = vst [vmem:[#allocation32_spill] sm:$0xff] %v7955_v29  ;;  %v4864_v6 = vcombine.low %v4862_v55, %v7673_v47  ;;  %v4936_v37 = vcombine.high %v7955_v29, %v8734_v43 }
 0x427   :  { %v3176_v55 = vcombine.high %v3175_v28, %v8734_v43 }
 0x428   :  { %v7947_v19 = vpop.permute.xlu1 %5091  ;;  %v7950_v3 = vpop.permute.xlu0 %3861  ;;  %v4871_v47 = vrot.slane %v4864_v6, %v6006_v59 }
 0x42a   :  { %3973 = vrot.lane.b32.xlu1 %v3697_v39, %s5744_s18  ;;  %4560 = vrot.lane.b32.xlu0 %v4284_v48, %s5744_s18  ;;  %v4905_v39 = vcombine.high %v7938_v38, %v7926_v23  ;;  %v3241_v23 = vcombine.high %v3223_v1, %v8734_v43 }
 0x42c   :  { %v7958_v30 = vpop.permute.xlu1 %3403  ;;  %v7964_v22 = vpop.permute.xlu0 %4448  ;;  %v4919_v33 = vrot.slane %v4905_v39, %v6006_v59 }
 0x42e   :  { %4506 = vrot.lane.b32.xlu1 %v4416_v32, %s5748_s22  ;;  %5093 = vrot.lane.b32.xlu0 %v5003_v26, %s5748_s22  ;;  %v3798_v32 = vcombine.high %v7742_v63, %v7746_v45  ;;  %v3290_v26 = vrot.slane %v3276_v40, %v6006_v59  ;;  %v3745_v45 = vrot.slane %v3731_v0, %v6006_v59 }
 0x42f   :  { %v4332_v40 = vrot.slane %v4318_v36, %v6006_v59  ;;  %v4986_v36 = vrot.slane %v4972_v53, %v6006_v59  ;;  %v4937_v29 = vcombine.high %v4919_v33, %v8734_v43 }
 0x430   :  { %v7970_v21 = vpop.permute.xlu1 %3925  ;;  %v7974_v11 = vpop.permute.xlu0 %5035  ;;  %v3812_v28 = vrot.slane %v3798_v32, %v6006_v59  ;;  %v3763_v53 = vcombine.high %v3745_v45, %v8734_v43 }
 0x432   :  { %5029 = vrot.lane.b32.xlu1 %v4936_v37, %s5745_s19  ;;  %3341 = vrot.lane.b32.xlu0 %v3223_v1, %s5737_s11  ;;  %v3308_v1 = vcombine.high %v3290_v26, %v8734_v43 }
 0x434   :  { %v7981_v20 = vpop.permute.xlu1 %4512  ;;  %v7984_v17 = vpop.permute.xlu0 %3347 }
 0x436   :  { %5147 = vrot.lane.b32.xlu1 %v4871_v47, %s5744_s18  ;;  %3459 = vrot.lane.b32.xlu0 %v3176_v55, %s5752_s26  ;;  %v4285_v55 = vcombine.high %v4284_v48, %v8734_v43 }
 0x438   :  { %v7991_v58 = vpop.permute.xlu1 %5099  ;;  %v7998_v6 = vpop.permute.xlu0 %3869 }
 0x43a   :  { %3405 = vrot.lane.b32.xlu1 %v3290_v26, %s5741_s15  ;;  %3927 = vrot.lane.b32.xlu0 %v3812_v28, %s5741_s15  ;;  %v3260_v26 = vcombine.high %v7640_v57, %v8734_v43  ;;  %v8775_v57 = vcombine.low %v7458_v24, %v7463_v44  ;;  %v5004_v24 = vcombine.high %v4986_v36, %v8734_v43 }
 0x43c   :  { %v8003_v63 = vpop.permute.xlu1 %3411  ;;  %v8006_v37 = vpop.permute.xlu0 %4456 }
 0x43e   :  { %3863 = vrot.lane.b32.xlu1 %v3745_v45, %s5737_s11  ;;  %4450 = vrot.lane.b32.xlu0 %v4332_v40, %s5737_s11 }
 0x440   :  { %v8014_v41 = vpop.permute.xlu1 %3933  ;;  %v8019_v32 = vpop.permute.xlu0 %5043 }
 0x442   :  { %3981 = vrot.lane.b32.xlu1 %v3698_v51, %s5752_s26  ;;  %4568 = vrot.lane.b32.xlu0 %v4285_v55, %s5752_s26  ;;  %v4872_v51 = vcombine.high %v4871_v47, %v8734_v43  ;;  %v3245_v47 = vcombine.high %v7544_v7, %v7541_v35  ;;  %v4417_v7 = vcombine.high %v4399_v62, %v8734_v43 }
 0x444   :  { %v8025_v0 = vpop.permute.xlu1 %4520  ;;  %v8028_v46 = vpop.permute.xlu0 %3355  ;;  %v8068_v12 = vrot.slane %v3245_v47, %v5982_v50 }
 0x446   :  { %4514 = vrot.lane.b32.xlu1 %v4399_v62, %s5741_s15  ;;  %5101 = vrot.lane.b32.xlu0 %v4986_v36, %s5741_s15  ;;  %v4956_v36 = vcombine.high %v7663_v49, %v8734_v43  ;;  %v8778_v49 = vcombine.low %v7496_v14, %v7493_v5 }
 0x448   :  { %v8033_v9 = vpop.permute.xlu1 %5107  ;;  %v8036_v48 = vpop.permute.xlu0 %3877  ;;  %v8143_v5 = vrot.slane %v4956_v36, %v5982_v50  ;;  %v8782_v36 = vcombine.low %v7515_v18, %v7518_v60 }
 0x449   :  { %8774 = vst [vmem:[#allocation33_spill] sm:$0xff] %v8033_v9 }
 0x44a   :  { %5037 = vrot.lane.b32.xlu1 %v4919_v33, %s5737_s11  ;;  %3349 = vrot.lane.b32.xlu0 %v3241_v23, %s5746_s20  ;;  %v4350_v23 = vcombine.high %v4332_v40, %v8734_v43  ;;  %v5727_v40 = vld [vmem:[#allocation2 + $0x82] sm:$0xff] }
 0x44c   :  { %v8041_v38 = vpop.permute.xlu1 %3419  ;;  %v8044_v4 = vpop.permute.xlu0 %4464 }
 0x44e   :  { %5155 = vrot.lane.b32.xlu1 %v4872_v51, %s5752_s26  ;;  %3871 = vrot.lane.b32.xlu0 %v3763_v53, %s5746_s20  ;;  %v3830_v51 = vcombine.high %v3812_v28, %v8734_v43  ;;  %v5729_v28 = vld [vmem:[#allocation2 + $0x6a] sm:$0xff] }
 0x44f   :  { %v3782_v33 = vcombine.high %v5729_v28, %v8734_v43  ;;  %v4354_v28 = vcombine.high %v7556_v56, %v7553_v52  ;;  %v8777_v56 = vld [vmem:[#allocation11_spill] sm:$0xff] }
 0x450   :  { %v8049_v55 = vpop.permute.xlu1 %3941  ;;  %v8052_v39 = vpop.permute.xlu0 %5051 }
 0x451   :  { %v8094_v44 = vrot.slane %v3782_v33, %v5982_v50 }
 0x452   :  { %3413 = vrot.lane.b32.xlu1 %v3308_v1, %s5749_s23  ;;  %4458 = vrot.lane.b32.xlu0 %v4350_v23, %s5746_s20  ;;  %v5728_v1 = vld [vmem:[#allocation2 + $0x52] sm:$0xff] }
 0x453   :  { %v3767_v23 = vcombine.high %v5728_v1, %v5727_v40  ;;  %v4369_v40 = vcombine.high %v7666_v15, %v8734_v43  ;;  %v4941_v15 = vcombine.high %v7566_v2, %v7563_v25  ;;  %v3465_v25 = vsel %vm596_vm6, %v8777_v56, %v7860_v13 }
 0x454   :  { %v8059_v45 = vpop.permute.xlu1 %4528  ;;  %v3364_v53 = vpop.permute.xlu0 %3363 }
 0x455   :  { %v8084_v47 = vrot.slane %v3767_v23, %v5982_v50  ;;  %v8776_v23 = vcombine.low %v8752_v8, %v8751_v10  ;;  %v8111_v33 = vrot.slane %v4369_v40, %v5982_v50  ;;  %v8127_v8 = vrot.slane %v8778_v49, %v6006_v59 }
 0x456   :  { %3935 = vrot.lane.b32.xlu1 %v3830_v51, %s5749_s23  ;;  %5045 = vrot.lane.b32.xlu0 %v4937_v29, %s5746_s20  ;;  %v3232_v51 = vrot.slane %v8775_v57, %v6006_v59  ;;  %v8079_v29 = vrot.slane %v3260_v26, %v5982_v50  ;;  %v8130_v40 = vrot.slane %v4354_v28, %v5982_v50 }
 0x457   :  { %v3813_v52 = vcombine.low %v8084_v47, %v8094_v44  ;;  %v8162_v49 = vrot.slane %v8782_v36, %v6006_v59 }
 0x458   :  { %v8070_v35 = vpop.permute.xlu1 %5115  ;;  %v3886_v9 = vpop.permute.xlu0 %3885  ;;  %v3291_v62 = vcombine.low %v8068_v12, %v8079_v29  ;;  %v4400_v14 = vcombine.low %v8130_v40, %v8111_v33 }
 0x45a   :  { %4522 = vrot.lane.b32.xlu1 %v4417_v7, %s5749_s23  ;;  %3357 = vrot.lane.b32.xlu0 %v3232_v51, %s5738_s12  ;;  %v3754_v7 = vrot.slane %v8776_v23, %v6006_v59  ;;  %v3299_v10 = vrot.slane %v3291_v62, %v6006_v59  ;;  %v8133_v62 = vrot.slane %v4941_v15, %v5982_v50  ;;  %v8780_v15 = vld [vmem:[#allocation13_spill] sm:$0xff] }
 0x45c   :  { %v8090_v1 = vpop.permute.xlu1 %3427  ;;  %v8096_v26 = vpop.permute.xlu0 %4472  ;;  %v3309_v36 = vcombine.high %v3299_v10, %v8734_v43 }
 0x45e   :  { %5109 = vrot.lane.b32.xlu1 %v5004_v24, %s5749_s23  ;;  %3879 = vrot.lane.b32.xlu0 %v3754_v7, %s5738_s12  ;;  %v3467_v24 = vsel %vm599_vm7, %v3465_v25, %v7933_v61  ;;  %v8152_v61 = vrot.slane %v3813_v52, %v6006_v59 }
 0x45f   :  { %v3469_v13 = vsel %vm8779_vm11, %v3467_v24, %v7984_v17  ;;  %v3987_v17 = vsel %vm596_vm6, %v8780_v15, %v7879_v31  ;;  %v3764_v31 = vcombine.high %v3754_v7, %v8734_v43  ;;  %vm8789_vm11 = vcmask 424960  }
 0x460   :  { %v8113_v57 = vpop.permute.xlu1 %3949  ;;  %v8121_v2 = vpop.permute.xlu0 %5059  ;;  %v3471_v23 = vsel %vm605_vm9, %v3469_v13, %v8028_v46  ;;  %v4987_v46 = vcombine.low %v8133_v62, %v8143_v5  ;;  %v3989_v52 = vsel %vm599_vm7, %v3987_v17, %v7950_v3  ;;  %v3242_v3 = vcombine.high %v3232_v51, %v8734_v43  ;;  %v8786_v13 = vld [vmem:[#allocation8_spill] sm:$0xff] }
 0x461   :  { %v3473_v56 = vsel %vm8781_vm13, %v3471_v23, %v3364_v53  ;;  %v3479_v53 = vsel %vm8723_vm10, %v7753_v16, %v7791_v54  ;;  %v3991_v18 = vsel %vm8784_vm14, %v3989_v52, %v7998_v6  ;;  %v8189_v54 = vrot.slane %v4400_v14, %v6006_v59  ;;  %v8788_v6 = vld [vmem:[#allocation15_spill] sm:$0xff] }
 0x462   :  { %3421 = vrot.lane.b32.xlu1 %v3299_v10, %s5742_s16  ;;  %4466 = vrot.lane.b32.xlu0 %v8127_v8, %s5738_s12  ;;  %v3481_v23 = vsel %vm8787_vm8, %v3479_v53, %v8786_v13  ;;  %v3993_v7 = vsel %vm605_vm9, %v3991_v18, %v8036_v48  ;;  %vm8791_vm10 = vcmask 883712   ;;  %vm8794_vm14 = vcmask 130048   ;;  %v8797_v53 = vld [vmem:[#allocation12_spill] sm:$0xff] }
 0x463   :  { %v3995_v51 = vsel %vm8781_vm13, %v3993_v7, %v3886_v9  ;;  %v8793_v9 = vld [vmem:[#allocation4_spill] sm:$0xff]  ;;  %vm8796_vm8 = vcmask 1031168   ;;  %vm8800_vm13 = vcmask 424960  }
 0x464   :  { %v8149_v28 = vpop.permute.xlu1 %4536  ;;  %v3372_v25 = vpop.permute.xlu0 %3371 }
 0x465   :  { %v3475_v24 = vsel %vm8783_vm12, %v3473_v56, %v3372_v25  ;;  %v3483_v56 = vsel %vm8789_vm11, %v3481_v23, %v7958_v30  ;;  %vm8790_vm12 = vcmask 572416   ;;  %v8792_v30 = vld [vmem:[#allocation9_spill] sm:$0xff]  ;;  %vm8798_vm11 = vcmask 277504  }
 0x466   :  { %3943 = vrot.lane.b32.xlu1 %v8152_v61, %s5742_s16  ;;  %v3477_v60 = vsel %vm8785_vm15, %v3475_v24, %v7753_v16  ;;  %5053 = vrot.lane.b32.xlu0 %v8162_v49, %s5738_s12  ;;  %v4574_v16 = vsel %vm596_vm6, %v8788_v6, %v7899_v27  ;;  %v3485_v52 = vsel %vm8790_vm12, %v3483_v56, %v8003_v63  ;;  %vm8795_vm15 = vcmask 441344   ;;  %v8805_v56 = vld [vmem:[#allocation10_spill] sm:$0xff] }
 0x467   :  { %v3505_v15 = vrot.slane %v3477_v60, 1  ;;  %v4576_v48 = vsel %vm599_vm7, %v4574_v16, %v7964_v22  ;;  %v8206_v27 = vrot.slane %v4987_v46, %v6006_v59  ;;  %v4001_v24 = vsel %vm8794_vm14, %v8793_v9, %v8792_v30 }
 0x468   :  { %v8186_v17 = vpop.permute.xlu1 %5123  ;;  %v3894_v25 = vpop.permute.xlu0 %3893  ;;  %v4578_v10 = vsel %vm8795_vm15, %v4576_v48, %v8006_v37  ;;  %v3487_v22 = vsel %vm629_vm1, %v3485_v52, %v8041_v38  ;;  %v4003_v18 = vsel %vm8798_vm11, %v4001_v24, %v8797_v53  ;;  %v8799_v37 = vld [vmem:[#allocation16_spill] sm:$0xff]  ;;  %vm8801_vm12 = vcmask 736256  }
 0x469   :  { %3517 = vst [vmem:[#allocation3 + $0x30] ss:$-20 sps:$4 sm:$0x83] %v3505_v15   ;;  %v3997_v14 = vsel %vm8791_vm10, %v3995_v51, %v3894_v25  ;;  %v4580_v46 = vsel %vm605_vm9, %v4578_v10, %v8044_v4  ;;  %v3489_v60 = vsel %vm632_vm2, %v3487_v22, %v8090_v1  ;;  %v5161_v38 = vsel %vm596_vm6, %v8799_v37, %v7913_v42  ;;  %v8815_v10 = vld [vmem:[#allocation14_spill] sm:$0xff] }
 0x46a   :  { %4530 = vrot.lane.b32.xlu1 %v8189_v54, %s5742_s16  ;;  %v3999_v63 = vsel %vm8796_vm8, %v3997_v14, %v8793_v9  ;;  %3365 = vrot.lane.b32.xlu0 %v3242_v3, %s5747_s21  ;;  %v4005_v7 = vsel %vm8800_vm13, %v4003_v18, %v7970_v21  ;;  %v4582_v3 = vsel %vm8801_vm12, %v4580_v46, %v8096_v26  ;;  %vm8802_vm10 = vcmask 572416   ;;  %v8804_v21 = vld [vmem:[#allocation7_spill] sm:$0xff] }
 0x46b   :  { %v4027_v13 = vrot.slane %v3999_v63, 6  ;;  %v5163_v1 = vsel %vm599_vm7, %v5161_v38, %v7974_v11  ;;  %v4007_v6 = vsel %vm8802_vm10, %v4005_v7, %v8014_v41  ;;  %vm8803_vm14 = vcmask 883712  }
 0x46c   :  { %v8224_v23 = vpop.permute.xlu1 %3435  ;;  %v4481_v4 = vpop.permute.xlu0 %4480  ;;  %vm8806_vm15 = vcmask 130048   ;;  %vm8807_vm8 = vcmask 441344   ;;  %v4009_v11 = vsel %vm629_vm1, %v4007_v6, %v8049_v55  ;;  %vm8808_vm11 = vcmask 1031168  }
 0x46d   :  { %v3491_v15 = vsel %vm635_vm3, %v3489_v60, %v8224_v23  ;;  %4039 = vst [vmem:[#allocation3 + $0x30] sm:$0x1c] %v4027_v13  ;;  %v4584_v42 = vsel %vm8803_vm14, %v4582_v3, %v4481_v4  ;;  %v4588_v26 = vsel %vm8806_vm15, %v8805_v56, %v8804_v21  ;;  %v5165_v51 = vsel %vm8807_vm8, %v5163_v1, %v8019_v32  ;;  %v8817_v60 = vld [vmem:[#allocation33_spill] sm:$0xff] }
 0x46e   :  { %v3506_v16 = vrot.slane %v3491_v15, 1  ;;  %5117 = vrot.lane.b32.xlu1 %v8206_v27, %s5742_s16  ;;  %v4586_v41 = vsel %vm8808_vm11, %v4584_v42, %v8805_v56  ;;  %3887 = vrot.lane.b32.xlu0 %v3764_v31, %s5747_s21  ;;  %vm8809_vm13 = vcmask 277504   ;;  %v5167_v48 = vsel %vm605_vm9, %v5165_v51, %v8052_v39  ;;  %v8820_v4 = vld [vmem:[#allocation5_spill] sm:$0xff]  ;;  %v8821_v42 = vld [vmem:[#allocation26_spill] sm:$0xff] }
 0x46f   :  { %v4590_v25 = vsel %vm8809_vm13, %v4588_v26, %v7928_v34  ;;  %v4011_v52 = vsel %vm632_vm2, %v4009_v11, %v8113_v57  ;;  %v4614_v14 = vrot.slane %v4586_v41, 3  ;;  %vm8810_vm12 = vcmask 424960  }
 0x470   :  { %3518 = vst [vmem:[#allocation3 + $0x38] ss:$-20 sps:$4 sm:$0x83] %v3506_v16   ;;  %v8258_v32 = vpop.permute.xlu1 %3957  ;;  %v4592_v55 = vsel %vm8810_vm12, %v4590_v25, %v7981_v20  ;;  %vm8811_vm10 = vcmask 736256   ;;  %v5068_v34 = vpop.permute.xlu0 %5067  ;;  %v4351_v39 = vcombine.high %v8127_v8, %v8734_v43  ;;  %vm8812_vm14 = vcmask 572416   ;;  %v8814_v20 = vld [vmem:[#allocation29_spill] sm:$0xff] }
 0x471   :  { %v5169_v30 = vsel %vm8811_vm10, %v5167_v48, %v8121_v2  ;;  %v4013_v31 = vsel %vm635_vm3, %v4011_v52, %v8258_v32  ;;  %v4594_v57 = vsel %vm8812_vm14, %v4592_v55, %v8025_v0  ;;  %4626 = vst [vmem:[#allocation3 + $0x30] sm:$0xe0] %v4614_v14  ;;  %vm8813_vm15 = vcmask 883712   ;;  %vm8818_vm10 = vmmov %vm8812_vm14  ;;  %v5208_v41 = vld [vmem:[#allocation3 + $0x18] sm:$0xff]  ;;  %v8822_v25 = vld [vmem:[#allocation17_spill] sm:$0xff] }
 0x472   :  { %v4028_v9 = vrot.slane %v4013_v31, 6  ;;  %v5171_v24 = vsel %vm8813_vm15, %v5169_v30, %v5068_v34  ;;  %3429 = vrot.lane.b32.xlu1 %v3309_v36, %s5750_s24  ;;  %vm8816_vm8 = vcmask 130048   ;;  %v4596_v22 = vsel %vm629_vm1, %v4594_v57, %v8059_v45  ;;  %4474 = vrot.lane.b32.xlu0 %v4351_v39, %s5747_s21  ;;  %v8823_v48 = vld [vmem:[#allocation18_spill] sm:$0xff]  ;;  %v8824_v14 = vld [vmem:[#allocation27_spill] sm:$0xff]  ;;  %v5205_v30 = vld [vmem:[#allocation3] sm:$0xff] }
 0x473   :  { %v5175_v2 = vsel %vm8816_vm8, %v8815_v10, %v8814_v20  ;;  %v5173_v63 = vsel %vm8808_vm11, %v5171_v24, %v8815_v10  ;;  %v4598_v8 = vsel %vm632_vm2, %v4596_v22, %v8149_v28  ;;  %v3831_v53 = vcombine.high %v8152_v61, %v8734_v43  ;;  %v8825_v34 = vld [vmem:[#allocation19_spill] sm:$0xff]  ;;  %v8826_v39 = vld [vmem:[#allocation20_spill] sm:$0xff]  ;;  %v8827_v22 = vld [vmem:[#allocation25_spill] sm:$0xff] }
 0x474   :  { %v5177_v0 = vsel %vm8809_vm13, %v5175_v2, %v7947_v19  ;;  %4040 = vst [vmem:[#allocation3 + $0x38] sm:$0x1c] %v4028_v9  ;;  %5195 = vst [vmem:[#allocation3 + $0x48] sm:$0x7] %v5173_v63  ;;  %v8284_v36 = vpop.permute.xlu1 %4544  ;;  %v8292_v46 = vpop.permute.xlu0 %3381  ;;  %v4938_v19 = vcombine.high %v8162_v49, %v8734_v43  ;;  %v4418_v49 = vcombine.high %v8189_v54, %v8734_v43  ;;  %vm5234_vm14 = vcmask 1042432  }
 0x475   :  { %v5179_v45 = vsel %vm8810_vm12, %v5177_v0, %v7991_v58  ;;  %v4600_v18 = vsel %vm635_vm3, %v4598_v8, %v8284_v36  ;;  %v5005_v15 = vcombine.high %v8206_v27, %v8734_v43  ;;  %v4401_v56 = vcombine.high %v8130_v40, %v8111_v33  ;;  %v5206_v33 = vld [vmem:[#allocation3 + $0x8] sm:$0xff]  ;;  %vm8831_vm11 = vmmov %vm8816_vm8 }
 0x476   :  { %v5181_v28 = vsel %vm8818_vm10, %v5179_v45, %v8817_v60  ;;  %v4615_v13 = vrot.slane %v4600_v18, 3  ;;  %3951 = vrot.lane.b32.xlu1 %v3831_v53, %s5750_s24  ;;  %5061 = vrot.lane.b32.xlu0 %v4938_v19, %s5747_s21  ;;  %v3311_v52 = vcombine.low %v8823_v48, %v8822_v25  ;;  %v4988_v40 = vcombine.high %v8133_v62, %v8143_v5  ;;  %v5698_v20 = vld [vmem:[#allocation2 + $0x5a] ss:$48 sps:$4 sm:$0x33]   ;;  %v8366_v5 = vld [vmem:[%s8640_s1] sm:$0xff]  ;;  %vm8832_vm12 = vmmov %vm8809_vm13 }
 0x477   :  { %v5183_v61 = vsel %vm629_vm1, %v5181_v28, %v8070_v35  ;;  %v8819_v35 = vld [vmem:[#allocation24_spill] sm:$0xff]  ;;  %v4415_v31 = vrot.slane %v4401_v56, %v6006_v59  ;;  %v4420_v57 = vcombine.low %v8826_v39, %v8825_v34  ;;  %vm8681_vm15 = vcmask 220160   ;;  %v8828_v19 = vld [vmem:[#allocation21_spill] sm:$0xff]  ;;  %v8829_v60 = vld [vmem:[#allocation22_spill] sm:$0xff] }
 0x478   :  { %v5185_v58 = vsel %vm632_vm2, %v5183_v61, %v8186_v17  ;;  %4627 = vst [vmem:[#allocation3 + $0x38] sm:$0xe0] %v4615_v13  ;;  %v8304_v37 = vpop.permute.xlu1 %5131  ;;  %v8310_v7 = vpop.permute.xlu0 %3443  ;;  %v3292_v17 = vcombine.high %v8068_v12, %v8079_v29  ;;  %v3814_v12 = vcombine.high %v8084_v47, %v8094_v44  ;;  %v5211_v47 = vld [vmem:[#allocation3 + $0x30] sm:$0xff]  ;;  %v5209_v11 = vld [vmem:[#allocation3 + $0x20] sm:$0xff]  ;;  %v3318_v62 = vrot.slane %v3311_v52, %v5982_v50  ;;  %vm8834_vm10 = vmmov %vm8816_vm8 }
 0x479   :  { %v5187_v38 = vsel %vm635_vm3, %v5185_v58, %v8304_v37  ;;  %v5002_v2 = vrot.slane %v4988_v40, %v6006_v59  ;;  %5640 = vmatprep.mubr.msk.f32.mxu1 %vm8681_vm15, %v8366_v5  ;;  %v4427_v0 = vrot.slane %v4420_v57, %v5982_v50  ;;  %v4419_v53 = vcombine.high %v4415_v31, %v8734_v43  ;;  %v3841_v18 = vld [vmem:[#allocation2 + $0x72] sm:$0x3] }
 0x47a   :  { %5196 = vst [vmem:[#allocation3 + $0x50] sm:$0x7] %v5187_v38  ;;  %4538 = vrot.lane.b32.xlu1 %v4418_v49, %s5750_s24  ;;  %3373 = vrot.lane.b32.xlu0 %v8819_v35, %s5739_s13  ;;  %v3306_v6 = vrot.slane %v3292_v17, %v6006_v59  ;;  %v3828_v44 = vrot.slane %v3814_v12, %v6006_v59  ;;  %v8830_v49 = vld [vmem:[#allocation23_spill] sm:$0xff] }
 0x47b   :  { %v5214_v27 = vld [vmem:[#allocation3 + $0x48] sm:$0x7]  ;;  %v3320_v63 = vcombine.low %v3318_v62, %v8827_v22  ;;  %v3840_v45 = vrot.slane %v5698_v20, %v5982_v50  ;;  %v5007_v28 = vcombine.low %v8829_v60, %v8828_v19  ;;  %v4429_v38 = vcombine.low %v4427_v0, %v8830_v49  ;;  %v8837_v20 = vld [vmem:[#allocation28_spill] sm:$0xff] }
 0x47c   :  { %v8317_v3 = vpop.permute.xlu1 %3389  ;;  %v8321_v54 = vpop.permute.xlu0 %3911  ;;  %v3310_v24 = vcombine.high %v3306_v6, %v8734_v43  ;;  %v3832_v61 = vcombine.high %v3828_v44, %v8734_v43  ;;  %v5006_v12 = vcombine.high %v5002_v2, %v8734_v43 }
 0x47d   :  { %v3327_v58 = vrot.slane %v3320_v63, %v6006_v59  ;;  %v3842_v17 = vcombine.low %v3840_v45, %v3841_v18  ;;  %v5203_v18 = vld [vmem:[%s8641_s2] sm:$0xff] }
 0x47e   :  { %5125 = vrot.lane.b32.xlu1 %v5005_v15, %s5750_s24  ;;  %3895 = vrot.lane.b32.xlu0 %v8820_v4, %s5739_s13  ;;  %v5014_v15 = vrot.slane %v5007_v28, %v5982_v50  ;;  %v3480_v4 = vsel %vm8816_vm8, %v8292_v46, %v8317_v3  ;;  %v8833_v3 = vld [vmem:[#allocation6_spill] sm:$0xff] }
 0x47f   :  { %v5212_v21 = vld [vmem:[#allocation3 + $0x38] sm:$0xff]  ;;  %v3849_v50 = vrot.slane %v3842_v17, %v6006_v59 }
 0x480   :  { %v8326_v1 = vpop.permute.xlu1 %3903  ;;  %v8331_v29 = vpop.permute.xlu0 %4490 }
 0x481   :  { %v5215_v16 = vld [vmem:[#allocation3 + $0x50] sm:$0x7] }
 0x482   :  { %3437 = vrot.lane.b32.xlu1 %v3306_v6, %s5743_s17  ;;  %5600 = vmatprep.subr.msk.mxu0 %vm5234_vm14, %v5215_v16  ;;  %v4436_v16 = vrot.slane %v4429_v38, %v6006_v59 }
 0x483   :  { %4482 = vrot.lane.b32.xlu0 %v8821_v42, %s5739_s13  ;;  %5601 = vmatpush1.msk.msra.mxu0 %vm5234_vm14, %v5214_v27  ;;  %v4002_v27 = vsel %vm8831_vm11, %v8326_v1, %v8321_v54  ;;  %v8413_v54 = vld [vmem:[%s8640_s1 + $0x8] sm:$0xff]  ;;  %vm8835_vm11 = vmmov %vm8832_vm12 }
 0x484   :  { %v8340_v26 = vpop.permute.xlu1 %3965  ;;  %5270 = vmatprep.subr.mxu0 %v5212_v21  ;;  %v8343_v51 = vpop.permute.xlu0 %4552  ;;  %v4437_v52 = vcombine.high %v4436_v16, %v8734_v43 }
 0x485   :  { %5271 = vmatpush1.msra.mxu0 %v5211_v47  ;;  %v5016_v47 = vcombine.low %v5014_v15, %v8833_v3  ;;  %v4015_v17 = vsel %vm638_vm4, %v8258_v32, %v8340_v26  ;;  %v4602_v15 = vsel %vm638_vm4, %v8284_v36, %v8343_v51 }
 0x486   :  { %3959 = vrot.lane.b32.xlu1 %v3828_v44, %s5743_s17  ;;  %5272 = vmatprep.subr.mxu0 %v5209_v11  ;;  %v3328_v11 = vcombine.high %v3327_v58, %v8734_v43 }
 0x487   :  { %5069 = vrot.lane.b32.xlu0 %v8824_v14, %s5739_s13  ;;  %5273 = vmatpush1.msra.mxu0 %v5208_v41  ;;  %v5023_v25 = vrot.slane %v5016_v47, %v6006_v59 }
 0x488   :  { %v8352_v55 = vpop.permute.xlu1 %4498  ;;  %5274 = vmatprep.subr.mxu0 %v5206_v33  ;;  %v8357_v9 = vpop.permute.xlu0 %5085  ;;  %v3850_v33 = vcombine.high %v3849_v50, %v8734_v43 }
 0x489   :  { %5275 = vmatpush1.msra.mxu0 %v5205_v30  ;;  %v4589_v40 = vsel %vm8834_vm10, %v8331_v29, %v8352_v55  ;;  %v5024_v57 = vcombine.high %v5023_v25, %v8734_v43  ;;  %vm8678_vm10 = vcmask 549888  }
 0x48a   :  { %4546 = vrot.lane.b32.xlu1 %v4415_v31, %s5743_s17  ;;  %5602 = vmatmul.mubr.msk.f32.vlgmr.msra.gmra.mxu0 %vm8681_vm15, %v8366_v5 }
 0x48b   :  { %3445 = vrot.lane.b32.xlu0 %v3310_v24, %s5751_s25  ;;  %5314 = vmatprep.mubr.f32.mxu0 %v8734_v43 }
 0x48c   :  { %v8368_v10 = vpop.permute.xlu1 %5077  ;;  %v3334_v8 = vpop.permute.xlu0 %3333 }
 0x48d   :  { %v5176_v59 = vsel %vm8816_vm8, %v8368_v10, %v8357_v9  ;;  %v3466_v62 = vsel %vm596_vm6, %v8837_v20, %v3334_v8  ;;  %v3493_v9 = vsel %vm638_vm4, %v8224_v23, %v8310_v7  ;;  %v5753_v8 = vmov 0   ;;  %v5204_v23 = vld [vmem:[%s8641_s2 + $0x8] sm:$0xff] }
 0x48e   :  { %5133 = vrot.lane.b32.xlu1 %v5002_v2, %s5743_s17  ;;  %5603 = vmatmul.mubr.msk.f32.gmra.mxu0 %vm8681_vm15, %v8413_v54  ;;  %vm8838_vm8 = vcmask 424960  }
 0x48f   :  { %4554 = vrot.lane.b32.xlu0 %v4419_v53, %s5751_s25  ;;  %5495 = vmatprep.mubr.f32.mxu0 %v8734_v43 }
 0x490   :  { %v8384_v13 = vpop.permute.xlu1 %5139  ;;  %v3452_v35 = vpop.permute.xlu0 %3451  ;;  %5677 = vset.pattern.permute.xlu0 %v5753_v8  ;;  %5678 = vset.pattern.permute.xlu1 %v5753_v8 }
 0x491   :  { %v3495_v63 = vsel %vm641_vm5, %v3493_v9, %v3452_v35  ;;  %v5189_v47 = vsel %vm638_vm4, %v8304_v37, %v8384_v13 }
 0x492   :  { %3967 = vrot.lane.b32.xlu1 %v3832_v61, %s5751_s25 }
 0x493   :  { %3453 = vrot.lane.b32.xlu0 %v3327_v58, %s5744_s18  ;;  %v8840_v58 = vld [vmem:[#allocation31_spill] sm:$0xff] }
 0x494   :  { %v3398_v6 = vpop.permute.xlu1 %3397  ;;  %v3920_v21 = vpop.permute.xlu0 %3919 }
 0x495   :  { %v3482_v42 = vsel %vm8809_vm13, %v3480_v4, %v3398_v6  ;;  %v4004_v56 = vsel %vm8832_vm12, %v4002_v27, %v3920_v21  ;;  %vm8836_vm13 = vmmov %vm8835_vm11  ;;  %vm8682_vm12 = vcmask 556039  }
 0x496   :  { %5141 = vrot.lane.b32.xlu1 %v5006_v12, %s5751_s25 }
 0x497   :  { %4562 = vrot.lane.b32.xlu0 %v4436_v16, %s5744_s18 }
 0x498   :  { %v8406_v44 = vpop.permute.xlu1 %3855  ;;  %v4443_v41 = vpop.permute.xlu0 %4442 }
 0x499   :  { %v4575_v49 = vsel %vm596_vm6, %v8840_v58, %v4443_v41 }
 0x49a   :  { %3975 = vrot.lane.b32.xlu1 %v3849_v50, %s5744_s18 }
 0x49b   :  { %3461 = vrot.lane.b32.xlu0 %v3328_v11, %s5752_s26 }
 0x49c   :  { %v3974_v48 = vpop.permute.xlu1 %3973  ;;  %v4561_v14 = vpop.permute.xlu0 %4560 }
 0x49d   :  { %v4017_v4 = vsel %vm641_vm5, %v4015_v17, %v3974_v48  ;;  %v4604_v12 = vsel %vm641_vm5, %v4602_v15, %v4561_v14 }
 0x49e   :  { %5149 = vrot.lane.b32.xlu1 %v5023_v25, %s5744_s18 }
 0x49f   :  { %4570 = vrot.lane.b32.xlu0 %v4437_v52, %s5752_s26 }
 0x4a0   :  { %v4507_v30 = vpop.permute.xlu1 %4506  ;;  %v5094_v34 = vpop.permute.xlu0 %5093 }
 0x4a1   :  { %v4591_v31 = vsel %vm8835_vm11, %v4589_v40, %v4507_v30  ;;  %v5178_v39 = vsel %vm8836_vm13, %v5176_v59, %v5094_v34  ;;  %vm8839_vm11 = vmmov %vm8838_vm8  ;;  %vm8679_vm13 = vcmask 552962   ;;  %v5207_v34 = vld [vmem:[#allocation3 + $0x10] sm:$0xff] }
 0x4a2   :  { %3983 = vrot.lane.b32.xlu1 %v3850_v33, %s5752_s26 }
 0x4a3   :  { %5219 = vperm.xlu0 %5677, %v5203_v18  }
 0x4a4   :  { %v8434_v24 = vpop.permute.xlu1 %5029  ;;  %v3342_v55 = vpop.permute.xlu0 %3341 }
 0x4a5   :  { %v8439_v2 = vsel %vm599_vm7, %v3466_v62, %v3342_v55 }
 0x4a6   :  { %5157 = vrot.lane.b32.xlu1 %v5024_v57, %s5752_s26 }
 0x4a8   :  { %v5148_v22 = vpop.permute.xlu1 %5147  ;;  %v3460_v0 = vpop.permute.xlu0 %3459 }
 0x4a9   :  { %v3497_v53 = vsel %vm644_vm0, %v3495_v63, %v3460_v0  ;;  %v5191_v11 = vsel %vm641_vm5, %v5189_v47, %v5148_v22 }
 0x4aa   :  { %v3507_v45 = vrot.slane %v3497_v53, 1  ;;  %5224 = vperm.xlu1 %5678, %v5204_v23  }
 0x4ac   :  { %v3406_v7 = vpop.permute.xlu1 %3405  ;;  %3520 = vst.msk [vmem:[#allocation3 + $0x28] sm:$0x80] %vm8682_vm12, %v3507_v45  ;;  %v3928_v60 = vpop.permute.xlu0 %3927 }
 0x4ad   :  { %3524 = vst.msk [vmem:[#allocation3 + $0x40] sm:$0x3] %vm8678_vm10, %v3507_v45  ;;  %v8456_v19 = vsel %vm8838_vm8, %v3482_v42, %v3406_v7  ;;  %v8459_v28 = vsel %vm8839_vm11, %v4004_v56, %v3928_v60  ;;  %vm8680_vm8 = vcmask 556037   ;;  %vm8841_vm10 = vmmov %vm8839_vm11 }
 0x4b0   :  { %v8461_v61 = vpop.permute.xlu1 %3863  ;;  %v4451_v38 = vpop.permute.xlu0 %4450 }
 0x4b1   :  { %v8466_v35 = vsel %vm599_vm7, %v4575_v49, %v4451_v38  ;;  %v8844_v49 = vld [vmem:[#allocation30_spill] sm:$0xff] }
 0x4b2   :  { %v3988_v38 = vsel %vm596_vm6, %v8844_v49, %v8406_v44 }
 0x4b4   :  { %v3982_v6 = vpop.permute.xlu1 %3981  ;;  %v4569_v27 = vpop.permute.xlu0 %4568 }
 0x4b5   :  { %v4019_v16 = vsel %vm644_vm0, %v4017_v4, %v3982_v6  ;;  %v4606_v21 = vsel %vm644_vm0, %v4604_v12, %v4569_v27  ;;  %v3990_v4 = vsel %vm599_vm7, %v3988_v38, %v8461_v61 }
 0x4b6   :  { %v4029_v42 = vrot.slane %v4019_v16, 6  ;;  %v4616_v56 = vrot.slane %v4606_v21, 3 }
 0x4b8   :  { %4042 = vst.msk [vmem:[#allocation3 + $0x40] sm:$0x1c] %vm8679_vm13, %v4029_v42  ;;  %v4515_v32 = vpop.permute.xlu1 %4514  ;;  %v5102_v26 = vpop.permute.xlu0 %5101  ;;  %vm8842_vm13 = vcmask 550912  }
 0x4b9   :  { %4629 = vst.msk [vmem:[#allocation3 + $0x40] sm:$0xe0] %vm8680_vm8, %v4616_v56  ;;  %v8481_v36 = vsel %vm8839_vm11, %v4591_v31, %v4515_v32  ;;  %v8484_v51 = vsel %vm8841_vm10, %v5178_v39, %v5102_v26  ;;  %v5210_v31 = vld [vmem:[#allocation3 + $0x28] sm:$0xff]  ;;  %vm8843_vm10 = vcmask 441344   ;;  %vm8846_vm11 = vcmask 883712  }
 0x4ba   :  { %vm8847_vm8 = vmmov %vm8843_vm10 }
 0x4bb   :  { %vm8851_vm12 = vmmov %vm8846_vm11 }
 0x4bc   :  { %v8486_v50 = vpop.permute.xlu1 %5037  ;;  %v3350_v3 = vpop.permute.xlu0 %3349 }
 0x4bd   :  { %v3470_v7 = vsel %vm8843_vm10, %v8439_v2, %v3350_v3 }
 0x4c0   :  { %v5156_v41 = vpop.permute.xlu1 %5155  ;;  %v3872_v48 = vpop.permute.xlu0 %3871  ;;  %v5213_v37 = vld [vmem:[#allocation3 + $0x40] sm:$0xff] }
 0x4c1   :  { %v5193_v25 = vsel %vm644_vm0, %v5191_v11, %v5156_v41  ;;  %v3992_v12 = vsel %vm8847_vm8, %v3990_v4, %v3872_v48 }
 0x4c2   :  { %5197 = vst.msk [vmem:[#allocation3 + $0x58] sm:$0x7] %vm8842_vm13, %v5193_v25  ;;  %vm8845_vm13 = vcmask 736256   ;;  %v8853_v25 = vld [vmem:[#allocation32_spill] sm:$0xff] }
 0x4c3   :  { %vm8849_vm10 = vmmov %vm8845_vm13 }
 0x4c4   :  { %v3414_v52 = vpop.permute.xlu1 %3413  ;;  %v4459_v14 = vpop.permute.xlu0 %4458 }
 0x4c8   :  { %v8494_v33 = vpop.permute.xlu1 %3935  ;;  %v8496_v40 = vpop.permute.xlu0 %5045 }
 0x4c9   :  { %v5216_v30 = vld [vmem:[#allocation3 + $0x58] sm:$0x7] }
 0x4ca   :  { %5632 = vmatprep.subr.msk.mxu1 %vm5234_vm14, %v5216_v30 }
 0x4cb   :  { %5633 = vmatpush3.msk.msra.mxu1 %vm5234_vm14, %v5216_v30 }
 0x4cc   :  { %v8500_v13 = vpop.permute.xlu1 %4522  ;;  %5634 = vmatprep.subr.mxu1 %v5213_v37  ;;  %v3358_v59 = vpop.permute.xlu0 %3357 }
 0x4cd   :  { %5635 = vmatpush3.msra.mxu1 %v5213_v37  ;;  %v3472_v60 = vsel %vm605_vm9, %v3470_v7, %v3358_v59 }
 0x4ce   :  { %5636 = vmatprep.subr.mxu1 %v5210_v31 }
 0x4cf   :  { %5637 = vmatpush3.msra.mxu1 %v5210_v31 }
 0x4d0   :  { %v8502_v39 = vpop.permute.xlu1 %5109  ;;  %5638 = vmatprep.subr.mxu1 %v5207_v34  ;;  %v3880_v57 = vpop.permute.xlu0 %3879 }
 0x4d1   :  { %5639 = vmatpush3.msra.mxu1 %v5207_v34  ;;  %v3994_v16 = vsel %vm605_vm9, %v3992_v12, %v3880_v57 }
 0x4d2   :  { %5641 = vmatmul.mubr.msk.f32.vlgmr.msra.gmra.mxu1 %vm8681_vm15, %v8413_v54 }
 0x4d3   :  { %5651 = vmatprep.mubr.msk.f32.mxu1 %vm8681_vm15, %v8366_v5  ;;  %vm8848_vm15 = vcmask 1031168  }
 0x4d4   :  { %v3422_v20 = vpop.permute.xlu1 %3421  ;;  %v4467_v62 = vpop.permute.xlu0 %4466 }
 0x4d8   :  { %v3944_v55 = vpop.permute.xlu1 %3943  ;;  %v5054_v9 = vpop.permute.xlu0 %5053 }
 0x4dc   :  { %v4531_v22 = vpop.permute.xlu1 %4530  ;;  %v3366_v63 = vpop.permute.xlu0 %3365 }
 0x4dd   :  { %v3474_v17 = vsel %vm8845_vm13, %v3472_v60, %v3366_v63  ;;  %vm8850_vm13 = vcmask 572416  }
 0x4de   :  { %v3486_v56 = vsel %vm8850_vm13, %v8456_v19, %v3414_v52  ;;  %v5162_v19 = vsel %vm596_vm6, %v8853_v25, %v8434_v24  ;;  %vm8858_vm6 = vmmov %vm8848_vm15 }
 0x4df   :  { %v3488_v26 = vsel %vm629_vm1, %v3486_v56, %v3422_v20 }
 0x4e0   :  { %v8508_v0 = vpop.permute.xlu1 %5117  ;;  %v3888_v53 = vpop.permute.xlu0 %3887 }
 0x4e1   :  { %v3996_v21 = vsel %vm8849_vm10, %v3994_v16, %v3888_v53 }
 0x4e4   :  { %v3430_v45 = vpop.permute.xlu1 %3429  ;;  %v4475_v8 = vpop.permute.xlu0 %4474 }
 0x4e5   :  { %v3490_v47 = vsel %vm632_vm2, %v3488_v26, %v3430_v45 }
 0x4e8   :  { %v3952_v18 = vpop.permute.xlu1 %3951  ;;  %v5062_v23 = vpop.permute.xlu0 %5061 }
 0x4ec   :  { %v4539_v58 = vpop.permute.xlu1 %4538  ;;  %v3374_v15 = vpop.permute.xlu0 %3373 }
 0x4ed   :  { %v3476_v6 = vsel %vm8846_vm11, %v3474_v17, %v3374_v15  ;;  %vm8852_vm11 = vmmov %vm8847_vm8 }
 0x4ee   :  { %v3478_v2 = vsel %vm8848_vm15, %v3476_v6, %v8292_v46  ;;  %v4579_v32 = vsel %vm8852_vm11, %v8466_v35, %v4459_v14  ;;  %vm8854_vm8 = vmmov %vm8849_vm10  ;;  %v5164_v14 = vsel %vm599_vm7, %v5162_v19, %v8486_v50  ;;  %vm8856_vm10 = vcmask 883712  }
 0x4ef   :  { %v3508_v27 = vrot.slane %v3478_v2, 1  ;;  %v4581_v3 = vsel %vm605_vm9, %v4579_v32, %v4467_v62  ;;  %vm8859_vm7 = vmmov %vm8854_vm8  ;;  %v5410_v32 = vld [vmem:[#allocation3 + $0x60] sm:$0xff] }
 0x4f0   :  { %v5126_v42 = vpop.permute.xlu1 %5125  ;;  %v3896_v44 = vpop.permute.xlu0 %3895  ;;  %v4583_v48 = vsel %vm8854_vm8, %v4581_v3, %v4475_v8 }
 0x4f1   :  { %3525 = vst [vmem:[#allocation3 + $0x90] ss:$-20 sps:$4 sm:$0x83] %v3508_v27   ;;  %v3998_v61 = vsel %vm8851_vm12, %v3996_v21, %v3896_v44  ;;  %vm8855_vm12 = vmmov %vm8850_vm13  ;;  %v5411_v44 = vld [vmem:[#allocation3 + $0x68] sm:$0xff] }
 0x4f2   :  { %v4000_v46 = vsel %vm8848_vm15, %v3998_v61, %v8326_v1  ;;  %v4008_v1 = vsel %vm8855_vm12, %v8459_v28, %v8494_v33  ;;  %vm8857_vm13 = vmmov %vm8852_vm11 }
 0x4f3   :  { %v4030_v11 = vrot.slane %v4000_v46, 6  ;;  %v5166_v59 = vsel %vm8857_vm13, %v5164_v14, %v8496_v40  ;;  %v4010_v24 = vsel %vm629_vm1, %v4008_v1, %v3944_v55  ;;  %vm8860_vm11 = vmmov %vm8855_vm12  ;;  %vm8867_vm12 = vcmask 556037  }
 0x4f4   :  { %v3438_v41 = vpop.permute.xlu1 %3437  ;;  %v5168_v34 = vsel %vm605_vm9, %v5166_v59, %v5054_v9  ;;  %v4012_v50 = vsel %vm632_vm2, %v4010_v24, %v3952_v18  ;;  %v4595_v40 = vsel %vm8860_vm11, %v8481_v36, %v8500_v13  ;;  %vm8861_vm15 = vmmov %vm8856_vm10  ;;  %vm8869_vm13 = vcmask 552962  }
 0x4f5   :  { %v3492_v52 = vsel %vm635_vm3, %v3490_v47, %v3438_v41  ;;  %v4483_v35 = vpop.permute.xlu0 %4482  ;;  %4043 = vst [vmem:[#allocation3 + $0x90] sm:$0x1c] %v4030_v11  ;;  %v5170_v28 = vsel %vm8859_vm7, %v5168_v34, %v5062_v23  ;;  %v4597_v9 = vsel %vm629_vm1, %v4595_v40, %v4531_v22  ;;  %vm8862_vm9 = vmmov %vm8858_vm6 }
 0x4f6   :  { %v3509_v30 = vrot.slane %v3492_v52, 1  ;;  %v4585_v37 = vsel %vm8856_vm10, %v4583_v48, %v4483_v35  ;;  %v4599_v53 = vsel %vm632_vm2, %v4597_v9, %v4539_v58  ;;  %vm8863_vm8 = vmmov %vm8860_vm11 }
 0x4f7   :  { %v4587_v31 = vsel %vm8858_vm6, %v4585_v37, %v8331_v29  ;;  %v5182_v36 = vsel %vm8863_vm8, %v8484_v51, %v8502_v39  ;;  %vm8870_vm6 = vcmask 550912   ;;  %v5412_v37 = vld [vmem:[#allocation3 + $0x70] sm:$0xff] }
 0x4f8   :  { %3526 = vst [vmem:[#allocation3 + $0x98] ss:$-20 sps:$4 sm:$0x83] %v3509_v30   ;;  %v4617_v57 = vrot.slane %v4587_v31, 3  ;;  %v3960_v20 = vpop.permute.xlu1 %3959  ;;  %v5184_v23 = vsel %vm629_vm1, %v5182_v36, %v8508_v0  ;;  %vm8864_vm1 = vcmask 556039  }
 0x4f9   :  { %v4014_v33 = vsel %vm635_vm3, %v4012_v50, %v3960_v20  ;;  %v5070_v62 = vpop.permute.xlu0 %5069  ;;  %v5186_v22 = vsel %vm632_vm2, %v5184_v23, %v5126_v42  ;;  %v5413_v42 = vld [vmem:[#allocation3 + $0x78] sm:$0xff]  ;;  %vm8865_vm2 = vcmask 549888  }
 0x4fa   :  { %4630 = vst [vmem:[#allocation3 + $0x90] sm:$0xe0] %v4617_v57  ;;  %v4031_v55 = vrot.slane %v4014_v33, 6  ;;  %v5172_v29 = vsel %vm8861_vm15, %v5170_v28, %v5070_v62 }
 0x4fb   :  { %v5174_v63 = vsel %vm8862_vm9, %v5172_v29, %v8368_v10 }
 0x4fc   :  { %4044 = vst [vmem:[#allocation3 + $0x98] sm:$0x1c] %v4031_v55  ;;  %5198 = vst [vmem:[#allocation3 + $0xa8] sm:$0x7] %v5174_v63  ;;  %v4547_v45 = vpop.permute.xlu1 %4546 }
 0x4fd   :  { %v4601_v8 = vsel %vm635_vm3, %v4599_v53, %v4547_v45  ;;  %v3446_v18 = vpop.permute.xlu0 %3445 }
 0x4fe   :  { %v4618_v13 = vrot.slane %v4601_v8, 3  ;;  %v3494_v0 = vsel %vm638_vm4, %v3438_v41, %v3446_v18 }
 0x4ff   :  { %v5414_v16 = vld [vmem:[#allocation3 + $0x80] sm:$0xff] }
 0x500   :  { %4631 = vst [vmem:[#allocation3 + $0x98] sm:$0xe0] %v4618_v13  ;;  %v5134_v10 = vpop.permute.xlu1 %5133 }
 0x501   :  { %v5188_v7 = vsel %vm635_vm3, %v5186_v22, %v5134_v10  ;;  %v4555_v60 = vpop.permute.xlu0 %4554  ;;  %v5416_v6 = vld [vmem:[#allocation3 + $0x90] sm:$0xff]  ;;  %vm8866_vm3 = vcmask 220160  }
 0x502   :  { %5199 = vst [vmem:[#allocation3 + $0xb0] sm:$0x7] %v5188_v7  ;;  %v4603_v56 = vsel %vm638_vm4, %v4547_v45, %v4555_v60  ;;  %vm8868_vm10 = vmmov %vm8866_vm3 }
 0x503   :  { %v5419_v51 = vld [vmem:[#allocation3 + $0xa8] sm:$0x7] }
 0x504   :  { %v3968_v58 = vpop.permute.xlu1 %3967 }
 0x505   :  { %v3454_v49 = vpop.permute.xlu0 %3453  ;;  %v4016_v47 = vsel %vm638_vm4, %v3960_v20, %v3968_v58 }
 0x506   :  { %v3496_v12 = vsel %vm641_vm5, %v3494_v0, %v3454_v49 }
 0x507   :  { %v5417_v39 = vld [vmem:[#allocation3 + $0x98] sm:$0xff] }
 0x508   :  { %v5142_v38 = vpop.permute.xlu1 %5141 }
 0x509   :  { %v4563_v17 = vpop.permute.xlu0 %4562  ;;  %v5420_v15 = vld [vmem:[#allocation3 + $0xb0] sm:$0x7]  ;;  %v5190_v52 = vsel %vm638_vm4, %v5134_v10, %v5142_v38  ;;  %vm8871_vm4 = vmmov %vm8866_vm3 }
 0x50a   :  { %5607 = vmatprep.subr.msk.mxu0 %vm5234_vm14, %v5420_v15  ;;  %v4605_v26 = vsel %vm641_vm5, %v4603_v56, %v4563_v17 }
 0x50b   :  { %5608 = vmatpush1.msk.msra.mxu0 %vm5234_vm14, %v5419_v51 }
 0x50c   :  { %v3976_v4 = vpop.permute.xlu1 %3975  ;;  %5457 = vmatprep.subr.mxu0 %v5417_v39 }
 0x50d   :  { %v3462_v2 = vpop.permute.xlu0 %3461  ;;  %5458 = vmatpush1.msra.mxu0 %v5416_v6  ;;  %v4018_v41 = vsel %vm641_vm5, %v4016_v47, %v3976_v4 }
 0x50e   :  { %v3498_v27 = vsel %vm644_vm0, %v3496_v12, %v3462_v2  ;;  %5459 = vmatprep.subr.mxu0 %v5414_v16 }
 0x50f   :  { %v3510_v21 = vrot.slane %v3498_v27, 1  ;;  %5460 = vmatpush1.msra.mxu0 %v5413_v42 }
 0x510   :  { %v5150_v61 = vpop.permute.xlu1 %5149  ;;  %5461 = vmatprep.subr.mxu0 %v5411_v44 }
 0x511   :  { %3527 = vst.msk [vmem:[#allocation3 + $0x88] sm:$0x80] %vm8864_vm1, %v3510_v21  ;;  %v4571_v46 = vpop.permute.xlu0 %4570  ;;  %5462 = vmatpush1.msra.mxu0 %v5410_v32 }
 0x512   :  { %3530 = vst.msk [vmem:[#allocation3 + $0xa0] sm:$0x3] %vm8865_vm2, %v3510_v21  ;;  %v4607_v3 = vsel %vm644_vm0, %v4605_v26, %v4571_v46  ;;  %5609 = vmatmul.mubr.msk.f32.vlgmr.msra.gmra.mxu0 %vm8866_vm3, %v8366_v5  ;;  %v5192_v5 = vsel %vm641_vm5, %v5190_v52, %v5150_v61 }
 0x513   :  { %v4619_v11 = vrot.slane %v4607_v3, 3  ;;  %5501 = vmatprep.mubr.f32.mxu0 %v8734_v43 }
 0x514   :  { %v3984_v25 = vpop.permute.xlu1 %3983 }
 0x515   :  { %4632 = vst.msk [vmem:[#allocation3 + $0xa0] sm:$0xe0] %vm8867_vm12, %v4619_v11  ;;  %v4020_v19 = vsel %vm644_vm0, %v4018_v41, %v3984_v25 }
 0x516   :  { %v4032_v48 = vrot.slane %v4020_v19, 6  ;;  %5610 = vmatmul.mubr.msk.f32.gmra.mxu0 %vm8868_vm10, %v8413_v54 }
 0x518   :  { %4045 = vst.msk [vmem:[#allocation3 + $0xa0] sm:$0x1c] %vm8869_vm13, %v4032_v48  ;;  %v5158_v35 = vpop.permute.xlu1 %5157  ;;  %v5415_v30 = vld [vmem:[#allocation3 + $0x88] sm:$0xff] }
 0x519   :  { %v5194_v43 = vsel %vm644_vm0, %v5192_v5, %v5158_v35  ;;  %vm5404_vm0 = vcmask 556032  }
 0x51a   :  { %5200 = vst.msk [vmem:[#allocation3 + $0xb8] sm:$0x7] %vm8870_vm6, %v5194_v43 }
 0x51e   :  { %v5220_v59 = vpop.permute.xlu0 %5219 }
 0x51f   :  { %v5418_v1 = vld [vmem:[#allocation3 + $0xa0] sm:$0xff] }
 0x521   :  { %v5421_v14 = vld [vmem:[#allocation3 + $0xb8] sm:$0x7] }
 0x522   :  { %5643 = vmatprep.subr.msk.mxu1 %vm5234_vm14, %v5421_v14 }
 0x523   :  { %5644 = vmatpush3.msk.msra.mxu1 %vm5234_vm14, %v5421_v14 }
 0x524   :  { %5645 = vmatprep.subr.mxu1 %v5418_v1 }
 0x525   :  { %5646 = vmatpush3.msra.mxu1 %v5418_v1  ;;  %v5225_v57 = vpop.permute.xlu1 %5224 }
 0x526   :  { %5647 = vmatprep.subr.mxu1 %v5415_v30 }
 0x527   :  { %5648 = vmatpush3.msra.mxu1 %v5415_v30 }
 0x528   :  { %5649 = vmatprep.subr.mxu1 %v5412_v37 }
 0x529   :  { %5650 = vmatpush3.msra.mxu1 %v5412_v37 }
 0x52a   :  { %5652 = vmatmul.mubr.msk.f32.vlgmr.msra.gmra.mxu1 %vm8871_vm4, %v8413_v54 }
 0x54a   :  { %v5310_v24 = vpop.f32.mrf.mxu0 }
 0x54b   :  { %v5311_v31 = vadd.f32 %v5310_v24, %v5220_v59 }
 0x54c   :  { %v5312_v34 = vpop.f32.mrf.mxu0 }
 0x54d   :  { %v5313_v50 = vadd.f32 %v5312_v34, %v5220_v59  ;;  %5699 = vtanh.f32 %v5311_v31 }
 0x54e   :  { %v5316_v20 = vpop.f32.mrf.mxu0 }
 0x54f   :  { %5701 = vtanh.f32 %v5313_v50  ;;  %v5317_v33 = vadd.f32 %v5316_v20, %v5225_v57 }
 0x550   :  { %v5318_v62 = vpop.f32.mrf.mxu0 }
 0x551   :  { %5703 = vtanh.f32 %v5317_v33  ;;  %v5319_v55 = vadd.f32 %v5318_v62, %v5225_v57 }
 0x553   :  { %5705 = vtanh.f32 %v5319_v55 }
 0x55a   :  { %v5700_v28 = vpop.eup %5699 }
 0x55b   :  { %5402 = vst [vmem:[%s8642_s3] sm:$0xff] %v5700_v28 }
 0x55c   :  { %v5702_v40 = vpop.eup %5701 }
 0x55d   :  { %5403 = vst [vmem:[%s8642_s3 + $0x8] sm:$0xff] %v5702_v40 }
 0x55e   :  { %v5704_v54 = vpop.eup %5703 }
 0x55f   :  { %5406 = vst [vmem:[%s8642_s3 + $0x18] sm:$0xff] %v5704_v54 }
 0x560   :  { %v5706_v29 = vpop.eup %5705 }
 0x561   :  { %5407 = vst [vmem:[%s8642_s3 + $0x20] sm:$0xff] %v5706_v29 }
 0x592   :  { %v5642_v9 = vpop.f32.mrf.mxu1 }
 0x593   :  { %v5393_v63 = vadd.f32 %v5642_v9, %v5225_v57 }
 0x594   :  { %v5387_v53 = vpop.f32.mrf.mxu1 }
 0x595   :  { %5707 = vtanh.f32 %v5393_v63  ;;  %v5388_v45 = vadd.f32 %v5387_v53, %v5220_v59 }
 0x597   :  { %5709 = vtanh.f32 %v5388_v45 }
 0x5a2   :  { %v5708_v8 = vpop.eup %5707 }
 0x5a3   :  { %5408 = vst.msk [vmem:[%s8642_s3 + $0x28] sm:$0xff] %vm5404_vm0, %v5708_v8 }
 0x5a4   :  { %v5710_v18 = vpop.eup %5709 }
 0x5a5   :  { %5405 = vst.msk [vmem:[%s8642_s3 + $0x10] sm:$0xff] %vm5404_vm0, %v5710_v18 }
 0x5d2   :  { %v5497_v36 = vpop.f32.mrf.mxu0 }
 0x5d3   :  { %v5498_v13 = vadd.f32 %v5497_v36, %v5220_v59 }
 0x5d4   :  { %v5499_v23 = vpop.f32.mrf.mxu0 }
 0x5d5   :  { %5711 = vtanh.f32 %v5498_v13  ;;  %v5500_v22 = vadd.f32 %v5499_v23, %v5220_v59 }
 0x5d6   :  { %v5503_v10 = vpop.f32.mrf.mxu0 }
 0x5d7   :  { %5713 = vtanh.f32 %v5500_v22  ;;  %v5504_v7 = vadd.f32 %v5503_v10, %v5225_v57 }
 0x5d8   :  { %v5505_v60 = vpop.f32.mrf.mxu0 }
 0x5d9   :  { %5715 = vtanh.f32 %v5504_v7  ;;  %v5506_v58 = vadd.f32 %v5505_v60, %v5225_v57 }
 0x5db   :  { %5717 = vtanh.f32 %v5506_v58 }
 0x5e2   :  { %v5712_v49 = vpop.eup %5711 }
 0x5e3   :  { %5614 = vst [vmem:[%s8642_s3 + $0x30] sm:$0xff] %v5712_v49 }
 0x5e4   :  { %v5714_v38 = vpop.eup %5713 }
 0x5e5   :  { %5615 = vst [vmem:[%s8642_s3 + $0x38] sm:$0xff] %v5714_v38 }
 0x5e6   :  { %v5716_v17 = vpop.eup %5715 }
 0x5e7   :  { %5617 = vst [vmem:[%s8642_s3 + $0x48] sm:$0xff] %v5716_v17 }
 0x5e8   :  { %v5718_v15 = vpop.eup %5717 }
 0x5e9   :  { %5618 = vst [vmem:[%s8642_s3 + $0x50] sm:$0xff] %v5718_v15 }
 0x5ea   :  { %v5653_v51 = vpop.f32.mrf.mxu1 }
 0x5eb   :  { %v5580_v39 = vadd.f32 %v5653_v51, %v5225_v57 }
 0x5ec   :  { %v5574_v0 = vpop.f32.mrf.mxu1 }
 0x5ed   :  { %5719 = vtanh.f32 %v5580_v39  ;;  %v5575_v4 = vadd.f32 %v5574_v0, %v5220_v59 }
 0x5ef   :  { %5721 = vtanh.f32 %v5575_v4 }
 0x5fa   :  { %v5720_v6 = vpop.eup %5719 }
 0x5fb   :  { %5619 = vst.msk [vmem:[%s8642_s3 + $0x58] sm:$0xff] %vm5404_vm0, %v5720_v6 }
 0x5fc   :  { %v5722_v12 = vpop.eup %5721 }
 0x5fd   :  { %5616 = vst.msk [vmem:[%s8642_s3 + $0x40] sm:$0xff] %vm5404_vm0, %v5722_v12 }

</bundles_post_ra>
